<compile_context>
chip_gen: v7x
topology: tpu7x:2x2x1
jax: 0.10.0
libtpu: 0.0.40
codegen_flags: <defaults>
</compile_context>

<pallas_src>
import numpy as np
import jax
import jax.numpy as jnp
from jax.experimental import pallas as pl
from jax.experimental.pallas import tpu as pltpu

# ---------------- static geometry (MNIST 28x28, three conv/pool stages) ----------------
CIN  = (1, 16, 32)
COUT = (16, 32, 64)
HP   = (30, 16, 9)       # padded heights  (H+2)
WP   = (30, 16, 9)       # padded widths   (W+2)
HQ   = (14, 7, 3)        # pooled heights
WQ   = (14, 7, 3)        # pooled widths
UP   = (512, 128, 128)   # per-phase matmul lane width  (>= Hq*Wp, multiple of 128)
LP   = (640, 256, 256)   # parity-plane lane length     (>= max slice end, multiple of 128)


def _reflect(v, n):
    if v < 0:
        return -v
    if v >= n:
        return 2 * n - 2 - v
    return v


def _handoff_matrix(hq, wq, wp_src, up_src, wp_dst, lp_dst):
    """0/1 matrix G with pooled_layout(C, up_src) @ G == [fe_next | fo_next] (C, 2*lp_dst).

    Source layout: lane u = i*wp_src + j holds pooled[i, j] (valid for i<hq, j<wq).
    Destination: parity-split flattening of ReflectionPad2d(1)(pooled), width wp_dst=wq+2.
    Junk source lanes never receive a 1, padded destination lanes stay exactly zero.
    """
    g = np.zeros((up_src, 2 * lp_dst), np.float32)
    for y in range(hq + 2):
        for x in range(wp_dst):
            flat = y * wp_dst + x
            u = _reflect(y - 1, hq) * wp_src + _reflect(x - 1, wq)
            g[u, (flat % 2) * lp_dst + flat // 2] = 1.0
    return g


_G12 = _handoff_matrix(HQ[0], WQ[0], WP[0], UP[0], WP[1], LP[1])   # (512, 512)
_G23 = _handoff_matrix(HQ[1], WQ[1], WP[1], UP[1], WP[2], LP[2])   # (128, 512)


# ------------------------------------ kernel -------------------------------------------
def _stage(fe, fo, w_mat, b_col, wp, up):
    """Conv3x3(+bias) -> ReLU -> MaxPool2x2 on a parity-split padded input.

    fe, fo : (Cin, Lp) even/odd parity planes.  w_mat: (Cout, 9*Cin).  b_col: (Cout, 1).
    Returns (Cout, up) in "padded-flat" layout: lane u = i*wp + j holds pooled[i, j];
    lanes with j >= wq or i >= hq are junk (finite) and are dropped downstream.
    """
    taps = []
    for ky in range(3):
        for kx in range(3):
            phases = []
            for py in range(2):
                for px in range(2):
                    c = (py + ky) * wp + (px + kx)
                    src = fe if c % 2 == 0 else fo
                    s = c // 2
                    phases.append(src[:, s:s + up])           # unit-stride lane slice
            taps.append(jnp.concatenate(phases, axis=1))      # (Cin, 4*up), 128-aligned
    patches = jnp.concatenate(taps, axis=0)                   # (9*Cin, 4*up)
    y = jnp.dot(w_mat, patches, preferred_element_type=jnp.float32)   # one MXU matmul
    pooled = jnp.maximum(jnp.maximum(y[:, :up], y[:, up:2 * up]),
                         jnp.maximum(y[:, 2 * up:3 * up], y[:, 3 * up:]))
    # bias is phase-independent: ReLU(max(.) + b) == pool(ReLU(conv + b))
    return jnp.maximum(pooled + b_col, 0.0)


def fused_feature_kernel(planes_ref, w1_ref, b1_ref, w2_ref, b2_ref, w3_ref, b3_ref,
                         g12_ref, g23_ref, o1_ref, o2_ref, o3_ref):
    planes = planes_ref[0]                                               # (2, LP1)
    h1 = _stage(planes[0:1], planes[1:2], w1_ref[...], b1_ref[...], WP[0], UP[0])
    o1_ref[0] = h1.astype(o1_ref.dtype)                                  # (16, 512)

    p2 = jnp.dot(h1, g12_ref[...], preferred_element_type=jnp.float32)   # handoff gather
    h2 = _stage(p2[:, :LP[1]], p2[:, LP[1]:], w2_ref[...], b2_ref[...], WP[1], UP[1])
    o2_ref[0] = h2.astype(o2_ref.dtype)                                  # (32, 128)

    p3 = jnp.dot(h2, g23_ref[...], preferred_element_type=jnp.float32)
    h3 = _stage(p3[:, :LP[2]], p3[:, LP[2]:], w3_ref[...], b3_ref[...], WP[2], UP[2])
    o3_ref[0] = h3.astype(o3_ref.dtype)                                  # (64, 128)


# ------------------------------------ wrapper ------------------------------------------
@jax.jit
def feature_extractor(x, w1, b1, w2, b2, w3, b3):
    """FeatureExtractorModel.forward: returns (pool_1_out, pool_2_out, features_output)."""
    N = x.shape[0]

    # Stage-1 input prep (a handful of tiny XLA ops on the 28x28 input):
    # reflection pad -> flatten -> parity split -> zero pad to LP[0] lanes.
    xp = jnp.pad(x, ((0, 0), (0, 0), (1, 1), (1, 1)), mode="reflect")    # (N, 1, 30, 30)
    flat = xp.reshape(N, 1, HP[0] * WP[0])                               # (N, 1, 900)
    npar = HP[0] * WP[0] // 2                                            # 450
    fe = jnp.pad(flat[:, :, 0::2], ((0, 0), (0, 0), (0, LP[0] - npar)))
    fo = jnp.pad(flat[:, :, 1::2], ((0, 0), (0, 0), (0, LP[0] - npar)))
    planes1 = jnp.concatenate([fe, fo], axis=1)                          # (N, 2, LP1)

    # Conv weights as (Cout, 9*Cin) matmul matrices, k = (ky*3+kx)*Cin + ic.
    wm = [jnp.transpose(w, (0, 2, 3, 1)).reshape(w.shape[0], 9 * w.shape[1])
          for w in (w1, w2, w3)]
    bc = [b.reshape(-1, 1) for b in (b1, b2, b3)]

    const = lambda n: (0, 0)
    o1, o2, o3 = pl.pallas_call(
        fused_feature_kernel,
        out_shape=(
            jax.ShapeDtypeStruct((N, COUT[0], UP[0]), x.dtype),
            jax.ShapeDtypeStruct((N, COUT[1], UP[1]), x.dtype),
            jax.ShapeDtypeStruct((N, COUT[2], UP[2]), x.dtype),
        ),
        grid_spec=pltpu.PrefetchScalarGridSpec(
            num_scalar_prefetch=0,
            grid=(N,),
            in_specs=[
                pl.BlockSpec((1, 2, LP[0]), lambda n: (n, 0, 0)),
                pl.BlockSpec((COUT[0], 9 * CIN[0]), const),
                pl.BlockSpec((COUT[0], 1), const),
                pl.BlockSpec((COUT[1], 9 * CIN[1]), const),
                pl.BlockSpec((COUT[1], 1), const),
                pl.BlockSpec((COUT[2], 9 * CIN[2]), const),
                pl.BlockSpec((COUT[2], 1), const),
                pl.BlockSpec((UP[0], 2 * LP[1]), const),
                pl.BlockSpec((UP[1], 2 * LP[2]), const),
            ],
            out_specs=[
                pl.BlockSpec((1, COUT[0], UP[0]), lambda n: (n, 0, 0)),
                pl.BlockSpec((1, COUT[1], UP[1]), lambda n: (n, 0, 0)),
                pl.BlockSpec((1, COUT[2], UP[2]), lambda n: (n, 0, 0)),
            ],
        ),
        compiler_params=pltpu.CompilerParams(dimension_semantics=("parallel",)),
    )(planes1, wm[0], bc[0], wm[1], bc[1], wm[2], bc[2],
      jnp.asarray(_G12), jnp.asarray(_G23))

    # Strip junk lanes (padded-flat layout -> compact NCHW flattening, == torch .view).
    def compact(o, cout, hq, wq, wp):
        return (o[:, :, :hq * wp].reshape(N, cout, hq, wp)[:, :, :, :wq]
                .reshape(N, cout * hq * wq))

    pool_1_out = compact(o1, COUT[0], HQ[0], WQ[0], WP[0])   # (N, 16*14*14)
    pool_2_out = compact(o2, COUT[1], HQ[1], WQ[1], WP[1])   # (N, 32*7*7)
    # `features` hook = ReLU on the flattened pool3 output: a numerical no-op on pooled
    # ReLU outputs, so it is exactly the compacted stage-3 result.
    features = compact(o3, COUT[2], HQ[2], WQ[2], WP[2])     # (N, 64*3*3)
    # The final nn.Linear classifier output is discarded by FeatureExtractorModel.forward,
    # so it is not computed here (dead code w.r.t. the returned tuple).
    return pool_1_out, pool_2_out, features


# ----------------------------------- reference -----------------------------------------
def reference(x, w1, b1, w2, b2, w3, b3):
    """Pure-JAX reference of FeatureExtractorModel.forward."""
    def block(x, w, b):
        xp = jnp.pad(x, ((0, 0), (0, 0), (1, 1), (1, 1)), mode="reflect")
        y = jax.lax.conv_general_dilated(
            xp, w, window_strides=(1, 1), padding="VALID",
            dimension_numbers=("NCHW", "OIHW", "NCHW")) + b.reshape(1, -1, 1, 1)
        y = jnp.maximum(y, 0.0)
        return jax.lax.reduce_window(y, -jnp.inf, jax.lax.max,
                                     (1, 1, 2, 2), (1, 1, 2, 2), "VALID")
    N = x.shape[0]
    h1 = block(x, w1, b1)
    h2 = block(h1, w2, b2)
    h3 = block(h2, w3, b3)
    return (h1.reshape(N, -1), h2.reshape(N, -1),
            jnp.maximum(h3.reshape(N, -1), 0.0))


if __name__ == "__main__":
    key = jax.random.PRNGKey(0)
    ks = jax.random.split(key, 7)

    N = 2
    # MNIST-shaped input: the .view(-1, 16*14*14) hook implies 28x28 single-channel input.
    x = jax.random.normal(ks[0], (N, 1, 28, 28), dtype=jnp.float32)
    # Deterministic synthetic weights (stand-in for the mnist_classifier.pth state_dict).
    w1 = 0.3 * jax.random.normal(ks[1], (16, 1, 3, 3), dtype=jnp.float32)
    b1 = 0.1 * jax.random.normal(ks[2], (16,), dtype=jnp.float32)
    w2 = 0.1 * jax.random.normal(ks[3], (32, 16, 3, 3), dtype=jnp.float32)
    b2 = 0.1 * jax.random.normal(ks[4], (32,), dtype=jnp.float32)
    w3 = 0.1 * jax.random.normal(ks[5], (64, 32, 3, 3), dtype=jnp.float32)
    b3 = 0.1 * jax.random.normal(ks[6], (64,), dtype=jnp.float32)

    outs = jax.block_until_ready(feature_extractor(x, w1, b1, w2, b2, w3, b3))
    refs = jax.block_until_ready(reference(x, w1, b1, w2, b2, w3, b3))

    assert outs[0].shape == (N, 16 * 14 * 14), outs[0].shape
    assert outs[1].shape == (N, 32 * 7 * 7), outs[1].shape
    assert outs[2].shape == (N, 64 * 3 * 3), outs[2].shape
    for o, r in zip(outs, refs):
        err = float(jnp.max(jnp.abs(o - r)))
        assert jnp.allclose(o, r, atol=1e-4, rtol=1e-4), err

    print("KERNEL_OK")
</pallas_src>

<mosaic_0001>
module attributes {stable_mosaic.version = 11 : i64} {
  func.func @fused_feature_kernel(%arg0: i32, %arg1: memref<1x2x640xf32, #tpu.memory_space<vmem>>, %arg2: memref<16x9xf32, #tpu.memory_space<vmem>>, %arg3: memref<16x1xf32, #tpu.memory_space<vmem>>, %arg4: memref<32x144xf32, #tpu.memory_space<vmem>>, %arg5: memref<32x1xf32, #tpu.memory_space<vmem>>, %arg6: memref<64x288xf32, #tpu.memory_space<vmem>>, %arg7: memref<64x1xf32, #tpu.memory_space<vmem>>, %arg8: memref<512x512xf32, #tpu.memory_space<vmem>>, %arg9: memref<128x512xf32, #tpu.memory_space<vmem>>, %arg10: memref<1x16x512xf32, #tpu.memory_space<vmem>>, %arg11: memref<1x32x128xf32, #tpu.memory_space<vmem>>, %arg12: memref<1x64x128xf32, #tpu.memory_space<vmem>>) attributes {dimension_semantics = [#tpu.dimension_semantics<parallel>], iteration_bounds = array<i64: 2>, scalar_prefetch = 0 : i64, scratch_operands = 0 : i64, tpu.core_type = #tpu.core_type<tc>, window_params = [{transform_indices = @transform_0, window_bounds = array<i64: 1, 2, 640>}, {pipeline_mode = #tpu.pipeline_mode<synchronous>, transform_indices = @transform_1, window_bounds = array<i64: 16, 9>}, {pipeline_mode = #tpu.pipeline_mode<synchronous>, transform_indices = @transform_2, window_bounds = array<i64: 16, 1>}, {pipeline_mode = #tpu.pipeline_mode<synchronous>, transform_indices = @transform_3, window_bounds = array<i64: 32, 144>}, {pipeline_mode = #tpu.pipeline_mode<synchronous>, transform_indices = @transform_4, window_bounds = array<i64: 32, 1>}, {pipeline_mode = #tpu.pipeline_mode<synchronous>, transform_indices = @transform_5, window_bounds = array<i64: 64, 288>}, {pipeline_mode = #tpu.pipeline_mode<synchronous>, transform_indices = @transform_6, window_bounds = array<i64: 64, 1>}, {pipeline_mode = #tpu.pipeline_mode<synchronous>, transform_indices = @transform_7, window_bounds = array<i64: 512, 512>}, {pipeline_mode = #tpu.pipeline_mode<synchronous>, transform_indices = @transform_8, window_bounds = array<i64: 128, 512>}, {transform_indices = @transform_9, window_bounds = array<i64: 1, 16, 512>}, {transform_indices = @transform_10, window_bounds = array<i64: 1, 32, 128>}, {transform_indices = @transform_11, window_bounds = array<i64: 1, 64, 128>}]} {
    %c0 = arith.constant 0 : index
    %c0_0 = arith.constant 0 : index
    %c0_1 = arith.constant 0 : index
    %0 = vector.load %arg1[%c0, %c0_0, %c0_1] : memref<1x2x640xf32, #tpu.memory_space<vmem>>, vector<1x2x640xf32>
    %1 = vector.shape_cast %0 : vector<1x2x640xf32> to vector<2x640xf32>
    %2 = vector.extract_strided_slice %1 {offsets = [0, 0], sizes = [1, 640], strides = [1, 1]} : vector<2x640xf32> to vector<1x640xf32>
    %3 = vector.extract_strided_slice %1 {offsets = [1, 0], sizes = [1, 640], strides = [1, 1]} : vector<2x640xf32> to vector<1x640xf32>
    %c0_2 = arith.constant 0 : index
    %c0_3 = arith.constant 0 : index
    %4 = vector.load %arg2[%c0_2, %c0_3] : memref<16x9xf32, #tpu.memory_space<vmem>>, vector<16x9xf32>
    %c0_4 = arith.constant 0 : index
    %c0_5 = arith.constant 0 : index
    %5 = vector.load %arg3[%c0_4, %c0_5] : memref<16x1xf32, #tpu.memory_space<vmem>>, vector<16x1xf32>
    %6 = vector.extract_strided_slice %2 {offsets = [0, 0], sizes = [1, 512], strides = [1, 1]} : vector<1x640xf32> to vector<1x512xf32>
    %7 = vector.extract_strided_slice %3 {offsets = [0, 0], sizes = [1, 512], strides = [1, 1]} : vector<1x640xf32> to vector<1x512xf32>
    %8 = vector.extract_strided_slice %2 {offsets = [0, 15], sizes = [1, 512], strides = [1, 1]} : vector<1x640xf32> to vector<1x512xf32>
    %9 = vector.extract_strided_slice %3 {offsets = [0, 15], sizes = [1, 512], strides = [1, 1]} : vector<1x640xf32> to vector<1x512xf32>
    %10 = tpu.concatenate %6, %7, %8, %9 in 1 : vector<1x512xf32>, vector<1x512xf32>, vector<1x512xf32>, vector<1x512xf32> -> vector<1x2048xf32>
    %11 = vector.extract_strided_slice %3 {offsets = [0, 0], sizes = [1, 512], strides = [1, 1]} : vector<1x640xf32> to vector<1x512xf32>
    %12 = vector.extract_strided_slice %2 {offsets = [0, 1], sizes = [1, 512], strides = [1, 1]} : vector<1x640xf32> to vector<1x512xf32>
    %13 = vector.extract_strided_slice %3 {offsets = [0, 15], sizes = [1, 512], strides = [1, 1]} : vector<1x640xf32> to vector<1x512xf32>
    %14 = vector.extract_strided_slice %2 {offsets = [0, 16], sizes = [1, 512], strides = [1, 1]} : vector<1x640xf32> to vector<1x512xf32>
    %15 = tpu.concatenate %11, %12, %13, %14 in 1 : vector<1x512xf32>, vector<1x512xf32>, vector<1x512xf32>, vector<1x512xf32> -> vector<1x2048xf32>
    %16 = vector.extract_strided_slice %2 {offsets = [0, 1], sizes = [1, 512], strides = [1, 1]} : vector<1x640xf32> to vector<1x512xf32>
    %17 = vector.extract_strided_slice %3 {offsets = [0, 1], sizes = [1, 512], strides = [1, 1]} : vector<1x640xf32> to vector<1x512xf32>
    %18 = vector.extract_strided_slice %2 {offsets = [0, 16], sizes = [1, 512], strides = [1, 1]} : vector<1x640xf32> to vector<1x512xf32>
    %19 = vector.extract_strided_slice %3 {offsets = [0, 16], sizes = [1, 512], strides = [1, 1]} : vector<1x640xf32> to vector<1x512xf32>
    %20 = tpu.concatenate %16, %17, %18, %19 in 1 : vector<1x512xf32>, vector<1x512xf32>, vector<1x512xf32>, vector<1x512xf32> -> vector<1x2048xf32>
    %21 = vector.extract_strided_slice %2 {offsets = [0, 15], sizes = [1, 512], strides = [1, 1]} : vector<1x640xf32> to vector<1x512xf32>
    %22 = vector.extract_strided_slice %3 {offsets = [0, 15], sizes = [1, 512], strides = [1, 1]} : vector<1x640xf32> to vector<1x512xf32>
    %23 = vector.extract_strided_slice %2 {offsets = [0, 30], sizes = [1, 512], strides = [1, 1]} : vector<1x640xf32> to vector<1x512xf32>
    %24 = vector.extract_strided_slice %3 {offsets = [0, 30], sizes = [1, 512], strides = [1, 1]} : vector<1x640xf32> to vector<1x512xf32>
    %25 = tpu.concatenate %21, %22, %23, %24 in 1 : vector<1x512xf32>, vector<1x512xf32>, vector<1x512xf32>, vector<1x512xf32> -> vector<1x2048xf32>
    %26 = vector.extract_strided_slice %3 {offsets = [0, 15], sizes = [1, 512], strides = [1, 1]} : vector<1x640xf32> to vector<1x512xf32>
    %27 = vector.extract_strided_slice %2 {offsets = [0, 16], sizes = [1, 512], strides = [1, 1]} : vector<1x640xf32> to vector<1x512xf32>
    %28 = vector.extract_strided_slice %3 {offsets = [0, 30], sizes = [1, 512], strides = [1, 1]} : vector<1x640xf32> to vector<1x512xf32>
    %29 = vector.extract_strided_slice %2 {offsets = [0, 31], sizes = [1, 512], strides = [1, 1]} : vector<1x640xf32> to vector<1x512xf32>
    %30 = tpu.concatenate %26, %27, %28, %29 in 1 : vector<1x512xf32>, vector<1x512xf32>, vector<1x512xf32>, vector<1x512xf32> -> vector<1x2048xf32>
    %31 = vector.extract_strided_slice %2 {offsets = [0, 16], sizes = [1, 512], strides = [1, 1]} : vector<1x640xf32> to vector<1x512xf32>
    %32 = vector.extract_strided_slice %3 {offsets = [0, 16], sizes = [1, 512], strides = [1, 1]} : vector<1x640xf32> to vector<1x512xf32>
    %33 = vector.extract_strided_slice %2 {offsets = [0, 31], sizes = [1, 512], strides = [1, 1]} : vector<1x640xf32> to vector<1x512xf32>
    %34 = vector.extract_strided_slice %3 {offsets = [0, 31], sizes = [1, 512], strides = [1, 1]} : vector<1x640xf32> to vector<1x512xf32>
    %35 = tpu.concatenate %31, %32, %33, %34 in 1 : vector<1x512xf32>, vector<1x512xf32>, vector<1x512xf32>, vector<1x512xf32> -> vector<1x2048xf32>
    %36 = vector.extract_strided_slice %2 {offsets = [0, 30], sizes = [1, 512], strides = [1, 1]} : vector<1x640xf32> to vector<1x512xf32>
    %37 = vector.extract_strided_slice %3 {offsets = [0, 30], sizes = [1, 512], strides = [1, 1]} : vector<1x640xf32> to vector<1x512xf32>
    %38 = vector.extract_strided_slice %2 {offsets = [0, 45], sizes = [1, 512], strides = [1, 1]} : vector<1x640xf32> to vector<1x512xf32>
    %39 = vector.extract_strided_slice %3 {offsets = [0, 45], sizes = [1, 512], strides = [1, 1]} : vector<1x640xf32> to vector<1x512xf32>
    %40 = tpu.concatenate %36, %37, %38, %39 in 1 : vector<1x512xf32>, vector<1x512xf32>, vector<1x512xf32>, vector<1x512xf32> -> vector<1x2048xf32>
    %41 = vector.extract_strided_slice %3 {offsets = [0, 30], sizes = [1, 512], strides = [1, 1]} : vector<1x640xf32> to vector<1x512xf32>
    %42 = vector.extract_strided_slice %2 {offsets = [0, 31], sizes = [1, 512], strides = [1, 1]} : vector<1x640xf32> to vector<1x512xf32>
    %43 = vector.extract_strided_slice %3 {offsets = [0, 45], sizes = [1, 512], strides = [1, 1]} : vector<1x640xf32> to vector<1x512xf32>
    %44 = vector.extract_strided_slice %2 {offsets = [0, 46], sizes = [1, 512], strides = [1, 1]} : vector<1x640xf32> to vector<1x512xf32>
    %45 = tpu.concatenate %41, %42, %43, %44 in 1 : vector<1x512xf32>, vector<1x512xf32>, vector<1x512xf32>, vector<1x512xf32> -> vector<1x2048xf32>
    %46 = vector.extract_strided_slice %2 {offsets = [0, 31], sizes = [1, 512], strides = [1, 1]} : vector<1x640xf32> to vector<1x512xf32>
    %47 = vector.extract_strided_slice %3 {offsets = [0, 31], sizes = [1, 512], strides = [1, 1]} : vector<1x640xf32> to vector<1x512xf32>
    %48 = vector.extract_strided_slice %2 {offsets = [0, 46], sizes = [1, 512], strides = [1, 1]} : vector<1x640xf32> to vector<1x512xf32>
    %49 = vector.extract_strided_slice %3 {offsets = [0, 46], sizes = [1, 512], strides = [1, 1]} : vector<1x640xf32> to vector<1x512xf32>
    %50 = tpu.concatenate %46, %47, %48, %49 in 1 : vector<1x512xf32>, vector<1x512xf32>, vector<1x512xf32>, vector<1x512xf32> -> vector<1x2048xf32>
    %51 = tpu.concatenate %10, %15, %20, %25, %30, %35, %40, %45, %50 in 0 : vector<1x2048xf32>, vector<1x2048xf32>, vector<1x2048xf32>, vector<1x2048xf32>, vector<1x2048xf32>, vector<1x2048xf32>, vector<1x2048xf32>, vector<1x2048xf32>, vector<1x2048xf32> -> vector<9x2048xf32>
    %cst = arith.constant dense<0.000000e+00> : vector<16x2048xf32>
    %52 = tpu.matmul %4, %51, %cst {dimension_numbers = #tpu.dot_dimension_numbers<[1], [0], [0], [1], [0, 0, 1, 1], [], []>} : vector<16x9xf32>, vector<9x2048xf32>, vector<16x2048xf32> -> vector<16x2048xf32>
    %53 = vector.extract_strided_slice %52 {offsets = [0, 0], sizes = [16, 512], strides = [1, 1]} : vector<16x2048xf32> to vector<16x512xf32>
    %54 = vector.extract_strided_slice %52 {offsets = [0, 512], sizes = [16, 512], strides = [1, 1]} : vector<16x2048xf32> to vector<16x512xf32>
    %55 = arith.maximumf %53, %54 : vector<16x512xf32>
    %56 = vector.extract_strided_slice %52 {offsets = [0, 1024], sizes = [16, 512], strides = [1, 1]} : vector<16x2048xf32> to vector<16x512xf32>
    %57 = vector.extract_strided_slice %52 {offsets = [0, 1536], sizes = [16, 512], strides = [1, 1]} : vector<16x2048xf32> to vector<16x512xf32>
    %58 = arith.maximumf %56, %57 : vector<16x512xf32>
    %59 = arith.maximumf %55, %58 : vector<16x512xf32>
    %60 = vector.broadcast %5 : vector<16x1xf32> to vector<16x512xf32>
    %61 = arith.addf %59, %60 : vector<16x512xf32>
    %cst_6 = arith.constant 0.000000e+00 : f32
    %62 = vector.broadcast %cst_6 : f32 to vector<16x512xf32>
    %63 = arith.maximumf %61, %62 : vector<16x512xf32>
    %c0_7 = arith.constant 0 : index
    %c0_8 = arith.constant 0 : index
    %c0_9 = arith.constant 0 : index
    %64 = vector.load %arg10[%c0_7, %c0_8, %c0_9] : memref<1x16x512xf32, #tpu.memory_space<vmem>>, vector<1x16x512xf32>
    %65 = vector.shape_cast %64 : vector<1x16x512xf32> to vector<16x512xf32>
    %66 = vector.shape_cast %63 : vector<16x512xf32> to vector<1x16x512xf32>
    tpu.vector_store %arg10[%c0_7, %c0_8, %c0_9], %66 {strides = array<i32>} : memref<1x16x512xf32, #tpu.memory_space<vmem>>, vector<1x16x512xf32>,
    %c0_10 = arith.constant 0 : index
    %c0_11 = arith.constant 0 : index
    %67 = vector.load %arg8[%c0_10, %c0_11] : memref<512x512xf32, #tpu.memory_space<vmem>>, vector<512x512xf32>
    %cst_12 = arith.constant dense<0.000000e+00> : vector<16x512xf32>
    %68 = tpu.matmul %63, %67, %cst_12 {dimension_numbers = #tpu.dot_dimension_numbers<[1], [0], [0], [1], [0, 0, 1, 1], [], []>} : vector<16x512xf32>, vector<512x512xf32>, vector<16x512xf32> -> vector<16x512xf32>
    %69 = vector.extract_strided_slice %68 {offsets = [0, 0], sizes = [16, 256], strides = [1, 1]} : vector<16x512xf32> to vector<16x256xf32>
    %70 = vector.extract_strided_slice %68 {offsets = [0, 256], sizes = [16, 256], strides = [1, 1]} : vector<16x512xf32> to vector<16x256xf32>
    %c0_13 = arith.constant 0 : index
    %c0_14 = arith.constant 0 : index
    %71 = vector.load %arg4[%c0_13, %c0_14] : memref<32x144xf32, #tpu.memory_space<vmem>>, vector<32x144xf32>
    %c0_15 = arith.constant 0 : index
    %c0_16 = arith.constant 0 : index
    %72 = vector.load %arg5[%c0_15, %c0_16] : memref<32x1xf32, #tpu.memory_space<vmem>>, vector<32x1xf32>
    %73 = vector.extract_strided_slice %69 {offsets = [0, 0], sizes = [16, 128], strides = [1, 1]} : vector<16x256xf32> to vector<16x128xf32>
    %74 = vector.extract_strided_slice %70 {offsets = [0, 0], sizes = [16, 128], strides = [1, 1]} : vector<16x256xf32> to vector<16x128xf32>
    %75 = vector.extract_strided_slice %69 {offsets = [0, 8], sizes = [16, 128], strides = [1, 1]} : vector<16x256xf32> to vector<16x128xf32>
    %76 = vector.extract_strided_slice %70 {offsets = [0, 8], sizes = [16, 128], strides = [1, 1]} : vector<16x256xf32> to vector<16x128xf32>
    %77 = tpu.concatenate %73, %74, %75, %76 in 1 : vector<16x128xf32>, vector<16x128xf32>, vector<16x128xf32>, vector<16x128xf32> -> vector<16x512xf32>
    %78 = vector.extract_strided_slice %70 {offsets = [0, 0], sizes = [16, 128], strides = [1, 1]} : vector<16x256xf32> to vector<16x128xf32>
    %79 = vector.extract_strided_slice %69 {offsets = [0, 1], sizes = [16, 128], strides = [1, 1]} : vector<16x256xf32> to vector<16x128xf32>
    %80 = vector.extract_strided_slice %70 {offsets = [0, 8], sizes = [16, 128], strides = [1, 1]} : vector<16x256xf32> to vector<16x128xf32>
    %81 = vector.extract_strided_slice %69 {offsets = [0, 9], sizes = [16, 128], strides = [1, 1]} : vector<16x256xf32> to vector<16x128xf32>
    %82 = tpu.concatenate %78, %79, %80, %81 in 1 : vector<16x128xf32>, vector<16x128xf32>, vector<16x128xf32>, vector<16x128xf32> -> vector<16x512xf32>
    %83 = vector.extract_strided_slice %69 {offsets = [0, 1], sizes = [16, 128], strides = [1, 1]} : vector<16x256xf32> to vector<16x128xf32>
    %84 = vector.extract_strided_slice %70 {offsets = [0, 1], sizes = [16, 128], strides = [1, 1]} : vector<16x256xf32> to vector<16x128xf32>
    %85 = vector.extract_strided_slice %69 {offsets = [0, 9], sizes = [16, 128], strides = [1, 1]} : vector<16x256xf32> to vector<16x128xf32>
    %86 = vector.extract_strided_slice %70 {offsets = [0, 9], sizes = [16, 128], strides = [1, 1]} : vector<16x256xf32> to vector<16x128xf32>
    %87 = tpu.concatenate %83, %84, %85, %86 in 1 : vector<16x128xf32>, vector<16x128xf32>, vector<16x128xf32>, vector<16x128xf32> -> vector<16x512xf32>
    %88 = vector.extract_strided_slice %69 {offsets = [0, 8], sizes = [16, 128], strides = [1, 1]} : vector<16x256xf32> to vector<16x128xf32>
    %89 = vector.extract_strided_slice %70 {offsets = [0, 8], sizes = [16, 128], strides = [1, 1]} : vector<16x256xf32> to vector<16x128xf32>
    %90 = vector.extract_strided_slice %69 {offsets = [0, 16], sizes = [16, 128], strides = [1, 1]} : vector<16x256xf32> to vector<16x128xf32>
    %91 = vector.extract_strided_slice %70 {offsets = [0, 16], sizes = [16, 128], strides = [1, 1]} : vector<16x256xf32> to vector<16x128xf32>
    %92 = tpu.concatenate %88, %89, %90, %91 in 1 : vector<16x128xf32>, vector<16x128xf32>, vector<16x128xf32>, vector<16x128xf32> -> vector<16x512xf32>
    %93 = vector.extract_strided_slice %70 {offsets = [0, 8], sizes = [16, 128], strides = [1, 1]} : vector<16x256xf32> to vector<16x128xf32>
    %94 = vector.extract_strided_slice %69 {offsets = [0, 9], sizes = [16, 128], strides = [1, 1]} : vector<16x256xf32> to vector<16x128xf32>
    %95 = vector.extract_strided_slice %70 {offsets = [0, 16], sizes = [16, 128], strides = [1, 1]} : vector<16x256xf32> to vector<16x128xf32>
    %96 = vector.extract_strided_slice %69 {offsets = [0, 17], sizes = [16, 128], strides = [1, 1]} : vector<16x256xf32> to vector<16x128xf32>
    %97 = tpu.concatenate %93, %94, %95, %96 in 1 : vector<16x128xf32>, vector<16x128xf32>, vector<16x128xf32>, vector<16x128xf32> -> vector<16x512xf32>
    %98 = vector.extract_strided_slice %69 {offsets = [0, 9], sizes = [16, 128], strides = [1, 1]} : vector<16x256xf32> to vector<16x128xf32>
    %99 = vector.extract_strided_slice %70 {offsets = [0, 9], sizes = [16, 128], strides = [1, 1]} : vector<16x256xf32> to vector<16x128xf32>
    %100 = vector.extract_strided_slice %69 {offsets = [0, 17], sizes = [16, 128], strides = [1, 1]} : vector<16x256xf32> to vector<16x128xf32>
    %101 = vector.extract_strided_slice %70 {offsets = [0, 17], sizes = [16, 128], strides = [1, 1]} : vector<16x256xf32> to vector<16x128xf32>
    %102 = tpu.concatenate %98, %99, %100, %101 in 1 : vector<16x128xf32>, vector<16x128xf32>, vector<16x128xf32>, vector<16x128xf32> -> vector<16x512xf32>
    %103 = vector.extract_strided_slice %69 {offsets = [0, 16], sizes = [16, 128], strides = [1, 1]} : vector<16x256xf32> to vector<16x128xf32>
    %104 = vector.extract_strided_slice %70 {offsets = [0, 16], sizes = [16, 128], strides = [1, 1]} : vector<16x256xf32> to vector<16x128xf32>
    %105 = vector.extract_strided_slice %69 {offsets = [0, 24], sizes = [16, 128], strides = [1, 1]} : vector<16x256xf32> to vector<16x128xf32>
    %106 = vector.extract_strided_slice %70 {offsets = [0, 24], sizes = [16, 128], strides = [1, 1]} : vector<16x256xf32> to vector<16x128xf32>
    %107 = tpu.concatenate %103, %104, %105, %106 in 1 : vector<16x128xf32>, vector<16x128xf32>, vector<16x128xf32>, vector<16x128xf32> -> vector<16x512xf32>
    %108 = vector.extract_strided_slice %70 {offsets = [0, 16], sizes = [16, 128], strides = [1, 1]} : vector<16x256xf32> to vector<16x128xf32>
    %109 = vector.extract_strided_slice %69 {offsets = [0, 17], sizes = [16, 128], strides = [1, 1]} : vector<16x256xf32> to vector<16x128xf32>
    %110 = vector.extract_strided_slice %70 {offsets = [0, 24], sizes = [16, 128], strides = [1, 1]} : vector<16x256xf32> to vector<16x128xf32>
    %111 = vector.extract_strided_slice %69 {offsets = [0, 25], sizes = [16, 128], strides = [1, 1]} : vector<16x256xf32> to vector<16x128xf32>
    %112 = tpu.concatenate %108, %109, %110, %111 in 1 : vector<16x128xf32>, vector<16x128xf32>, vector<16x128xf32>, vector<16x128xf32> -> vector<16x512xf32>
    %113 = vector.extract_strided_slice %69 {offsets = [0, 17], sizes = [16, 128], strides = [1, 1]} : vector<16x256xf32> to vector<16x128xf32>
    %114 = vector.extract_strided_slice %70 {offsets = [0, 17], sizes = [16, 128], strides = [1, 1]} : vector<16x256xf32> to vector<16x128xf32>
    %115 = vector.extract_strided_slice %69 {offsets = [0, 25], sizes = [16, 128], strides = [1, 1]} : vector<16x256xf32> to vector<16x128xf32>
    %116 = vector.extract_strided_slice %70 {offsets = [0, 25], sizes = [16, 128], strides = [1, 1]} : vector<16x256xf32> to vector<16x128xf32>
    %117 = tpu.concatenate %113, %114, %115, %116 in 1 : vector<16x128xf32>, vector<16x128xf32>, vector<16x128xf32>, vector<16x128xf32> -> vector<16x512xf32>
    %118 = tpu.concatenate %77, %82, %87, %92, %97, %102, %107, %112, %117 in 0 : vector<16x512xf32>, vector<16x512xf32>, vector<16x512xf32>, vector<16x512xf32>, vector<16x512xf32>, vector<16x512xf32>, vector<16x512xf32>, vector<16x512xf32>, vector<16x512xf32> -> vector<144x512xf32>
    %cst_17 = arith.constant dense<0.000000e+00> : vector<32x512xf32>
    %119 = tpu.matmul %71, %118, %cst_17 {dimension_numbers = #tpu.dot_dimension_numbers<[1], [0], [0], [1], [0, 0, 1, 1], [], []>} : vector<32x144xf32>, vector<144x512xf32>, vector<32x512xf32> -> vector<32x512xf32>
    %120 = vector.extract_strided_slice %119 {offsets = [0, 0], sizes = [32, 128], strides = [1, 1]} : vector<32x512xf32> to vector<32x128xf32>
    %121 = vector.extract_strided_slice %119 {offsets = [0, 128], sizes = [32, 128], strides = [1, 1]} : vector<32x512xf32> to vector<32x128xf32>
    %122 = arith.maximumf %120, %121 : vector<32x128xf32>
    %123 = vector.extract_strided_slice %119 {offsets = [0, 256], sizes = [32, 128], strides = [1, 1]} : vector<32x512xf32> to vector<32x128xf32>
    %124 = vector.extract_strided_slice %119 {offsets = [0, 384], sizes = [32, 128], strides = [1, 1]} : vector<32x512xf32> to vector<32x128xf32>
    %125 = arith.maximumf %123, %124 : vector<32x128xf32>
    %126 = arith.maximumf %122, %125 : vector<32x128xf32>
    %127 = vector.broadcast %72 : vector<32x1xf32> to vector<32x128xf32>
    %128 = arith.addf %126, %127 : vector<32x128xf32>
    %cst_18 = arith.constant 0.000000e+00 : f32
    %129 = vector.broadcast %cst_18 : f32 to vector<32x128xf32>
    %130 = arith.maximumf %128, %129 : vector<32x128xf32>
    %c0_19 = arith.constant 0 : index
    %c0_20 = arith.constant 0 : index
    %c0_21 = arith.constant 0 : index
    %131 = vector.load %arg11[%c0_19, %c0_20, %c0_21] : memref<1x32x128xf32, #tpu.memory_space<vmem>>, vector<1x32x128xf32>
    %132 = vector.shape_cast %131 : vector<1x32x128xf32> to vector<32x128xf32>
    %133 = vector.shape_cast %130 : vector<32x128xf32> to vector<1x32x128xf32>
    tpu.vector_store %arg11[%c0_19, %c0_20, %c0_21], %133 {strides = array<i32>} : memref<1x32x128xf32, #tpu.memory_space<vmem>>, vector<1x32x128xf32>,
    %c0_22 = arith.constant 0 : index
    %c0_23 = arith.constant 0 : index
    %134 = vector.load %arg9[%c0_22, %c0_23] : memref<128x512xf32, #tpu.memory_space<vmem>>, vector<128x512xf32>
    %cst_24 = arith.constant dense<0.000000e+00> : vector<32x512xf32>
    %135 = tpu.matmul %130, %134, %cst_24 {dimension_numbers = #tpu.dot_dimension_numbers<[1], [0], [0], [1], [0, 0, 1, 1], [], []>} : vector<32x128xf32>, vector<128x512xf32>, vector<32x512xf32> -> vector<32x512xf32>
    %136 = vector.extract_strided_slice %135 {offsets = [0, 0], sizes = [32, 256], strides = [1, 1]} : vector<32x512xf32> to vector<32x256xf32>
    %137 = vector.extract_strided_slice %135 {offsets = [0, 256], sizes = [32, 256], strides = [1, 1]} : vector<32x512xf32> to vector<32x256xf32>
    %c0_25 = arith.constant 0 : index
    %c0_26 = arith.constant 0 : index
    %138 = vector.load %arg6[%c0_25, %c0_26] : memref<64x288xf32, #tpu.memory_space<vmem>>, vector<64x288xf32>
    %c0_27 = arith.constant 0 : index
    %c0_28 = arith.constant 0 : index
    %139 = vector.load %arg7[%c0_27, %c0_28] : memref<64x1xf32, #tpu.memory_space<vmem>>, vector<64x1xf32>
    %140 = vector.extract_strided_slice %136 {offsets = [0, 0], sizes = [32, 128], strides = [1, 1]} : vector<32x256xf32> to vector<32x128xf32>
    %141 = vector.extract_strided_slice %137 {offsets = [0, 0], sizes = [32, 128], strides = [1, 1]} : vector<32x256xf32> to vector<32x128xf32>
    %142 = vector.extract_strided_slice %137 {offsets = [0, 4], sizes = [32, 128], strides = [1, 1]} : vector<32x256xf32> to vector<32x128xf32>
    %143 = vector.extract_strided_slice %136 {offsets = [0, 5], sizes = [32, 128], strides = [1, 1]} : vector<32x256xf32> to vector<32x128xf32>
    %144 = tpu.concatenate %140, %141, %142, %143 in 1 : vector<32x128xf32>, vector<32x128xf32>, vector<32x128xf32>, vector<32x128xf32> -> vector<32x512xf32>
    %145 = vector.extract_strided_slice %137 {offsets = [0, 0], sizes = [32, 128], strides = [1, 1]} : vector<32x256xf32> to vector<32x128xf32>
    %146 = vector.extract_strided_slice %136 {offsets = [0, 1], sizes = [32, 128], strides = [1, 1]} : vector<32x256xf32> to vector<32x128xf32>
    %147 = vector.extract_strided_slice %136 {offsets = [0, 5], sizes = [32, 128], strides = [1, 1]} : vector<32x256xf32> to vector<32x128xf32>
    %148 = vector.extract_strided_slice %137 {offsets = [0, 5], sizes = [32, 128], strides = [1, 1]} : vector<32x256xf32> to vector<32x128xf32>
    %149 = tpu.concatenate %145, %146, %147, %148 in 1 : vector<32x128xf32>, vector<32x128xf32>, vector<32x128xf32>, vector<32x128xf32> -> vector<32x512xf32>
    %150 = vector.extract_strided_slice %136 {offsets = [0, 1], sizes = [32, 128], strides = [1, 1]} : vector<32x256xf32> to vector<32x128xf32>
    %151 = vector.extract_strided_slice %137 {offsets = [0, 1], sizes = [32, 128], strides = [1, 1]} : vector<32x256xf32> to vector<32x128xf32>
    %152 = vector.extract_strided_slice %137 {offsets = [0, 5], sizes = [32, 128], strides = [1, 1]} : vector<32x256xf32> to vector<32x128xf32>
    %153 = vector.extract_strided_slice %136 {offsets = [0, 6], sizes = [32, 128], strides = [1, 1]} : vector<32x256xf32> to vector<32x128xf32>
    %154 = tpu.concatenate %150, %151, %152, %153 in 1 : vector<32x128xf32>, vector<32x128xf32>, vector<32x128xf32>, vector<32x128xf32> -> vector<32x512xf32>
    %155 = vector.extract_strided_slice %137 {offsets = [0, 4], sizes = [32, 128], strides = [1, 1]} : vector<32x256xf32> to vector<32x128xf32>
    %156 = vector.extract_strided_slice %136 {offsets = [0, 5], sizes = [32, 128], strides = [1, 1]} : vector<32x256xf32> to vector<32x128xf32>
    %157 = vector.extract_strided_slice %136 {offsets = [0, 9], sizes = [32, 128], strides = [1, 1]} : vector<32x256xf32> to vector<32x128xf32>
    %158 = vector.extract_strided_slice %137 {offsets = [0, 9], sizes = [32, 128], strides = [1, 1]} : vector<32x256xf32> to vector<32x128xf32>
    %159 = tpu.concatenate %155, %156, %157, %158 in 1 : vector<32x128xf32>, vector<32x128xf32>, vector<32x128xf32>, vector<32x128xf32> -> vector<32x512xf32>
    %160 = vector.extract_strided_slice %136 {offsets = [0, 5], sizes = [32, 128], strides = [1, 1]} : vector<32x256xf32> to vector<32x128xf32>
    %161 = vector.extract_strided_slice %137 {offsets = [0, 5], sizes = [32, 128], strides = [1, 1]} : vector<32x256xf32> to vector<32x128xf32>
    %162 = vector.extract_strided_slice %137 {offsets = [0, 9], sizes = [32, 128], strides = [1, 1]} : vector<32x256xf32> to vector<32x128xf32>
    %163 = vector.extract_strided_slice %136 {offsets = [0, 10], sizes = [32, 128], strides = [1, 1]} : vector<32x256xf32> to vector<32x128xf32>
    %164 = tpu.concatenate %160, %161, %162, %163 in 1 : vector<32x128xf32>, vector<32x128xf32>, vector<32x128xf32>, vector<32x128xf32> -> vector<32x512xf32>
    %165 = vector.extract_strided_slice %137 {offsets = [0, 5], sizes = [32, 128], strides = [1, 1]} : vector<32x256xf32> to vector<32x128xf32>
    %166 = vector.extract_strided_slice %136 {offsets = [0, 6], sizes = [32, 128], strides = [1, 1]} : vector<32x256xf32> to vector<32x128xf32>
    %167 = vector.extract_strided_slice %136 {offsets = [0, 10], sizes = [32, 128], strides = [1, 1]} : vector<32x256xf32> to vector<32x128xf32>
    %168 = vector.extract_strided_slice %137 {offsets = [0, 10], sizes = [32, 128], strides = [1, 1]} : vector<32x256xf32> to vector<32x128xf32>
    %169 = tpu.concatenate %165, %166, %167, %168 in 1 : vector<32x128xf32>, vector<32x128xf32>, vector<32x128xf32>, vector<32x128xf32> -> vector<32x512xf32>
    %170 = vector.extract_strided_slice %136 {offsets = [0, 9], sizes = [32, 128], strides = [1, 1]} : vector<32x256xf32> to vector<32x128xf32>
    %171 = vector.extract_strided_slice %137 {offsets = [0, 9], sizes = [32, 128], strides = [1, 1]} : vector<32x256xf32> to vector<32x128xf32>
    %172 = vector.extract_strided_slice %137 {offsets = [0, 13], sizes = [32, 128], strides = [1, 1]} : vector<32x256xf32> to vector<32x128xf32>
    %173 = vector.extract_strided_slice %136 {offsets = [0, 14], sizes = [32, 128], strides = [1, 1]} : vector<32x256xf32> to vector<32x128xf32>
    %174 = tpu.concatenate %170, %171, %172, %173 in 1 : vector<32x128xf32>, vector<32x128xf32>, vector<32x128xf32>, vector<32x128xf32> -> vector<32x512xf32>
    %175 = vector.extract_strided_slice %137 {offsets = [0, 9], sizes = [32, 128], strides = [1, 1]} : vector<32x256xf32> to vector<32x128xf32>
    %176 = vector.extract_strided_slice %136 {offsets = [0, 10], sizes = [32, 128], strides = [1, 1]} : vector<32x256xf32> to vector<32x128xf32>
    %177 = vector.extract_strided_slice %136 {offsets = [0, 14], sizes = [32, 128], strides = [1, 1]} : vector<32x256xf32> to vector<32x128xf32>
    %178 = vector.extract_strided_slice %137 {offsets = [0, 14], sizes = [32, 128], strides = [1, 1]} : vector<32x256xf32> to vector<32x128xf32>
    %179 = tpu.concatenate %175, %176, %177, %178 in 1 : vector<32x128xf32>, vector<32x128xf32>, vector<32x128xf32>, vector<32x128xf32> -> vector<32x512xf32>
    %180 = vector.extract_strided_slice %136 {offsets = [0, 10], sizes = [32, 128], strides = [1, 1]} : vector<32x256xf32> to vector<32x128xf32>
    %181 = vector.extract_strided_slice %137 {offsets = [0, 10], sizes = [32, 128], strides = [1, 1]} : vector<32x256xf32> to vector<32x128xf32>
    %182 = vector.extract_strided_slice %137 {offsets = [0, 14], sizes = [32, 128], strides = [1, 1]} : vector<32x256xf32> to vector<32x128xf32>
    %183 = vector.extract_strided_slice %136 {offsets = [0, 15], sizes = [32, 128], strides = [1, 1]} : vector<32x256xf32> to vector<32x128xf32>
    %184 = tpu.concatenate %180, %181, %182, %183 in 1 : vector<32x128xf32>, vector<32x128xf32>, vector<32x128xf32>, vector<32x128xf32> -> vector<32x512xf32>
    %185 = tpu.concatenate %144, %149, %154, %159, %164, %169, %174, %179, %184 in 0 : vector<32x512xf32>, vector<32x512xf32>, vector<32x512xf32>, vector<32x512xf32>, vector<32x512xf32>, vector<32x512xf32>, vector<32x512xf32>, vector<32x512xf32>, vector<32x512xf32> -> vector<288x512xf32>
    %cst_29 = arith.constant dense<0.000000e+00> : vector<64x512xf32>
    %186 = tpu.matmul %138, %185, %cst_29 {dimension_numbers = #tpu.dot_dimension_numbers<[1], [0], [0], [1], [0, 0, 1, 1], [], []>} : vector<64x288xf32>, vector<288x512xf32>, vector<64x512xf32> -> vector<64x512xf32>
    %187 = vector.extract_strided_slice %186 {offsets = [0, 0], sizes = [64, 128], strides = [1, 1]} : vector<64x512xf32> to vector<64x128xf32>
    %188 = vector.extract_strided_slice %186 {offsets = [0, 128], sizes = [64, 128], strides = [1, 1]} : vector<64x512xf32> to vector<64x128xf32>
    %189 = arith.maximumf %187, %188 : vector<64x128xf32>
    %190 = vector.extract_strided_slice %186 {offsets = [0, 256], sizes = [64, 128], strides = [1, 1]} : vector<64x512xf32> to vector<64x128xf32>
    %191 = vector.extract_strided_slice %186 {offsets = [0, 384], sizes = [64, 128], strides = [1, 1]} : vector<64x512xf32> to vector<64x128xf32>
    %192 = arith.maximumf %190, %191 : vector<64x128xf32>
    %193 = arith.maximumf %189, %192 : vector<64x128xf32>
    %194 = vector.broadcast %139 : vector<64x1xf32> to vector<64x128xf32>
    %195 = arith.addf %193, %194 : vector<64x128xf32>
    %cst_30 = arith.constant 0.000000e+00 : f32
    %196 = vector.broadcast %cst_30 : f32 to vector<64x128xf32>
    %197 = arith.maximumf %195, %196 : vector<64x128xf32>
    %c0_31 = arith.constant 0 : index
    %c0_32 = arith.constant 0 : index
    %c0_33 = arith.constant 0 : index
    %198 = vector.load %arg12[%c0_31, %c0_32, %c0_33] : memref<1x64x128xf32, #tpu.memory_space<vmem>>, vector<1x64x128xf32>
    %199 = vector.shape_cast %198 : vector<1x64x128xf32> to vector<64x128xf32>
    %200 = vector.shape_cast %197 : vector<64x128xf32> to vector<1x64x128xf32>
    tpu.vector_store %arg12[%c0_31, %c0_32, %c0_33], %200 {strides = array<i32>} : memref<1x64x128xf32, #tpu.memory_space<vmem>>, vector<1x64x128xf32>,
    return
  }
  func.func @transform_0(%arg0: i32) -> (i32, i32, i32) {
    %c0_i32 = arith.constant 0 : i32
    %c0_i32_0 = arith.constant 0 : i32
    %c0_i32_1 = arith.constant 0 : i32
    return %arg0, %c0_i32, %c0_i32_0 : i32, i32, i32
  }
  func.func @transform_1(%arg0: i32) -> (i32, i32) {
    %c0_i32 = arith.constant 0 : i32
    %c0_i32_0 = arith.constant 0 : i32
    %c0_i32_1 = arith.constant 0 : i32
    return %c0_i32, %c0_i32_0 : i32, i32
  }
  func.func @transform_2(%arg0: i32) -> (i32, i32) {
    %c0_i32 = arith.constant 0 : i32
    %c0_i32_0 = arith.constant 0 : i32
    %c0_i32_1 = arith.constant 0 : i32
    return %c0_i32, %c0_i32_0 : i32, i32
  }
  func.func @transform_3(%arg0: i32) -> (i32, i32) {
    %c0_i32 = arith.constant 0 : i32
    %c0_i32_0 = arith.constant 0 : i32
    %c0_i32_1 = arith.constant 0 : i32
    return %c0_i32, %c0_i32_0 : i32, i32
  }
  func.func @transform_4(%arg0: i32) -> (i32, i32) {
    %c0_i32 = arith.constant 0 : i32
    %c0_i32_0 = arith.constant 0 : i32
    %c0_i32_1 = arith.constant 0 : i32
    return %c0_i32, %c0_i32_0 : i32, i32
  }
  func.func @transform_5(%arg0: i32) -> (i32, i32) {
    %c0_i32 = arith.constant 0 : i32
    %c0_i32_0 = arith.constant 0 : i32
    %c0_i32_1 = arith.constant 0 : i32
    return %c0_i32, %c0_i32_0 : i32, i32
  }
  func.func @transform_6(%arg0: i32) -> (i32, i32) {
    %c0_i32 = arith.constant 0 : i32
    %c0_i32_0 = arith.constant 0 : i32
    %c0_i32_1 = arith.constant 0 : i32
    return %c0_i32, %c0_i32_0 : i32, i32
  }
  func.func @transform_7(%arg0: i32) -> (i32, i32) {
    %c0_i32 = arith.constant 0 : i32
    %c0_i32_0 = arith.constant 0 : i32
    %c0_i32_1 = arith.constant 0 : i32
    return %c0_i32, %c0_i32_0 : i32, i32
  }
  func.func @transform_8(%arg0: i32) -> (i32, i32) {
    %c0_i32 = arith.constant 0 : i32
    %c0_i32_0 = arith.constant 0 : i32
    %c0_i32_1 = arith.constant 0 : i32
    return %c0_i32, %c0_i32_0 : i32, i32
  }
  func.func @transform_9(%arg0: i32) -> (i32, i32, i32) {
    %c0_i32 = arith.constant 0 : i32
    %c0_i32_0 = arith.constant 0 : i32
    %c0_i32_1 = arith.constant 0 : i32
    return %arg0, %c0_i32, %c0_i32_0 : i32, i32, i32
  }
  func.func @transform_10(%arg0: i32) -> (i32, i32, i32) {
    %c0_i32 = arith.constant 0 : i32
    %c0_i32_0 = arith.constant 0 : i32
    %c0_i32_1 = arith.constant 0 : i32
    return %arg0, %c0_i32, %c0_i32_0 : i32, i32, i32
  }
  func.func @transform_11(%arg0: i32) -> (i32, i32, i32) {
    %c0_i32 = arith.constant 0 : i32
    %c0_i32_0 = arith.constant 0 : i32
    %c0_i32_1 = arith.constant 0 : i32
    return %arg0, %c0_i32, %c0_i32_0 : i32, i32, i32
  }
}

</mosaic_0001>

<bundles_post_ra>
// kernel: feature_extractor.1
= control target key start
LH: loop header
LB: loop body
LE: loop exit
PB: predicated region body
PF: predicated region fallthrough
CT: control target
= control target key end

     0   :  { %17 = vsyncpa [#allocation3], 0  ;;  %s5474_s17 = smov 0   ;;  %s7169_s0 = inlined_call_operand.vmem [shape: f32[2,2,640], index: 0, kind: input, shape index: {}]   ;;  %s7170_s1 = inlined_call_operand.vmem [shape: f32[16,9], index: 1, kind: input, shape index: {}]   ;;  %s7171_s2 = inlined_call_operand.vmem [shape: f32[16,1], index: 2, kind: input, shape index: {}]   ;;  %s7172_s3 = inlined_call_operand.vmem [shape: f32[32,144], index: 3, kind: input, shape index: {}]   ;;  %s7173_s4 = inlined_call_operand.vmem [shape: f32[32,1], index: 4, kind: input, shape index: {}]   ;;  %s7174_s5 = inlined_call_operand.vmem [shape: f32[64,288], index: 5, kind: input, shape index: {}]   ;;  %s7175_s6 = inlined_call_operand.vmem [shape: f32[64,1], index: 6, kind: input, shape index: {}]   ;;  %s7176_s7 = inlined_call_operand.hbm [shape: f32[512,512], index: 7, kind: input, shape index: {}]   ;;  %s7177_s8 = inlined_call_operand.vmem [shape: f32[128,512], index: 8, kind: input, shape index: {}]   ;;  %s7178_s9 = inlined_call_operand.vmem [shape: f32[2,16,512], index: 9, kind: output, shape index: {0}]   ;;  %s7179_s10 = inlined_call_operand.vmem [shape: f32[2,32,128], index: 10, kind: output, shape index: {1}]   ;;  %s7180_s11 = inlined_call_operand.vmem [shape: f32[2,64,128], index: 11, kind: output, shape index: {2}]  }
   0x1 LB: > { %s5480_s18 = sadd.s32 4294967295, %s5388_s17   ;;  %p4018_p0 = scmp.ge.s32.totalorder %s5388_s17, 1  ;;  %s5388_s17 = sphi %s5474_s17, %s23_s17  }
   0x2   : > { %p300_p1 = scmp.lt.s32.totalorder %s5388_s17, 3  ;;  %s5390_s19 = smov [#allocation2]  }
   0x3   : > { %s330_s20 = sshll.u32 %s5390_s19, 4  ;;  %p7181_p3 = scmp.eq.s32.totalorder %s5480_s18, 0  ;;  %s331_s20 = int_to_ptr.vmem [resolvable:$true] %s330_s20 }
   0x4   : > { %p5484_p2 = pnand %p4018_p0, %p300_p1  ;;  %s5350_s25 = scalar_lea.hbm %s7176_s7, 32768 }
   0x5   : > { %p5351_p6 = scmp.ne.s32.totalorder %s7176_s7, %s5350_s25  ;;  %p5357_p10 = scmp.lt.u32.totalorder %s5350_s25, %s7176_s7 }
   0x6   : > { %s7214_s21 = scalar_select %p5484_p2, 1, 0 }
   0x7   : > { %p4720_p4 = pneg %p5484_p2 }
   0x9   : > { %p5493_p5 = pnand %p7181_p3, %p4720_p4 }
   0xb   : > { %p5352_p7 = pneg %p5493_p5 }
   0xd   : > { %p5353_p8 = pnand %p5352_p7, %p5351_p6 }
   0xf   : > { %p5354_p9 = pneg %p5353_p8 }
  0x11   : > { %p5359_p11 = pnand %p5357_p10, %p5354_p9 }
  0x13   : > { %5362 = shalt.err (!%p5359_p11)
}
  0x14   : > { %s5363_s30 = scalar_lea.vmem %s331_s20, 32768  ;;  %p5371_p1 = scmp.lt.s32.totalorder %s331_s20, %s331_s20 }
  0x15   : > { %p5364_p12 = scmp.ne.s32.totalorder %s331_s20, %s5363_s30  ;;  %p5372_p4 = scmp.lt.s32.totalorder %s5363_s30, %s5363_s30 }
  0x17   : > { %p5366_p13 = pnand %p5364_p12, %p5352_p7  ;;  %p5373_p3 = por %p5372_p4, %p5371_p1 }
  0x19   : > { %p5367_p0 = pneg %p5366_p13 }
  0x1b   : > { %p5374_p2 = pnand %p5373_p3, %p5367_p0 }
  0x1d   : > { %5377 = shalt.err (!%p5374_p2)
}
  0x1e   : > { %s5391_s12 = smov 512   ;;  %s5392_s13 = smov 32  }
  0x1f   : > { %4723 = dma.hbm_to_vmem [thread:$0]  (!%p5493_p5), %s7176_s7, 32768, %s331_s20, [#allocation3], %s5391_s12, %s5391_s12, %s5392_s13  }
  0x20   : > { %p7216_p6 = scmp.ne.s32.totalorder %s7214_s21, 0 }
  0x22   : > { %357 = sbr.rel (%p7216_p6) target bundleno = 1868 (0x74c), region = 56 }
  0x29   : > { %p7217_p8 = scmp.eq.s32.totalorder %s5480_s18, 0 }
  0x2b   : > { %5383 = dma.done.wait (%p7217_p8), [#allocation3], 32768   ;;  %p7218_p7 = pmov %p7217_p8 }
  0x2c   : > { %p407_p2 = scmp.lt.s32.totalorder %s5480_s18, 1  ;;  %v434_v0 = vlaneseq  ;;  %s5393_s22 = smov 127   ;;  %v7188_v18 = vmov 0.0   ;;  %v431_v29 = vld [vmem:[%s7171_s2] sm:$0xff]  ;;  %v432_v30 = vld [vmem:[%s7171_s2 + $0x8] sm:$0xff]  ;;  %v5401_v31 = vmov 0  }
  0x2d   : > { %5385 = vsyncadd (%p7218_p7), [#allocation3], 4294934528  ;;  %s5394_s23 = smov 113   ;;  %s5395_s24 = smov 112   ;;  %1084 = vmatprep.mubr.f32.mxu0 %v7188_v18  ;;  %1161 = vmatprep.mubr.f32.mxu1 %v7188_v18  ;;  %v5592_v32 = vld [vmem:[#allocation2 + $0x8] sm:$0xff]  ;;  %vm862_vm0 = vcmask 1040384  }
  0x2e   : > { %s7304_s18 = smov (!%p407_p2, %s5480_s18), 1  ;;  %v435_v1 = vshrl.u32 %v434_v0, 7  ;;  %s5396_s25 = smov 98   ;;  %4928 = vset.pattern.permute.xlu0 %v5401_v31  ;;  %4929 = vset.pattern.permute.xlu1 %v5401_v31  ;;  %v5598_v35 = vld [vmem:[#allocation2 + $0x28] sm:$0xff]  ;;  %v5600_v36 = vld [vmem:[#allocation2] sm:$0xff]  ;;  %vm530_vm1 = vcmask 1039360  }
  0x2f   : > { %s4715_s16 = smul.u32 10, %s7304_s18  ;;  %s5397_s26 = smov 97   ;;  %v5602_v37 = vld [vmem:[#allocation2 + $0x20] sm:$0xff]  ;;  %v5607_v41 = vld [vmem:[#allocation2 + $0x48] sm:$0xff]  ;;  %vm879_vm2 = vcmask 1041408   ;;  %vm7213_vm3 = vcmask 924672  }
  0x30   : > { %v440_v2 = vsub.s32 2, %v435_v1  ;;  %v444_v3 = vsub.s32 4, %v435_v1  ;;  %v436_v4 = vsub.s32 0, %v435_v1  ;;  %v460_v5 = vsub.s32 3, %v435_v1  ;;  %s5399_s27 = smov 83   ;;  %s5400_s28 = smov 82  }
  0x31   : > { %s5527_s21 = scalar_lea.vmem %s7169_s0, %s4715_s16  ;;  %v456_v7 = vsub.s32 1, %v435_v1  ;;  %v464_v8 = vsub.s32 5, %v435_v1  ;;  %v448_v19 = vsub.s32 6, %v435_v1  ;;  %v468_v24 = vsub.s32 7, %v435_v1  ;;  %v5609_v42 = vld [vmem:[#allocation2 + $0x68] sm:$0xff]  ;;  %v5611_v43 = vld [vmem:[#allocation2 + $0x40] sm:$0xff] }
  0x32   : > { %v427_v6 = vld [vmem:[%s5527_s21] sm:$0xff]  ;;  %v428_v20 = vld [vmem:[%s5527_s21 + $0x8] sm:$0x3]  ;;  %vm896_vm4 = vcmask 1042432   ;;  %vm549_vm5 = vcmask 916480   ;;  %vm7202_vm6 = vcmask 801792  }
  0x33   : > { %v5530_v9 = vrot.slane %v427_v6, %v440_v2  ;;  %v5532_v10 = vrot.slane %v427_v6, %v444_v3  ;;  %v5534_v11 = vrot.slane %v427_v6, %v436_v4  ;;  %v5536_v12 = vrot.slane %v427_v6, %v460_v5  ;;  %v5613_v44 = vld [vmem:[#allocation2 + $0x60] sm:$0xff]  ;;  %v5615_v45 = vld [vmem:[#allocation2 + $0x88] sm:$0xff]  ;;  %s4088_s20 = sshll.u32 %s7304_s18, 6  ;;  %s5405_s29 = smov 111  }
  0x34   : > { %v5542_v15 = vrot.slane %v427_v6, %v456_v7  ;;  %v5546_v16 = vrot.slane %v427_v6, %v464_v8  ;;  %v5566_v21 = vrot.slane %v427_v6, %v448_v19  ;;  %v478_v22 = vrot.slane %v428_v20, %v436_v4  ;;  %v5617_v46 = vld [vmem:[#allocation2 + $0xa8] sm:$0xff]  ;;  %v5632_v50 = vld [vmem:[#allocation2 + $0x80] sm:$0xff]  ;;  %s5406_s30 = smov 104   ;;  %s5407_s12 = smov 103  }
  0x35   : > { %v4758_v13 = vpack.i.bf16 %v5532_v10, %v5530_v9  ;;  %v4768_v14 = vpack.i.bf16 %v5536_v12, %v5534_v11  ;;  %v5573_v26 = vrot.slane %v427_v6, %v468_v24  ;;  %v501_v27 = vrot.slane %v428_v20, %v456_v7  ;;  %v5634_v51 = vld [vmem:[#allocation2 + $0xa0] sm:$0xff]  ;;  %v5636_v52 = vld [vmem:[#allocation2 + $0xc8] sm:$0xff]  ;;  %s5408_s13 = smov 123   ;;  %s5409_s14 = smov 124  }
  0x36   : > { %v4778_v17 = vpack.i.bf16 %v5542_v15, %v5546_v16  ;;  %v4853_v23 = vpack.i.bf16 %v5546_v16, %v5536_v12  ;;  %v4858_v25 = vpack.i.bf16 %v478_v22, %v5566_v21  ;;  %v5622_v47 = vsel %vm862_vm0, %v5530_v9, %v5536_v12  ;;  %7219 = vst [vmem:[#allocation5_spill] sm:$0xff] %v5636_v52  ;;  %v5652_v59 = vld [vmem:[#allocation2 + $0xe8] sm:$0xff]  ;;  %v5654_v60 = vld [vmem:[#allocation2 + $0xc0] sm:$0xff]  ;;  %s5411_s15 = smov 118   ;;  %s5412_s16 = smov 114  }
  0x37   : > { %4759 = vrot.lane.b32.xlu0 %v4758_v13, %s5393_s22  ;;  %4769 = vrot.lane.b32.xlu1 %v4768_v14, %s5393_s22  ;;  %v4868_v28 = vpack.i.bf16 %v501_v27, %v5573_v26  ;;  %v863_v48 = vsel %vm862_vm0, %v5534_v11, %v5542_v15  ;;  %v5630_v49 = vsel %vm862_vm0, %v5532_v10, %v5546_v16  ;;  %v5656_v61 = vld [vmem:[#allocation2 + $0xe0] sm:$0xff]  ;;  %v5661_v2 = vld [vmem:[#allocation2 + $0x108] sm:$0xff]  ;;  %vm913_vm7 = vcmask 1043456   ;;  %s7156_s21 = scalar_lea.vmem %s7180_s11, %s4088_s20 }
  0x38   : > { %v5646_v56 = vsel %vm862_vm0, %v5566_v21, %v5573_v26  ;;  %7220 = vst [vmem:[#allocation6_spill] sm:$0xff] %v5654_v60  ;;  %7221 = vst [vmem:[#allocation7_spill] sm:$0xff] %v5656_v61  ;;  %v5671_v7 = vld [vmem:[#allocation2 + $0x128] sm:$0xff]  ;;  %v5673_v8 = vld [vmem:[#allocation2 + $0x100] sm:$0xff]  ;;  %vm930_vm8 = vcmask 1044480   ;;  %vm947_vm9 = vcmask 1045504  }
  0x39   : > { %7222 = vst [vmem:[#allocation8_spill] sm:$0xff] %v5661_v2  ;;  %7223 = vst [vmem:[#allocation9_spill] sm:$0xff] %v5671_v7  ;;  %v5675_v9 = vld [vmem:[#allocation2 + $0x120] sm:$0xff]  ;;  %v5687_v19 = vld [vmem:[#allocation2 + $0x168] sm:$0xff]  ;;  %vm625_vm10 = vcmask 793600   ;;  %vm964_vm11 = vcmask 1046528  }
  0x3a   : > { %7224 = vst [vmem:[#allocation10_spill] sm:$0xff] %v5673_v8  ;;  %7225 = vst [vmem:[#allocation11_spill] sm:$0xff] %v5675_v9  ;;  %v5689_v20 = vld [vmem:[#allocation2 + $0x140] sm:$0xff]  ;;  %vm654_vm12 = vcmask 678912   ;;  %vm5402_vm13 = vmmov 1   ;;  %vm981_vm15 = vcmask 72704  }
  0x3b   : > { %4764 = vrot.lane.b32.xlu0 %v4758_v13, %s5394_s23  ;;  %4774 = vrot.lane.b32.xlu1 %v4768_v14, %s5394_s23  ;;  %7227 = vst [vmem:[#allocation13_spill] sm:$0xff] %v5687_v19  ;;  %7228 = vst [vmem:[#allocation14_spill] sm:$0xff] %v5689_v20 }
  0x3c   : > { %vm5853_vm14 = vmpackc.low %vm862_vm0, %vm5402_vm13  ;;  %vm7252_vm13 = vcmask 801792  }
  0x3f   : > { %4779 = vrot.lane.b32.xlu0 %v4778_v17, %s5394_s23  ;;  %4784 = vrot.lane.b32.xlu1 %v4758_v13, %s5395_s24 }
  0x43   : > { %4789 = vrot.lane.b32.xlu0 %v4768_v14, %s5395_s24  ;;  %4794 = vrot.lane.b32.xlu1 %v4758_v13, %s5396_s25 }
  0x47   : > { %4799 = vrot.lane.b32.xlu0 %v4768_v14, %s5396_s25  ;;  %4804 = vrot.lane.b32.xlu1 %v4778_v17, %s5396_s25 }
  0x4b   : > { %4809 = vrot.lane.b32.xlu0 %v4778_v17, %s5393_s22  ;;  %4814 = vrot.lane.b32.xlu1 %v4758_v13, %s5397_s26 }
  0x4f   : > { %4819 = vrot.lane.b32.xlu0 %v4768_v14, %s5397_s26  ;;  %4824 = vrot.lane.b32.xlu1 %v4778_v17, %s5395_s24 }
  0x53   : > { %4829 = vrot.lane.b32.xlu0 %v4778_v17, %s5397_s26  ;;  %4834 = vrot.lane.b32.xlu1 %v4758_v13, %s5399_s27 }
  0x57   : > { %4839 = vrot.lane.b32.xlu0 %v4768_v14, %s5399_s27  ;;  %4844 = vrot.lane.b32.xlu1 %v4778_v17, %s5399_s27  ;;  %v5685_v17 = vld [vmem:[#allocation2 + $0x148] sm:$0xff] }
  0x58   : > { %7226 = vst [vmem:[#allocation12_spill] sm:$0xff] %v5685_v17 }
  0x5b   : > { %4849 = vrot.lane.b32.xlu0 %v4758_v13, %s5400_s28  ;;  %673 = vrot.lane.b32.xlu1 %v5534_v11, %s5400_s28 }
  0x5f   : > { %4854 = vrot.lane.b32.xlu0 %v4853_v23, %s5400_s28  ;;  %688 = vrot.lane.b32.xlu1 %v5542_v15, %s5400_s28 }
  0x63   : > { %4859 = vrot.lane.b32.xlu0 %v4858_v25, %s5393_s22  ;;  %4864 = vrot.lane.b32.xlu1 %v4858_v25, %s5394_s23 }
  0x67   : > { %4869 = vrot.lane.b32.xlu0 %v4868_v28, %s5394_s23  ;;  %4874 = vrot.lane.b32.xlu1 %v4858_v25, %s5395_s24 }
  0x6b   : > { %4879 = vrot.lane.b32.xlu0 %v4858_v25, %s5396_s25  ;;  %4884 = vrot.lane.b32.xlu1 %v4868_v28, %s5396_s25 }
  0x6f   : > { %4889 = vrot.lane.b32.xlu0 %v4868_v28, %s5393_s22  ;;  %4894 = vrot.lane.b32.xlu1 %v4858_v25, %s5397_s26 }
  0x73   : > { %4899 = vrot.lane.b32.xlu0 %v4868_v28, %s5395_s24  ;;  %4904 = vrot.lane.b32.xlu1 %v4868_v28, %s5397_s26  ;;  %s6340_s26 = scalar_lea.vmem %s7178_s9, %s4088_s20 }
  0x77   : > { %4909 = vrot.lane.b32.xlu0 %v4858_v25, %s5399_s27  ;;  %4914 = vrot.lane.b32.xlu1 %v4868_v28, %s5399_s27  ;;  %s5403_s27 = smov 120  }
  0x7b   : > { %4919 = vrot.lane.b32.xlu0 %v4858_v25, %s5400_s28  ;;  %4924 = vrot.lane.b32.xlu1 %v4868_v28, %s5400_s28  ;;  %v5695_v28 = vld [vmem:[#allocation2 + $0x160] sm:$0xff]  ;;  %s5404_s28 = smov 119  }
  0x7c   : > { %7229 = vst [vmem:[#allocation15_spill] sm:$0xff] %v5695_v28 }
  0x7f   : > { %1662 = vperm.xlu0 %4928, %v431_v29   ;;  %1667 = vperm.xlu1 %4929, %v432_v30   ;;  %v5697_v29 = vld [vmem:[#allocation2 + $0x188] sm:$0xff] }
  0x80   : > { %7230 = vst [vmem:[#allocation16_spill] sm:$0xff] %v5697_v29  ;;  %v5699_v30 = vld [vmem:[#allocation2 + $0x1a8] sm:$0xff] }
  0x81   : > { %7231 = vst [vmem:[#allocation17_spill] sm:$0xff] %v5699_v30 }
  0xa9   : > { %v5594_v33 = vpop.permute.xlu0 %4759  ;;  %v5596_v34 = vpop.permute.xlu1 %4769 }
  0xaa   : > { %v7187_v38 = vunpack.i.h.bf16 %v5594_v33  ;;  %v4761_v39 = vunpack.i.l.bf16 %v5594_v33  ;;  %v4771_v40 = vunpack.i.l.bf16 %v5596_v34  ;;  %v4772_v6 = vunpack.i.h.bf16 %v5596_v34 }
  0xac   : > { %v532_v53 = vsel %vm530_vm1, %v4761_v39, %v7187_v38  ;;  %v531_v62 = vsel %vm530_vm1, %v4771_v40, %v4761_v39 }
  0xad   : > { %v5641_v54 = vpop.permute.xlu0 %4764  ;;  %v4775_v55 = vpop.permute.xlu1 %4774  ;;  %v703_v21 = vrot.slane %v532_v53, 6  ;;  %v702_v22 = vrot.slane %v531_v62, 6  ;;  %v5723_v14 = vsel %vm862_vm0, %v5536_v12, %v532_v53  ;;  %v867_v12 = vsel %vm862_vm0, %v5542_v15, %v531_v62 }
  0xae   : > { %v7185_v63 = vunpack.i.h.bf16 %v5641_v54  ;;  %v4766_v0 = vunpack.i.l.bf16 %v5641_v54  ;;  %v4776_v1 = vunpack.i.l.bf16 %v4775_v55  ;;  %v4777_v23 = vunpack.i.h.bf16 %v4775_v55 }
  0xaf   : > { %v880_v13 = vsel %vm879_vm2, %v863_v48, %v702_v22 }
  0xb0   : > { %v491_v10 = vsel %vm7213_vm3, %v4766_v0, %v7185_v63  ;;  %v490_v11 = vsel %vm7213_vm3, %v4776_v1, %v4766_v0  ;;  %v881_v1 = vsel %vm879_vm2, %v5622_v47, %v703_v21 }
  0xb1   : > { %v734_v24 = vrot.slane %v490_v11, 5  ;;  %v5691_v25 = vpop.permute.xlu0 %4779  ;;  %v5693_v27 = vpop.permute.xlu1 %4784  ;;  %v735_v55 = vrot.slane %v491_v10, 5 }
  0xb2   : > { %v4782_v31 = vunpack.i.h.bf16 %v5691_v25  ;;  %v7184_v39 = vunpack.i.l.bf16 %v5691_v25  ;;  %v7183_v40 = vunpack.i.h.bf16 %v5693_v27  ;;  %v4786_v0 = vunpack.i.l.bf16 %v5693_v27 }
  0xb3   : > { %v897_v48 = vsel %vm896_vm4, %v880_v13, %v734_v24  ;;  %v898_v57 = vsel %vm896_vm4, %v881_v1, %v735_v55 }
  0xb4   : > { %v5715_v5 = vsel %vm7213_vm3, %v4777_v23, %v7184_v39  ;;  %v5727_v34 = vsel %vm7213_vm3, %v4782_v31, %v4777_v23  ;;  %v5732_v3 = vsel %vm549_vm5, %v4786_v0, %v7183_v40 }
  0xb5   : > { %v5734_v58 = vpop.permute.xlu0 %4789  ;;  %v5736_v4 = vpop.permute.xlu1 %4794  ;;  %v7196_v53 = vrot.slane %v5715_v5, 5  ;;  %v738_v40 = vrot.slane %v5727_v34, 5  ;;  %v871_v47 = vsel %vm862_vm0, %v490_v11, %v5727_v34  ;;  %v872_v15 = vsel %vm862_vm0, %v491_v10, %v5715_v5 }
  0xb6   : > { %v4791_v22 = vunpack.i.l.bf16 %v5734_v58  ;;  %v7186_v23 = vunpack.i.h.bf16 %v5736_v4  ;;  %v4796_v31 = vunpack.i.l.bf16 %v5736_v4  ;;  %v711_v62 = vrot.slane %v5732_v3, 6 }
  0xb7   : > { %v783_v39 = vrot.slane %v5732_v3, 3  ;;  %v5767_v10 = vsel %vm862_vm0, %v5715_v5, %v5732_v3  ;;  %v4792_v13 = vunpack.i.h.bf16 %v5734_v58  ;;  %v914_v58 = vsel %vm913_vm7, %v897_v48, %v738_v40 }
  0xb8   : > { %v5756_v21 = vsel %vm549_vm5, %v4791_v22, %v4786_v0  ;;  %v598_v24 = vsel %vm7202_vm6, %v4796_v31, %v7186_v23  ;;  %v915_v0 = vsel %vm913_vm7, %v898_v57, %v7196_v53  ;;  %v889_v29 = vsel %vm879_vm2, %v872_v15, %v711_v62 }
  0xb9   : > { %v4800_v55 = vpop.permute.xlu0 %4799  ;;  %v5761_v1 = vpop.permute.xlu1 %4804  ;;  %v710_v11 = vrot.slane %v5756_v21, 6  ;;  %v782_v63 = vrot.slane %v5756_v21, 3  ;;  %v743_v22 = vrot.slane %v598_v24, 5  ;;  %v815_v23 = vrot.slane %v598_v24, 2 }
  0xba   : > { %v4802_v38 = vunpack.i.h.bf16 %v4800_v55  ;;  %v4801_v18 = vunpack.i.l.bf16 %v4800_v55  ;;  %v4807_v30 = vunpack.i.h.bf16 %v5761_v1  ;;  %v7197_v20 = vunpack.i.l.bf16 %v5761_v1 }
  0xbb   : > { %v766_v28 = vrot.slane %v5756_v21, 5  ;;  %v932_v24 = vsel %vm930_vm8, %v915_v0, %v783_v39  ;;  %v875_v15 = vsel %vm862_vm0, %v5727_v34, %v5756_v21  ;;  %v931_v55 = vsel %vm930_vm8, %v914_v58, %v782_v63 }
  0xbc   : > { %v5780_v17 = vsel %vm7202_vm6, %v4801_v18, %v4796_v31  ;;  %v5794_v53 = vsel %vm879_vm2, %v871_v47, %v710_v11  ;;  %v906_v18 = vsel %vm896_vm4, %v889_v29, %v743_v22  ;;  %v5798_v31 = vsel %vm7202_vm6, %v4807_v30, %v4802_v38 }
  0xbd   : > { %v5782_v19 = vpop.permute.xlu0 %4809  ;;  %v5784_v57 = vpop.permute.xlu1 %4814  ;;  %v949_v48 = vsel %vm947_vm9, %v932_v24, %v815_v23  ;;  %v814_v34 = vrot.slane %v5780_v17, 2  ;;  %v5808_v63 = vsel %vm7202_vm6, %v4802_v38, %v7197_v20  ;;  %vm683_vm6 = vcmask 670720  }
  0xbe   : > { %v4812_v62 = vunpack.i.h.bf16 %v5782_v19  ;;  %v7198_v39 = vunpack.i.l.bf16 %v5782_v19  ;;  %v4816_v23 = vunpack.i.l.bf16 %v5784_v57  ;;  %v747_v38 = vrot.slane %v5808_v63, 5 }
  0xc0   : > { %v568_v21 = vsel %vm530_vm1, %v4812_v62, %v4772_v6  ;;  %v569_v29 = vsel %vm530_vm1, %v4772_v6, %v7198_v39 }
  0xc1   : > { %v706_v30 = vrot.slane %v568_v21, 6  ;;  %v4820_v11 = vpop.permute.xlu0 %4819  ;;  %v5815_v22 = vpop.permute.xlu1 %4824  ;;  %v707_v58 = vrot.slane %v569_v29, 6  ;;  %v948_v29 = vsel %vm947_vm9, %v931_v55, %v814_v34  ;;  %v5842_v55 = vsel %vm913_vm7, %v906_v18, %v747_v38 }
  0xc2   : > { %v4827_v62 = vunpack.i.h.bf16 %v5815_v22  ;;  %v7201_v21 = vunpack.i.l.bf16 %v5815_v22  ;;  %v4822_v8 = vunpack.i.h.bf16 %v4820_v11  ;;  %v4821_v9 = vunpack.i.l.bf16 %v4820_v11 }
  0xc3   : > { %v884_v6 = vsel %vm879_vm2, %v867_v12, %v706_v30  ;;  %v885_v0 = vsel %vm879_vm2, %v5723_v14, %v707_v58  ;;  %v7232_v12 = vunpack.i.h.bf16 %v5784_v57  ;;  %v7233_v34 = vrot.slane %v5715_v5, 5 }
  0xc4   : > { %v901_v47 = vsel %vm896_vm4, %v884_v6, %v738_v40  ;;  %v582_v24 = vsel %vm549_vm5, %v4827_v62, %v4792_v13  ;;  %v583_v20 = vsel %vm549_vm5, %v4792_v13, %v7201_v21 }
  0xc5   : > { %v5835_v30 = vsel %vm625_vm10, %v4816_v23, %v7232_v12  ;;  %v5837_v39 = vpop.permute.xlu0 %4829  ;;  %v5839_v14 = vpop.permute.xlu1 %4834  ;;  %v714_v40 = vrot.slane %v582_v24, 6  ;;  %v786_v58 = vrot.slane %v582_v24, 3  ;;  %v715_v62 = vrot.slane %v583_v20, 6 }
  0xc6   : > { %v902_v11 = vsel %vm896_vm4, %v885_v0, %v7233_v34  ;;  %v918_v13 = vsel %vm913_vm7, %v901_v47, %v766_v28  ;;  %v771_v6 = vrot.slane %v5835_v30, 5  ;;  %v7234_v12 = vrot.slane %v5808_v63, 2 }
  0xc7   : > { %v893_v5 = vsel %vm879_vm2, %v5767_v10, %v715_v62  ;;  %v4832_v28 = vunpack.i.h.bf16 %v5837_v39  ;;  %v7206_v0 = vunpack.i.l.bf16 %v5837_v39  ;;  %v4836_v34 = vunpack.i.l.bf16 %v5839_v14 }
  0xc8   : > { %v966_v21 = vsel %vm964_vm11, %v949_v48, %v7234_v12  ;;  %v910_v47 = vsel %vm896_vm4, %v893_v5, %v747_v38  ;;  %v7207_v48 = vunpack.i.h.bf16 %v5839_v14  ;;  %v5866_v12 = vsel %vm625_vm10, %v4821_v9, %v4816_v23 }
  0xc9   : > { %v4091_v18 = vpack.c.bf16 %v5835_v30, %v966_v21  ;;  %v4840_v2 = vpop.permute.xlu0 %4839  ;;  %v5868_v7 = vpop.permute.xlu1 %4844  ;;  %v787_v60 = vrot.slane %v583_v20, 3  ;;  %v892_v10 = vsel %vm879_vm2, %v875_v15, %v714_v40  ;;  %v935_v21 = vsel %vm930_vm8, %v918_v13, %v786_v58 }
  0xca   : > { %7237 = vst [vmem:[#allocation18_spill] sm:$0xff] %v5868_v7  ;;  %v791_v62 = vrot.slane %v5835_v30, 3  ;;  %v847_v38 = vrot.slane %v5835_v30, 2  ;;  %v5877_v5 = vsel %vm913_vm7, %v910_v47, %v771_v6  ;;  %v5880_v9 = vsel %vm625_vm10, %v4832_v28, %v4822_v8 }
  0xcb   : > { %4093 = vmatprep.subr.msk.bf16.mxu0 %vm5853_vm14, %v4091_v18  ;;  %v5885_v20 = vsel %vm625_vm10, %v4822_v8, %v7206_v0  ;;  %v656_v15 = vsel %vm654_vm12, %v4836_v34, %v7207_v48  ;;  %v790_v23 = vrot.slane %v5866_v12, 3  ;;  %v7238_v40 = vrot.slane %v5798_v31, 2 }
  0xcc   : > { %v4842_v58 = vunpack.i.h.bf16 %v4840_v2  ;;  %v4841_v6 = vunpack.i.l.bf16 %v4840_v2  ;;  %v4847_v18 = vunpack.i.h.bf16 %v5868_v7  ;;  %v7210_v28 = vunpack.i.l.bf16 %v5868_v7 }
  0xcd   : > { %v965_v30 = vsel %vm964_vm11, %v948_v29, %v7238_v40  ;;  %v5897_v8 = vpop.permute.xlu0 %4849  ;;  %v674_v47 = vpop.permute.xlu1 %673  ;;  %v7239_v0 = vrot.slane %v5732_v3, 5  ;;  %v7240_v29 = vrot.slane %v5780_v17, 5 }
  0xce   : > { %v4094_v13 = vpack.c.bf16 %v5866_v12, %v965_v30  ;;  %v4851_v52 = vunpack.i.l.bf16 %v5897_v8  ;;  %v655_v40 = vsel %vm654_vm12, %v4841_v6, %v4836_v34  ;;  %v669_v30 = vsel %vm654_vm12, %v4847_v18, %v4842_v58 }
  0xcf   : > { %v919_v48 = vsel %vm913_vm7, %v902_v11, %v7239_v0  ;;  %v905_v2 = vsel %vm896_vm4, %v5794_v53, %v7240_v29  ;;  %v670_v3 = vsel %vm654_vm12, %v4842_v58, %v7210_v28  ;;  %v5918_v11 = vld [vmem:[%s7170_s1] sm:$0xff]  ;;  %v823_v0 = vrot.slane %v656_v15, 2 }
  0xd0   : > { %4096 = vmatpush1.bf16.msk.msra.mxu0 %vm5853_vm14, %v4094_v13  ;;  %v936_v17 = vsel %vm930_vm8, %v919_v48, %v787_v60  ;;  %v770_v53 = vrot.slane %v5866_v12, 5  ;;  %v822_v29 = vrot.slane %v655_v40, 2  ;;  %v7241_v13 = vrot.slane %v5808_v63, 2 }
  0xd1   : > { %v846_v6 = vrot.slane %v5866_v12, 2  ;;  %v827_v18 = vrot.slane %v670_v3, 2  ;;  %v826_v28 = vrot.slane %v669_v30, 2  ;;  %v5927_v61 = vpop.permute.xlu0 %4854  ;;  %v689_v7 = vpop.permute.xlu1 %688  ;;  %v7242_v48 = vunpack.i.h.bf16 %v5897_v8 }
  0xd2   : > { %v953_v34 = vsel %vm947_vm9, %v936_v17, %v7241_v13  ;;  %v7243_v15 = vrot.slane %v5798_v31, 5  ;;  %v7244_v40 = vrot.slane %v5798_v31, 2  ;;  %v7245_v3 = vmov 0.0  }
  0xd3   : > { %v970_v58 = vsel %vm964_vm11, %v953_v34, %v847_v38  ;;  %4032 = vmatmul.mubr.msk.f32.vlgmr.msra.gmra.mrb[0].mxu0 %vm981_vm15, %v5918_v11  ;;  %v685_v63 = vsel %vm683_vm6, %v4851_v52, %v7242_v48  ;;  %v7212_v13 = vunpack.i.h.bf16 %v5927_v61  ;;  %v4856_v34 = vunpack.i.l.bf16 %v5927_v61 }
  0xd4   : > { %v4103_v60 = vpack.c.bf16 %v5885_v20, %v970_v58  ;;  %v922_v12 = vsel %vm913_vm7, %v905_v2, %v7243_v15  ;;  %v952_v38 = vsel %vm947_vm9, %v935_v21, %v7244_v40  ;;  %1090 = vmatprep.mubr.f32.mxu0 %v7245_v3  ;;  %v684_v58 = vsel %vm683_vm6, %v674_v47, %v4851_v52  ;;  %v5954_v21 = vld [vmem:[%s7170_s1 + $0x8] sm:$0xff] }
  0xd5   : > { %v939_v30 = vsel %vm930_vm8, %v922_v12, %v790_v23  ;;  %v969_v17 = vsel %vm964_vm11, %v952_v38, %v846_v6  ;;  %v7246_v23 = vmov %v7243_v15  ;;  %v794_v15 = vrot.slane %v5880_v9, 3  ;;  %v4860_v47 = vpop.permute.xlu0 %4859 }
  0xd6   : > { %4105 = vmatprep.subr.msk.bf16.mxu0 %vm5853_vm14, %v4103_v60  ;;  %v956_v2 = vsel %vm947_vm9, %v939_v30, %v822_v29  ;;  %v4106_v48 = vpack.c.bf16 %v5880_v9, %v969_v17  ;;  %v909_v6 = vsel %vm896_vm4, %v892_v10, %v7246_v23  ;;  %v795_v12 = vrot.slane %v5885_v20, 3  ;;  %v4865_v29 = vpop.permute.xlu1 %4864 }
  0xd7   : > { %v973_v60 = vsel %vm964_vm11, %v956_v2, %v826_v28  ;;  %v940_v52 = vsel %vm930_vm8, %v5842_v55, %v791_v62  ;;  %v851_v40 = vrot.slane %v685_v63, 2  ;;  %v926_v38 = vsel %vm913_vm7, %v909_v6, %v770_v53  ;;  %4033 = vmatmul.mubr.msk.f32.gmra.mrb[2].mxu0 %vm981_vm15, %v5954_v21 }
  0xd8   : > { %4108 = vmatpush1.bf16.msk.msra.mxu0 %vm5853_vm14, %v4106_v48  ;;  %v957_v31 = vsel %vm947_vm9, %v940_v52, %v823_v0  ;;  %v4862_v10 = vunpack.i.h.bf16 %v4860_v47  ;;  %v850_v30 = vrot.slane %v684_v58, 2  ;;  %v699_v9 = vsel %vm683_vm6, %v4856_v34, %v7212_v13  ;;  %1238 = vmatprep.mubr.f32.mxu0 %v7245_v3 }
  0xd9   : > { %v974_v55 = vsel %vm964_vm11, %v957_v31, %v827_v18  ;;  %v4861_v62 = vunpack.i.l.bf16 %v4860_v47  ;;  %v4118_v20 = vpack.c.bf16 %v684_v58, %v973_v60  ;;  %v4867_v2 = vunpack.i.h.bf16 %v4865_v29  ;;  %v4870_v13 = vpop.permute.xlu0 %4869 }
  0xda   : > { %v4115_v17 = vpack.c.bf16 %v685_v63, %v974_v55  ;;  %v4866_v53 = vunpack.i.l.bf16 %v4865_v29  ;;  %v943_v0 = vsel %vm930_vm8, %v926_v38, %v794_v15  ;;  %v7247_v48 = vunpack.i.h.bf16 %v5594_v33  ;;  %v4875_v31 = vpop.permute.xlu1 %4874 }
  0xdb   : > { %v534_v6 = vsel %vm530_vm1, %v4861_v62, %v4862_v10  ;;  %v944_v52 = vsel %vm930_vm8, %v5877_v5, %v795_v12  ;;  %v698_v58 = vsel %vm683_vm6, %v689_v7, %v4856_v34  ;;  %v960_v60 = vsel %vm947_vm9, %v943_v0, %v826_v28  ;;  %4040 = vmatmul.mubr.msk.f32.vlgmr.msra.gmra.mrb[4].mxu0 %vm981_vm15, %v5918_v11 }
  0xdc   : > { %v533_v23 = vsel %vm530_vm1, %v7247_v48, %v4861_v62  ;;  %4117 = vmatprep.subr.msk.bf16.mxu0 %vm5853_vm14, %v4115_v17  ;;  %v961_v15 = vsel %vm947_vm9, %v944_v52, %v827_v18  ;;  %v977_v33 = vsel %vm964_vm11, %v960_v60, %v850_v30  ;;  %v7248_v47 = vunpack.i.h.bf16 %v5641_v54  ;;  %1244 = vmatprep.mubr.f32.mxu0 %v7245_v3 }
  0xdd   : > { %v704_v63 = vrot.slane %v533_v23, 6  ;;  %v978_v12 = vsel %vm964_vm11, %v961_v15, %v851_v40  ;;  %v4872_v7 = vunpack.i.h.bf16 %v4870_v13  ;;  %4120 = vmatpush1.bf16.msk.msra.mxu0 %vm5853_vm14, %v4118_v20  ;;  %v705_v28 = vrot.slane %v534_v6, 6  ;;  %v4880_v55 = vpop.permute.xlu0 %4879 }
  0xde   : > { %v492_v5 = vsel %vm7213_vm3, %v7248_v47, %v4866_v53  ;;  %v5999_v18 = vsel %vm7213_vm3, %v4866_v53, %v4867_v2  ;;  %v4127_v38 = vpack.c.bf16 %v699_v9, %v978_v12  ;;  %v4871_v54 = vunpack.i.l.bf16 %v4870_v13  ;;  %v6002_v40 = vpop.permute.xlu1 %4884 }
  0xdf   : > { %v882_v34 = vsel %vm879_vm2, %v5630_v49, %v704_v63  ;;  %v736_v29 = vrot.slane %v492_v5, 5  ;;  %v4877_v10 = vunpack.i.h.bf16 %v4875_v31  ;;  %v4876_v30 = vunpack.i.l.bf16 %v4875_v31  ;;  %4041 = vmatmul.mubr.msk.f32.gmra.mrb[6].mxu0 %vm981_vm15, %v5954_v21 }
  0xe0   : > { %v4130_v62 = vpack.c.bf16 %v698_v58, %v977_v33  ;;  %v6006_v20 = vsel %vm862_vm0, %v5546_v16, %v533_v23  ;;  %v6010_v49 = vsel %vm862_vm0, %v5573_v26, %v534_v6  ;;  %v4882_v17 = vunpack.i.h.bf16 %v4880_v55  ;;  %4129 = vmatprep.subr.msk.bf16.mxu0 %vm5853_vm14, %v4127_v38  ;;  %1392 = vmatprep.mubr.f32.mxu0 %v7245_v3 }
  0xe1   : > { %v7249_v13 = vunpack.i.l.bf16 %v5691_v25  ;;  %v6022_v2 = vsel %vm7213_vm3, %v4871_v54, %v4872_v7  ;;  %v7250_v16 = vunpack.i.h.bf16 %v5693_v27  ;;  %v4881_v53 = vunpack.i.l.bf16 %v4880_v55 }
  0xe2   : > { %v6031_v0 = vsel %vm879_vm2, %v5646_v56, %v705_v28  ;;  %v6035_v25 = vsel %vm896_vm4, %v882_v34, %v736_v29  ;;  %v4886_v23 = vunpack.i.l.bf16 %v6002_v40  ;;  %v6041_v27 = vsel %vm549_vm5, %v4876_v30, %v4877_v10  ;;  %v4890_v56 = vpop.permute.xlu0 %4889  ;;  %v6045_v58 = vpop.permute.xlu1 %4894 }
  0xe3   : > { %v6019_v9 = vsel %vm7213_vm3, %v7249_v13, %v4871_v54  ;;  %v6027_v26 = vsel %vm549_vm5, %v7250_v16, %v4876_v30  ;;  %v4887_v31 = vunpack.i.h.bf16 %v6002_v40  ;;  %v741_v60 = vrot.slane %v6022_v2, 5  ;;  %4048 = vmatmul.mubr.msk.f32.vlgmr.msra.gmra.mrb[8].mxu0 %vm981_vm15, %v5918_v11  ;;  %vm7253_vm3 = vmmov %vm7252_vm13 }
  0xe4   : > { %v740_v6 = vrot.slane %v6019_v9, 5  ;;  %v712_v52 = vrot.slane %v6027_v26, 6  ;;  %v873_v63 = vsel %vm862_vm0, %v492_v5, %v6019_v9  ;;  %v874_v15 = vsel %vm862_vm0, %v5999_v18, %v6022_v2  ;;  %4132 = vmatpush1.bf16.msk.msra.mxu0 %vm5853_vm14, %v4130_v62  ;;  %1398 = vmatprep.mubr.f32.mxu0 %v7245_v3 }
  0xe5   : > { %v713_v33 = vrot.slane %v6041_v27, 6  ;;  %v768_v47 = vrot.slane %v6027_v26, 5  ;;  %v7251_v7 = vunpack.i.h.bf16 %v5736_v4  ;;  %v6064_v5 = vsel %vm7253_vm3, %v4881_v53, %v4882_v17 }
  0xe6   : > { %v877_v29 = vsel %vm862_vm0, %v6019_v9, %v6027_v26  ;;  %v7254_v4 = vunpack.i.l.bf16 %v5761_v1  ;;  %v878_v10 = vsel %vm862_vm0, %v6022_v2, %v6041_v27  ;;  %v745_v30 = vrot.slane %v6064_v5, 5  ;;  %v4900_v17 = vpop.permute.xlu0 %4899  ;;  %v4905_v13 = vpop.permute.xlu1 %4904  ;;  %vm7261_vm0 = vmmov %vm7253_vm3 }
  0xe7   : > { %v6061_v28 = vsel %vm7252_vm13, %v7251_v7, %v4881_v53  ;;  %vm7255_vm13 = vmmov %vm7253_vm3  ;;  %v890_v55 = vsel %vm879_vm2, %v873_v63, %v712_v52  ;;  %v4892_v62 = vunpack.i.h.bf16 %v4890_v56  ;;  %v7256_v16 = vpack.c.bf16 %v5598_v35, %v5592_v32  ;;  %4049 = vmatmul.mubr.msk.f32.gmra.mrb[10].mxu0 %vm981_vm15, %v5954_v21 }
  0xe8   : > { %v744_v38 = vrot.slane %v6061_v28, 5  ;;  %v6078_v54 = vsel %vm7255_vm13, %v7254_v4, %v4886_v23  ;;  %v891_v7 = vsel %vm879_vm2, %v874_v15, %v713_v33  ;;  %v4891_v4 = vunpack.i.l.bf16 %v4890_v56  ;;  %1546 = vmatprep.mubr.f32.mxu0 %v7245_v3 }
  0xe9   : > { %4140 = vmatprep.subr.bf16.mxu0 %v7256_v16  ;;  %v748_v34 = vrot.slane %v6078_v54, 5  ;;  %v4902_v52 = vunpack.i.h.bf16 %v4900_v17  ;;  %v4901_v63 = vunpack.i.l.bf16 %v4900_v17  ;;  %v7257_v32 = vunpack.i.l.bf16 %v5782_v19 }
  0xea   : > { %v907_v48 = vsel %vm896_vm4, %v890_v55, %v744_v38  ;;  %v571_v16 = vsel %vm530_vm1, %v4891_v4, %v4892_v62  ;;  %v4906_v56 = vunpack.i.l.bf16 %v4905_v13  ;;  %v7258_v12 = vunpack.i.l.bf16 %v5815_v22 }
  0xeb   : > { %v570_v35 = vsel %vm530_vm1, %v7257_v32, %v4891_v4  ;;  %v709_v33 = vrot.slane %v571_v16, 6  ;;  %v4907_v53 = vunpack.i.h.bf16 %v4905_v13  ;;  %v6106_v17 = vsel %vm896_vm4, %v891_v7, %v745_v30  ;;  %4056 = vmatmul.mubr.msk.f32.vlgmr.msra.gmra.mrb[12].mxu0 %vm981_vm15, %v5918_v11 }
  0xec   : > { %v708_v15 = vrot.slane %v570_v35, 6  ;;  %v584_v1 = vsel %vm549_vm5, %v7258_v12, %v4901_v63  ;;  %v4897_v38 = vunpack.i.h.bf16 %v6045_v58  ;;  %v6110_v19 = vsel %vm549_vm5, %v4901_v63, %v4902_v52  ;;  %1552 = vmatprep.mubr.f32.mxu0 %v7245_v3 }
  0xed   : > { %v716_v55 = vrot.slane %v584_v1, 6  ;;  %v887_v4 = vsel %vm879_vm2, %v6010_v49, %v709_v33  ;;  %v4896_v22 = vunpack.i.l.bf16 %v6045_v58  ;;  %v717_v12 = vrot.slane %v6110_v19, 6  ;;  %v4910_v58 = vpop.permute.xlu0 %4909 }
  0xee   : > { %v886_v62 = vsel %vm879_vm2, %v6006_v20, %v708_v15  ;;  %v6121_v30 = vsel %vm913_vm7, %v907_v48, %v748_v34  ;;  %v7259_v20 = vunpack.i.l.bf16 %v5837_v39  ;;  %v788_v52 = vrot.slane %v584_v1, 3 }
  0xef   : > { %v903_v13 = vsel %vm896_vm4, %v886_v62, %v740_v6  ;;  %v894_v7 = vsel %vm879_vm2, %v877_v29, %v716_v55  ;;  %v789_v63 = vrot.slane %v6110_v19, 3  ;;  %v6136_v32 = vsel %vm625_vm10, %v4906_v56, %v4907_v53  ;;  %4057 = vmatmul.mubr.msk.f32.gmra.mrb[14].mxu0 %vm981_vm15, %v5954_v21 }
  0xf0   : > { %v6130_v49 = vsel %vm625_vm10, %v7259_v20, %v4906_v56  ;;  %v911_v48 = vsel %vm896_vm4, %v894_v7, %v748_v34  ;;  %v7260_v35 = vpack.c.bf16 %v5602_v37, %v5600_v36  ;;  %v6144_v39 = vsel %vm896_vm4, %v887_v4, %v741_v60 }
  0xf1   : > { %v920_v29 = vsel %vm913_vm7, %v903_v13, %v768_v47  ;;  %v6152_v34 = vsel %vm7261_vm0, %v4886_v23, %v4887_v31  ;;  %v785_v1 = vrot.slane %v6041_v27, 3  ;;  %v7262_v36 = vpack.c.bf16 %v5609_v42, %v5607_v41  ;;  %v4920_v55 = vpop.permute.xlu0 %4919 }
  0xf2   : > { %4142 = vmatpush1.bf16.msra.mxu0 %v7260_v35  ;;  %v895_v37 = vsel %vm879_vm2, %v878_v10, %v717_v12  ;;  %v796_v53 = vrot.slane %v6130_v49, 3  ;;  %v6163_v47 = vsel %vm625_vm10, %v4896_v22, %v4897_v38  ;;  %v749_v40 = vrot.slane %v6152_v34, 5  ;;  %v4915_v38 = vpop.permute.xlu1 %4914 }
  0xf3   : > { %4144 = vmatprep.subr.bf16.mxu0 %v7262_v36  ;;  %v821_v23 = vrot.slane %v6152_v34, 2  ;;  %v7263_v31 = vrot.slane %v5999_v18, 5  ;;  %v7264_v42 = vunpack.i.h.bf16 %v5784_v57  ;;  %v916_v16 = vsel %vm913_vm7, %v6035_v25, %v740_v6 }
  0xf4   : > { %v937_v56 = vsel %vm930_vm8, %v920_v29, %v788_v52  ;;  %v797_v15 = vrot.slane %v6136_v32, 3  ;;  %v773_v33 = vrot.slane %v6163_v47, 5  ;;  %v7265_v57 = vpack.c.bf16 %v5613_v44, %v5611_v43 }
  0xf5   : > { %v900_v41 = vsel %vm896_vm4, %v6031_v0, %v7263_v31  ;;  %v6174_v10 = vsel %vm625_vm10, %v7264_v42, %v4896_v22  ;;  %v793_v0 = vrot.slane %v6163_v47, 3  ;;  %v849_v9 = vrot.slane %v6163_v47, 2 }
  0xf6   : > { %v917_v18 = vsel %vm913_vm7, %v900_v41, %v741_v60  ;;  %4146 = vmatpush1.bf16.msra.mxu0 %v7265_v57  ;;  %v912_v25 = vsel %vm896_vm4, %v895_v37, %v749_v40  ;;  %v7266_v62 = vpack.c.bf16 %v5617_v46, %v5615_v45  ;;  %v7267_v2 = vrot.slane %v6064_v5, 2 }
  0xf7   : > { %v934_v6 = vsel %vm930_vm8, %v917_v18, %v785_v1  ;;  %v772_v43 = vrot.slane %v6174_v10, 5  ;;  %v7268_v44 = vrot.slane %v6027_v26, 3  ;;  %v4912_v22 = vunpack.i.h.bf16 %v4910_v58 }
  0xf8   : > { %4148 = vmatprep.subr.bf16.mxu0 %v7266_v62  ;;  %v951_v60 = vsel %vm947_vm9, %v934_v6, %v7267_v2  ;;  %v7269_v13 = vrot.slane %v6061_v28, 2  ;;  %v4911_v46 = vunpack.i.l.bf16 %v4910_v58  ;;  %v4917_v7 = vunpack.i.h.bf16 %v4915_v38 }
  0xf9   : > { %v933_v4 = vsel %vm930_vm8, %v916_v16, %v7268_v44  ;;  %v968_v12 = vsel %vm964_vm11, %v951_v60, %v821_v23  ;;  %v7270_v20 = vrot.slane %v6078_v54, 2  ;;  %v4916_v26 = vunpack.i.l.bf16 %v4915_v38  ;;  %v7278_v60 = vld [vmem:[#allocation7_spill] sm:$0xff] }
  0xfa   : > { %v950_v45 = vsel %vm947_vm9, %v933_v4, %v7269_v13  ;;  %v4097_v5 = vpack.c.bf16 %v6163_v47, %v968_v12  ;;  %v4922_v35 = vunpack.i.h.bf16 %v4920_v55  ;;  %v7271_v29 = vpack.c.bf16 %v5634_v51, %v5632_v50  ;;  %v7273_v47 = vld [vmem:[#allocation5_spill] sm:$0xff]  ;;  %v7275_v51 = vld [vmem:[#allocation18_spill] sm:$0xff]  ;;  %v4925_v4 = vpop.permute.xlu1 %4924  ;;  %v7286_v54 = vld [vmem:[#allocation11_spill] sm:$0xff] }
  0xfb   : > { %v967_v52 = vsel %vm964_vm11, %v950_v45, %v7270_v20  ;;  %v7272_v28 = vunpack.i.h.bf16 %v5839_v14  ;;  %v658_v58 = vsel %vm654_vm12, %v4911_v46, %v4912_v22  ;;  %v4921_v37 = vunpack.i.l.bf16 %v4920_v55 }
  0xfc   : > { %4150 = vmatpush1.bf16.msra.mxu0 %v7271_v29  ;;  %v4100_v1 = vpack.c.bf16 %v6174_v10, %v967_v52  ;;  %v7274_v31 = vpack.c.bf16 %v5652_v59, %v7273_v47  ;;  %4099 = vmatprep.subr.msk.bf16.mxu1 %vm5853_vm14, %v4097_v5  ;;  %v792_v41 = vrot.slane %v6174_v10, 3  ;;  %v928_v50 = vsel %vm913_vm7, %v911_v48, %v772_v43  ;;  %v7279_v43 = vld [vmem:[#allocation6_spill] sm:$0xff] }
  0xfd   : > { %v657_v36 = vsel %vm654_vm12, %v7272_v28, %v4911_v46  ;;  %v7276_v42 = vunpack.i.l.bf16 %v7275_v51  ;;  %v672_v16 = vsel %vm654_vm12, %v4916_v26, %v4917_v7  ;;  %v925_v18 = vsel %vm913_vm7, %v6106_v17, %v749_v40  ;;  %v7289_v28 = vld [vmem:[#allocation13_spill] sm:$0xff] }
  0xfe   : > { %4152 = vmatprep.subr.bf16.mxu0 %v7274_v31  ;;  %4102 = vmatpush1.bf16.msk.msra.mxu1 %vm5853_vm14, %v4100_v1  ;;  %v824_v59 = vrot.slane %v657_v36, 2  ;;  %v7277_v6 = vunpack.i.h.bf16 %v5897_v8  ;;  %v929_v48 = vsel %vm913_vm7, %v912_v25, %v773_v33  ;;  %v848_v55 = vrot.slane %v6174_v10, 2  ;;  %v7282_v33 = vld [vmem:[#allocation9_spill] sm:$0xff]  ;;  %v7283_v25 = vld [vmem:[#allocation8_spill] sm:$0xff] }
  0xff   : > { %v671_v14 = vsel %vm654_vm12, %v7276_v42, %v4916_v26  ;;  %v825_v62 = vrot.slane %v658_v58, 2  ;;  %v7280_v44 = vpack.c.bf16 %v7278_v60, %v7279_v43  ;;  %v829_v17 = vrot.slane %v672_v16, 2  ;;  %v7287_v26 = vld [vmem:[#allocation10_spill] sm:$0xff]  ;;  %v1742_v58 = vld [vmem:[#allocation2 + $0x180] sm:$0xff]  ;;  %v7292_v42 = vld [vmem:[#allocation15_spill] sm:$0xff] }
 0x100   : > { %v828_v57 = vrot.slane %v671_v14, 2  ;;  %v686_v38 = vsel %vm683_vm6, %v7277_v6, %v4921_v37  ;;  %v687_v40 = vsel %vm683_vm6, %v4921_v37, %v4922_v35  ;;  %v945_v22 = vsel %vm930_vm8, %v928_v50, %v796_v53  ;;  %v1755_v50 = vld [vmem:[#allocation2 + $0x1e8] sm:$0xff]  ;;  %v1697_v43 = vld [vmem:[#allocation2 + $0x18] sm:$0xff] }
 0x101   : > { %v852_v2 = vrot.slane %v686_v38, 2  ;;  %4154 = vmatpush1.bf16.msra.mxu0 %v7280_v44  ;;  %v7281_v8 = vrot.slane %v6041_v27, 5  ;;  %v7284_v10 = vpack.c.bf16 %v7282_v33, %v7283_v25  ;;  %4036 = vmatmul.mubr.msk.f32.vlgmr.msra.gmra.mrb[0].mxu1 %vm981_vm15, %v5918_v11  ;;  %v941_v13 = vsel %vm930_vm8, %v6121_v30, %v792_v41  ;;  %v1751_v41 = vld [vmem:[#allocation2 + $0x1c8] sm:$0xff]  ;;  %v1701_v44 = vld [vmem:[#allocation2 + $0x38] sm:$0xff] }
 0x102   : > { %v962_v45 = vsel %vm947_vm9, %v945_v22, %v828_v57  ;;  %v7285_v27 = vmov %v7270_v20  ;;  %v853_v46 = vrot.slane %v687_v40, 2  ;;  %v958_v7 = vsel %vm947_vm9, %v941_v13, %v824_v59  ;;  %1167 = vmatprep.mubr.f32.mxu1 %v7245_v3  ;;  %v7296_v59 = vld [vmem:[#allocation16_spill] sm:$0xff]  ;;  %v1696_v22 = vld [vmem:[#allocation2 + $0x10] sm:$0xff] }
 0x103   : > { %v921_v12 = vsel %vm913_vm7, %v6144_v39, %v7281_v8  ;;  %4156 = vmatprep.subr.bf16.mxu0 %v7284_v10  ;;  %v954_v39 = vsel %vm947_vm9, %v937_v56, %v7285_v27  ;;  %v4927_v5 = vunpack.i.h.bf16 %v4925_v4  ;;  %v979_v20 = vsel %vm964_vm11, %v962_v45, %v852_v2  ;;  %v1700_v8 = vld [vmem:[#allocation2 + $0x30] sm:$0xff]  ;;  %v1709_v33 = vld [vmem:[#allocation2 + $0x78] sm:$0xff] }
 0x104   : > { %v938_v53 = vsel %vm930_vm8, %v921_v12, %v789_v63  ;;  %v4926_v52 = vunpack.i.l.bf16 %v4925_v4  ;;  %v971_v19 = vsel %vm964_vm11, %v954_v39, %v848_v55  ;;  %v942_v63 = vsel %vm930_vm8, %v925_v18, %v793_v0  ;;  %v1746_v0 = vld [vmem:[#allocation2 + $0x1a0] sm:$0xff]  ;;  %v1705_v12 = vld [vmem:[#allocation2 + $0x58] sm:$0xff]  ;;  %v1704_v10 = vld [vmem:[#allocation2 + $0x50] sm:$0xff] }
 0x105   : > { %v955_v30 = vsel %vm947_vm9, %v938_v53, %v821_v23  ;;  %v7288_v56 = vpack.c.bf16 %v7286_v54, %v7287_v26  ;;  %v4112_v29 = vpack.c.bf16 %v6130_v49, %v971_v19  ;;  %v959_v1 = vsel %vm947_vm9, %v942_v63, %v825_v62  ;;  %v7290_v23 = vld [vmem:[#allocation12_spill] sm:$0xff]  ;;  %4037 = vmatmul.mubr.msk.f32.gmra.mrb[2].mxu1 %vm981_vm15, %v5954_v21  ;;  %v7295_v18 = vld [vmem:[#allocation17_spill] sm:$0xff]  ;;  %v1708_v13 = vld [vmem:[#allocation2 + $0x70] sm:$0xff] }
 0x106   : > { %v972_v35 = vsel %vm964_vm11, %v955_v30, %v849_v9  ;;  %v946_v34 = vsel %vm930_vm8, %v929_v48, %v797_v15  ;;  %v7291_v36 = vpack.c.bf16 %v7289_v28, %v7290_v23  ;;  %v976_v9 = vsel %vm964_vm11, %v959_v1, %v829_v17  ;;  %1315 = vmatprep.mubr.f32.mxu1 %v7245_v3  ;;  %v1750_v48 = vld [vmem:[#allocation2 + $0x1c0] sm:$0xff]  ;;  %v1713_v45 = vld [vmem:[#allocation2 + $0x98] sm:$0xff]  ;;  %v1712_v39 = vld [vmem:[#allocation2 + $0x90] sm:$0xff] }
 0x107   : > { %4158 = vmatpush1.bf16.msra.mxu0 %v7288_v56  ;;  %v4109_v37 = vpack.c.bf16 %v6136_v32, %v972_v35  ;;  %v963_v49 = vsel %vm947_vm9, %v946_v34, %v829_v17  ;;  %v701_v47 = vsel %vm683_vm6, %v4926_v52, %v4927_v5  ;;  %v4121_v15 = vpack.c.bf16 %v687_v40, %v976_v9  ;;  %v7293_v32 = vld [vmem:[#allocation14_spill] sm:$0xff]  ;;  %v1754_v55 = vld [vmem:[#allocation2 + $0x1e0] sm:$0xff]  ;;  %v1717_v53 = vld [vmem:[#allocation2 + $0xb8] sm:$0xff] }
 0x108   : > { %4160 = vmatprep.subr.bf16.mxu0 %v7291_v36  ;;  %v980_v31 = vsel %vm964_vm11, %v963_v49, %v853_v46  ;;  %v975_v51 = vsel %vm964_vm11, %v958_v7, %v828_v57  ;;  %v7294_v14 = vpack.c.bf16 %v7292_v42, %v7293_v32  ;;  %v4165_v16 = vpack.c.bf16 %v1746_v0, %v1742_v58  ;;  %v1716_v46 = vld [vmem:[#allocation2 + $0xb0] sm:$0xff]  ;;  %v1721_v7 = vld [vmem:[#allocation2 + $0xd8] sm:$0xff]  ;;  %v1759_v9 = vld [vmem:[#allocation2 + $0x208] sm:$0xff] }
 0x109   : > { %4111 = vmatprep.subr.msk.bf16.mxu1 %vm5853_vm14, %v4109_v37  ;;  %v7297_v6 = vpack.c.bf16 %v7295_v18, %v7296_v59  ;;  %v4133_v57 = vpack.c.bf16 %v701_v47, %v980_v31  ;;  %v4167_v62 = vpack.c.bf16 %v1755_v50, %v1751_v41  ;;  %v4124_v2 = vpack.c.bf16 %v686_v38, %v975_v51  ;;  %v1725_v5 = vld [vmem:[#allocation2 + $0xf8] sm:$0xff]  ;;  %v1720_v30 = vld [vmem:[#allocation2 + $0xd0] sm:$0xff]  ;;  %v1763_v49 = vld [vmem:[#allocation2 + $0x228] sm:$0xff] }
 0x10a   : > { %4114 = vmatpush1.bf16.msk.msra.mxu1 %vm5853_vm14, %v4112_v29  ;;  %v4169_v60 = vpack.c.bf16 %v1754_v55, %v1750_v48  ;;  %v7298_v38 = vunpack.i.h.bf16 %v5927_v61  ;;  %v4267_v40 = vpack.c.bf16 %v1701_v44, %v1697_v43  ;;  %v4269_v61 = vpack.c.bf16 %v1700_v8, %v1696_v22  ;;  %v1724_v19 = vld [vmem:[#allocation2 + $0xf0] sm:$0xff]  ;;  %v1733_v63 = vld [vmem:[#allocation2 + $0x138] sm:$0xff]  ;;  %v1758_v41 = vld [vmem:[#allocation2 + $0x200] sm:$0xff] }
 0x10b   : > { %4162 = vmatpush1.bf16.msra.mxu0 %v7294_v14  ;;  %4123 = vmatprep.subr.msk.bf16.mxu1 %vm5853_vm14, %v4121_v15  ;;  %v4271_v25 = vpack.c.bf16 %v1709_v33, %v1705_v12  ;;  %v4273_v24 = vpack.c.bf16 %v1708_v13, %v1704_v10  ;;  %v4275_v27 = vpack.c.bf16 %v1717_v53, %v1713_v45  ;;  %v1728_v56 = vld [vmem:[#allocation2 + $0x110] sm:$0xff]  ;;  %v1737_v29 = vld [vmem:[#allocation2 + $0x158] sm:$0xff]  ;;  %v1762_v50 = vld [vmem:[#allocation2 + $0x220] sm:$0xff]  ;;  %vm2451_vm2 = vcmask 130048  }
 0x10c   : > { %4164 = vmatprep.subr.bf16.mxu0 %v7297_v6  ;;  %v700_v17 = vsel %vm683_vm6, %v7298_v38, %v4926_v52  ;;  %v4279_v52 = vpack.c.bf16 %v1725_v5, %v1721_v7  ;;  %v4281_v54 = vpack.c.bf16 %v1724_v19, %v1720_v30  ;;  %v1732_v35 = vld [vmem:[#allocation2 + $0x130] sm:$0xff]  ;;  %v1741_v1 = vld [vmem:[#allocation2 + $0x178] sm:$0xff]  ;;  %v4171_v31 = vpack.c.bf16 %v1763_v49, %v1759_v9  ;;  %v1767_v48 = vld [vmem:[#allocation2 + $0x248] sm:$0xff] }
 0x10d   : > { %4044 = vmatmul.mubr.msk.f32.vlgmr.msra.gmra.mrb[4].mxu1 %vm981_vm15, %v5918_v11  ;;  %v4136_v4 = vpack.c.bf16 %v700_v17, %v979_v20  ;;  %v4277_v20 = vpack.c.bf16 %v1716_v46, %v1712_v39  ;;  %v4285_v34 = vpack.c.bf16 %v1732_v35, %v1728_v56  ;;  %v1736_v28 = vld [vmem:[#allocation2 + $0x150] sm:$0xff]  ;;  %v1745_v36 = vld [vmem:[#allocation2 + $0x198] sm:$0xff]  ;;  %v4173_v32 = vpack.c.bf16 %v1762_v50, %v1758_v41  ;;  %v1771_v55 = vld [vmem:[#allocation2 + $0x268] sm:$0xff] }
 0x10e   : > { %4126 = vmatpush1.bf16.msk.msra.mxu1 %vm5853_vm14, %v4124_v2  ;;  %1321 = vmatprep.mubr.f32.mxu1 %v7245_v3  ;;  %v1740_v23 = vld [vmem:[#allocation2 + $0x170] sm:$0xff]  ;;  %v1749_v58 = vld [vmem:[#allocation2 + $0x1b8] sm:$0xff]  ;;  %v1766_v2 = vld [vmem:[#allocation2 + $0x240] sm:$0xff]  ;;  %vm2282_vm3 = vcmask 982016   ;;  %vm2323_vm4 = vcmask 973824   ;;  %vm2384_vm6 = vcmask 908288  }
 0x10f   : > { %4166 = vmatpush1.bf16.msra.mxu0 %v4165_v16  ;;  %4135 = vmatprep.subr.msk.bf16.mxu1 %vm5853_vm14, %v4133_v57  ;;  %v4289_v0 = vpack.c.bf16 %v1740_v23, %v1736_v28  ;;  %v1744_v37 = vld [vmem:[#allocation2 + $0x190] sm:$0xff]  ;;  %v4291_v47 = vpack.c.bf16 %v1749_v58, %v1745_v36  ;;  %v1753_v51 = vld [vmem:[#allocation2 + $0x1d8] sm:$0xff]  ;;  %v1775_v8 = vld [vmem:[#allocation2 + $0x288] sm:$0xff]  ;;  %vm2434_vm7 = vcmask 842752   ;;  %vm3017_vm8 = vcmask 1006592  }
 0x110   : > { %4168 = vmatprep.subr.bf16.mxu0 %v4167_v62  ;;  %v1748_v15 = vld [vmem:[#allocation2 + $0x1b0] sm:$0xff]  ;;  %v1757_v42 = vld [vmem:[#allocation2 + $0x1f8] sm:$0xff]  ;;  %v4175_v62 = vpack.c.bf16 %v1771_v55, %v1767_v48  ;;  %v1779_v12 = vld [vmem:[#allocation2 + $0x2a8] sm:$0xff]  ;;  %vm2984_vm9 = vcmask 1014784   ;;  %vm3114_vm10 = vcmask 998400   ;;  %vm3261_vm11 = vcmask 932864  }
 0x111   : > { %4045 = vmatmul.mubr.msk.f32.gmra.mrb[6].mxu1 %vm981_vm15, %v5954_v21  ;;  %v4293_v14 = vpack.c.bf16 %v1748_v15, %v1744_v37  ;;  %v1752_v16 = vld [vmem:[#allocation2 + $0x1d0] sm:$0xff]  ;;  %v4295_v59 = vpack.c.bf16 %v1757_v42, %v1753_v51  ;;  %v1761_v6 = vld [vmem:[#allocation2 + $0x218] sm:$0xff]  ;;  %v4179_v33 = vpack.c.bf16 %v1779_v12, %v1775_v8  ;;  %v1783_v46 = vld [vmem:[#allocation2 + $0x2c8] sm:$0xff]  ;;  %vm3236_vm12 = vcmask 941056  }
 0x112   : > { %1469 = vmatprep.mubr.f32.mxu1 %v7245_v3  ;;  %v1756_v18 = vld [vmem:[#allocation2 + $0x1f0] sm:$0xff]  ;;  %v1765_v57 = vld [vmem:[#allocation2 + $0x238] sm:$0xff]  ;;  %v1787_v7 = vld [vmem:[#allocation2 + $0x2e8] sm:$0xff] }
 0x113   : > { %4170 = vmatpush1.bf16.msra.mxu0 %v4169_v60  ;;  %v1770_v60 = vld [vmem:[#allocation2 + $0x260] sm:$0xff]  ;;  %v4297_v44 = vpack.c.bf16 %v1756_v18, %v1752_v16  ;;  %v4299_v38 = vpack.c.bf16 %v1765_v57, %v1761_v6  ;;  %v1760_v17 = vld [vmem:[#allocation2 + $0x210] sm:$0xff]  ;;  %v1773_v22 = vld [vmem:[#allocation2 + $0x278] sm:$0xff]  ;;  %v4183_v5 = vpack.c.bf16 %v1787_v7, %v1783_v46 }
 0x114   : > { %4172 = vmatprep.subr.bf16.mxu0 %v4171_v31  ;;  %v4177_v43 = vpack.c.bf16 %v1770_v60, %v1766_v2  ;;  %v1768_v53 = vld [vmem:[#allocation2 + $0x250] sm:$0xff]  ;;  %v1781_v39 = vld [vmem:[#allocation2 + $0x2b8] sm:$0xff]  ;;  %v1791_v56 = vld [vmem:[#allocation2 + $0x308] sm:$0xff] }
 0x115   : > { %4052 = vmatmul.mubr.msk.f32.vlgmr.msra.gmra.mrb[8].mxu1 %vm981_vm15, %v5918_v11  ;;  %v1776_v19 = vld [vmem:[#allocation2 + $0x290] sm:$0xff]  ;;  %v1795_v35 = vld [vmem:[#allocation2 + $0x328] sm:$0xff]  ;;  %v1793_v37 = vld [vmem:[#allocation2 + $0x318] sm:$0xff] }
 0x116   : > { %4138 = vmatpush1.bf16.msk.msra.mxu1 %vm5853_vm14, %v4136_v4  ;;  %1475 = vmatprep.mubr.f32.mxu1 %v7245_v3  ;;  %v1769_v4 = vld [vmem:[#allocation2 + $0x258] sm:$0xff]  ;;  %v1784_v36 = vld [vmem:[#allocation2 + $0x2d0] sm:$0xff]  ;;  %v1799_v9 = vld [vmem:[#allocation2 + $0x348] sm:$0xff]  ;;  %vm7299_vm14 = vcmask 924672  }
 0x117   : > { %4268 = vmatprep.subr.bf16.mxu1 %v4267_v40  ;;  %4174 = vmatpush1.bf16.msra.mxu0 %v4173_v32  ;;  %v1764_v40 = vld [vmem:[#allocation2 + $0x230] sm:$0xff]  ;;  %v4303_v45 = vpack.c.bf16 %v1773_v22, %v1769_v4  ;;  %v1803_v49 = vld [vmem:[#allocation2 + $0x368] sm:$0xff]  ;;  %v1798_v31 = vld [vmem:[#allocation2 + $0x340] sm:$0xff] }
 0x118   : > { %4176 = vmatprep.subr.bf16.mxu0 %v4175_v62  ;;  %v4301_v10 = vpack.c.bf16 %v1764_v40, %v1760_v17  ;;  %v1788_v58 = vld [vmem:[#allocation2 + $0x2f0] sm:$0xff]  ;;  %v4191_v15 = vpack.c.bf16 %v1803_v49, %v1799_v9  ;;  %v1802_v41 = vld [vmem:[#allocation2 + $0x360] sm:$0xff]  ;;  %v1801_v16 = vld [vmem:[#allocation2 + $0x358] sm:$0xff] }
 0x119   : > { %4053 = vmatmul.mubr.msk.f32.gmra.mrb[10].mxu1 %vm981_vm15, %v5954_v21  ;;  %v4193_v50 = vpack.c.bf16 %v1802_v41, %v1798_v31  ;;  %v4313_v51 = vpack.c.bf16 %v1788_v58, %v1784_v36  ;;  %v1792_v32 = vld [vmem:[#allocation2 + $0x310] sm:$0xff]  ;;  %v1805_v18 = vld [vmem:[#allocation2 + $0x378] sm:$0xff]  ;;  %v1807_v48 = vld [vmem:[#allocation2 + $0x388] sm:$0xff]  ;;  %v6331_v41 = vpop.permute.xlu0 %1662 }
 0x11a   : > { %1623 = vmatprep.mubr.f32.mxu1 %v7245_v3  ;;  %v1800_v6 = vld [vmem:[#allocation2 + $0x350] sm:$0xff]  ;;  %v1811_v55 = vld [vmem:[#allocation2 + $0x3a8] sm:$0xff]  ;;  %v4319_v57 = vpack.c.bf16 %v1805_v18, %v1801_v16  ;;  %v1806_v60 = vld [vmem:[#allocation2 + $0x380] sm:$0xff] }
 0x11b   : > { %4178 = vmatpush1.bf16.msra.mxu0 %v4177_v43  ;;  %v1804_v62 = vld [vmem:[#allocation2 + $0x370] sm:$0xff]  ;;  %v4195_v2 = vpack.c.bf16 %v1811_v55, %v1807_v48  ;;  %v1810_v43 = vld [vmem:[#allocation2 + $0x3a0] sm:$0xff]  ;;  %v1815_v12 = vld [vmem:[#allocation2 + $0x3c8] sm:$0xff] }
 0x11c   : > { %4180 = vmatprep.subr.bf16.mxu0 %v4179_v33  ;;  %v4197_v17 = vpack.c.bf16 %v1810_v43, %v1806_v60  ;;  %v4321_v40 = vpack.c.bf16 %v1804_v62, %v1800_v6  ;;  %v1808_v4 = vld [vmem:[#allocation2 + $0x390] sm:$0xff]  ;;  %v1819_v33 = vld [vmem:[#allocation2 + $0x3e8] sm:$0xff]  ;;  %v6342_v62 = vpop.permute.xlu1 %1667  ;;  %v1833_v43 = vld [vmem:[#allocation2 + $0x458] sm:$0xff] }
 0x11d   : > { %4060 = vmatmul.mubr.msk.f32.vlgmr.msra.gmra.mrb[12].mxu1 %vm981_vm15, %v5918_v11  ;;  %v1729_v11 = vld [vmem:[#allocation2 + $0x118] sm:$0xff]  ;;  %v1812_v22 = vld [vmem:[#allocation2 + $0x3b0] sm:$0xff]  ;;  %v1831_v55 = vld [vmem:[#allocation2 + $0x448] sm:$0xff] }
 0x11e   : > { %1629 = vmatprep.mubr.f32.mxu1 %v7245_v3  ;;  %4270 = vmatpush1.bf16.msra.mxu1 %v4269_v61  ;;  %v4283_v26 = vpack.c.bf16 %v1733_v63, %v1729_v11  ;;  %v1774_v61 = vld [vmem:[#allocation2 + $0x280] sm:$0xff]  ;;  %v1780_v11 = vld [vmem:[#allocation2 + $0x2b0] sm:$0xff]  ;;  %v1835_v60 = vld [vmem:[#allocation2 + $0x468] sm:$0xff] }
 0x11f   : > { %4272 = vmatprep.subr.bf16.mxu1 %v4271_v25  ;;  %v1778_v25 = vld [vmem:[#allocation2 + $0x2a0] sm:$0xff]  ;;  %v4309_v23 = vpack.c.bf16 %v1780_v11, %v1776_v19  ;;  %v1816_v7 = vld [vmem:[#allocation2 + $0x3d0] sm:$0xff]  ;;  %vm7301_vm13 = vmmov %vm7299_vm14 }
 0x120   : > { %v4181_v13 = vpack.c.bf16 %v1778_v25, %v1774_v61  ;;  %v1817_v61 = vld [vmem:[#allocation2 + $0x3d8] sm:$0xff]  ;;  %v4199_v25 = vpack.c.bf16 %v1819_v33, %v1815_v12  ;;  %v1824_v6 = vld [vmem:[#allocation2 + $0x410] sm:$0xff]  ;;  %v1830_v12 = vld [vmem:[#allocation2 + $0x440] sm:$0xff] }
 0x121   : > { %4061 = vmatmul.mubr.msk.f32.gmra.mrb[14].mxu1 %vm981_vm15, %v5954_v21  ;;  %v4287_v21 = vpack.c.bf16 %v1741_v1, %v1737_v29  ;;  %v1789_v29 = vld [vmem:[#allocation2 + $0x2f8] sm:$0xff]  ;;  %v4187_v1 = vpack.c.bf16 %v1795_v35, %v1791_v56  ;;  %v1828_v48 = vld [vmem:[#allocation2 + $0x430] sm:$0xff]  ;;  %v1834_v33 = vld [vmem:[#allocation2 + $0x460] sm:$0xff] }
 0x122   : > { %4274 = vmatpush1.bf16.msra.mxu1 %v4273_v24  ;;  %v1772_v24 = vld [vmem:[#allocation2 + $0x270] sm:$0xff]  ;;  %4182 = vmatpush1.bf16.msra.mxu0 %v4181_v13  ;;  %v1814_v13 = vld [vmem:[#allocation2 + $0x3c0] sm:$0xff]  ;;  %vm7300_vm15 = vmmov %vm7299_vm14 }
 0x123   : > { %4276 = vmatprep.subr.bf16.mxu1 %v4275_v27  ;;  %v1777_v27 = vld [vmem:[#allocation2 + $0x298] sm:$0xff]  ;;  %v4305_v30 = vpack.c.bf16 %v1772_v24, %v1768_v53  ;;  %4184 = vmatprep.subr.bf16.mxu0 %v4183_v5  ;;  %v1823_v24 = vld [vmem:[#allocation2 + $0x408] sm:$0xff]  ;;  %v1820_v5 = vld [vmem:[#allocation2 + $0x3f0] sm:$0xff] }
 0x124   : > { %v4329_v19 = vpack.c.bf16 %v1820_v5, %v1816_v7  ;;  %vm7302_vm0 = vmmov %vm7301_vm13 }
 0x126   : > { %4278 = vmatpush1.bf16.msra.mxu1 %v4277_v20  ;;  %v1782_v20 = vld [vmem:[#allocation2 + $0x2c0] sm:$0xff] }
 0x127   : > { %4280 = vmatprep.subr.bf16.mxu1 %v4279_v52  ;;  %v1786_v52 = vld [vmem:[#allocation2 + $0x2e0] sm:$0xff] }
 0x128   : > { %v4185_v63 = vpack.c.bf16 %v1786_v52, %v1782_v20  ;;  %v1825_v52 = vld [vmem:[#allocation2 + $0x418] sm:$0xff] }
 0x12a   : > { %4282 = vmatpush1.bf16.msra.mxu1 %v4281_v54  ;;  %v4307_v54 = vpack.c.bf16 %v1781_v39, %v1777_v27  ;;  %4186 = vmatpush1.bf16.msra.mxu0 %v4185_v63  ;;  %v4325_v27 = vpack.c.bf16 %v1812_v22, %v1808_v4  ;;  %v1827_v39 = vld [vmem:[#allocation2 + $0x428] sm:$0xff] }
 0x12b   : > { %4284 = vmatprep.subr.bf16.mxu1 %v4283_v26  ;;  %v1785_v26 = vld [vmem:[#allocation2 + $0x2d8] sm:$0xff]  ;;  %4188 = vmatprep.subr.bf16.mxu0 %v4187_v1  ;;  %v4203_v20 = vpack.c.bf16 %v1827_v39, %v1823_v24 }
 0x12c   : > { %v1841_v39 = vld [vmem:[#allocation2 + $0x498] sm:$0xff] }
 0x12e   : > { %4286 = vmatpush1.bf16.msra.mxu1 %v4285_v34  ;;  %v1790_v34 = vld [vmem:[#allocation2 + $0x300] sm:$0xff] }
 0x12f   : > { %4288 = vmatprep.subr.bf16.mxu1 %v4287_v21  ;;  %v1794_v21 = vld [vmem:[#allocation2 + $0x320] sm:$0xff] }
 0x130   : > { %v4189_v28 = vpack.c.bf16 %v1794_v21, %v1790_v34 }
 0x132   : > { %4290 = vmatpush1.bf16.msra.mxu1 %v4289_v0  ;;  %v4311_v0 = vpack.c.bf16 %v1789_v29, %v1785_v26  ;;  %4190 = vmatpush1.bf16.msra.mxu0 %v4189_v28 }
 0x133   : > { %4292 = vmatprep.subr.bf16.mxu1 %v4291_v47  ;;  %v1797_v47 = vld [vmem:[#allocation2 + $0x338] sm:$0xff]  ;;  %4192 = vmatprep.subr.bf16.mxu0 %v4191_v15 }
 0x134   : > { %v4315_v42 = vpack.c.bf16 %v1797_v47, %v1793_v37 }
 0x136   : > { %4294 = vmatpush1.bf16.msra.mxu1 %v4293_v14  ;;  %v1796_v14 = vld [vmem:[#allocation2 + $0x330] sm:$0xff]  ;;  %4194 = vmatpush1.bf16.msra.mxu0 %v4193_v50 }
 0x137   : > { %4296 = vmatprep.subr.bf16.mxu1 %v4295_v59  ;;  %v4317_v59 = vpack.c.bf16 %v1796_v14, %v1792_v32  ;;  %4196 = vmatprep.subr.bf16.mxu0 %v4195_v2  ;;  %v1822_v32 = vld [vmem:[#allocation2 + $0x400] sm:$0xff] }
 0x138   : > { %v1826_v14 = vld [vmem:[#allocation2 + $0x420] sm:$0xff] }
 0x139   : > { %v4205_v22 = vpack.c.bf16 %v1826_v14, %v1822_v32  ;;  %v1854_v14 = vld [vmem:[#allocation2 + $0x500] sm:$0xff] }
 0x13a   : > { %4298 = vmatpush1.bf16.msra.mxu1 %v4297_v44  ;;  %v1809_v44 = vld [vmem:[#allocation2 + $0x398] sm:$0xff]  ;;  %4198 = vmatpush1.bf16.msra.mxu0 %v4197_v17 }
 0x13b   : > { %4300 = vmatprep.subr.bf16.mxu1 %v4299_v38  ;;  %v1813_v38 = vld [vmem:[#allocation2 + $0x3b8] sm:$0xff]  ;;  %4200 = vmatprep.subr.bf16.mxu0 %v4199_v25 }
 0x13c   : > { %v4323_v8 = vpack.c.bf16 %v1813_v38, %v1809_v44  ;;  %v1837_v44 = vld [vmem:[#allocation2 + $0x478] sm:$0xff] }
 0x13d   : > { %v4335_v25 = vpack.c.bf16 %v1837_v44, %v1833_v43  ;;  %v1869_v43 = vld [vmem:[#allocation2 + $0x578] sm:$0xff] }
 0x13e   : > { %4302 = vmatpush1.bf16.msra.mxu1 %v4301_v10  ;;  %v1821_v10 = vld [vmem:[#allocation2 + $0x3f8] sm:$0xff] }
 0x13f   : > { %4304 = vmatprep.subr.bf16.mxu1 %v4303_v45  ;;  %v1818_v45 = vld [vmem:[#allocation2 + $0x3e0] sm:$0xff]  ;;  %v4327_v46 = vpack.c.bf16 %v1821_v10, %v1817_v61  ;;  %v4207_v61 = vpack.c.bf16 %v1835_v60, %v1831_v55  ;;  %v1860_v55 = vld [vmem:[#allocation2 + $0x530] sm:$0xff]  ;;  %v1865_v60 = vld [vmem:[#allocation2 + $0x558] sm:$0xff] }
 0x140   : > { %v4201_v53 = vpack.c.bf16 %v1818_v45, %v1814_v13  ;;  %v1832_v13 = vld [vmem:[#allocation2 + $0x450] sm:$0xff] }
 0x141   : > { %v1836_v45 = vld [vmem:[#allocation2 + $0x470] sm:$0xff] }
 0x142   : > { %4306 = vmatpush1.bf16.msra.mxu1 %v4305_v30  ;;  %4202 = vmatpush1.bf16.msra.mxu0 %v4201_v53  ;;  %v1829_v30 = vld [vmem:[#allocation2 + $0x438] sm:$0xff]  ;;  %v1839_v53 = vld [vmem:[#allocation2 + $0x488] sm:$0xff] }
 0x143   : > { %4308 = vmatprep.subr.bf16.mxu1 %v4307_v54  ;;  %4204 = vmatprep.subr.bf16.mxu0 %v4203_v20  ;;  %v4331_v11 = vpack.c.bf16 %v1829_v30, %v1825_v52  ;;  %v4209_v20 = vpack.c.bf16 %v1834_v33, %v1830_v12  ;;  %v4337_v52 = vpack.c.bf16 %v1836_v45, %v1832_v13  ;;  %v1838_v30 = vld [vmem:[#allocation2 + $0x480] sm:$0xff]  ;;  %v1868_v12 = vld [vmem:[#allocation2 + $0x570] sm:$0xff]  ;;  %v1871_v33 = vld [vmem:[#allocation2 + $0x588] sm:$0xff] }
 0x144   : > { %v1877_v13 = vld [vmem:[#allocation2 + $0x5b8] sm:$0xff] }
 0x146   : > { %4310 = vmatpush1.bf16.msra.mxu1 %v4309_v23 }
 0x147   : > { %4312 = vmatprep.subr.bf16.mxu1 %v4311_v0 }
 0x14a   : > { %4314 = vmatpush1.bf16.msra.mxu1 %v4313_v51 }
 0x14b   : > { %4316 = vmatprep.subr.bf16.mxu1 %v4315_v42 }
 0x14e   : > { %4318 = vmatpush1.bf16.msra.mxu1 %v4317_v59 }
 0x14f   : > { %4320 = vmatprep.subr.bf16.mxu1 %v4319_v57 }
 0x152   : > { %4322 = vmatpush1.bf16.msra.mxu1 %v4321_v40 }
 0x153   : > { %4324 = vmatprep.subr.bf16.mxu1 %v4323_v8  ;;  %v4333_v8 = vpack.c.bf16 %v1828_v48, %v1824_v6  ;;  %v1856_v48 = vld [vmem:[#allocation2 + $0x510] sm:$0xff] }
 0x156   : > { %4326 = vmatpush1.bf16.msra.mxu1 %v4325_v27  ;;  %v1843_v27 = vld [vmem:[#allocation2 + $0x4a8] sm:$0xff] }
 0x157   : > { %4328 = vmatprep.subr.bf16.mxu1 %v4327_v46  ;;  %v1845_v46 = vld [vmem:[#allocation2 + $0x4b8] sm:$0xff] }
 0x15a   : > { %4330 = vmatpush1.bf16.msra.mxu1 %v4329_v19  ;;  %v1842_v19 = vld [vmem:[#allocation2 + $0x4a0] sm:$0xff] }
 0x15b   : > { %4332 = vmatprep.subr.bf16.mxu1 %v4331_v11  ;;  %v4211_v11 = vpack.c.bf16 %v1843_v27, %v1839_v53 }
 0x1a6   : > { %v1086_v63 = vpop.f32.mrb[0].mxu0 }
 0x1a7   : > { %v1088_v54 = vpop.f32.mrb[1].mxu0 }
 0x1aa   : > { %v1092_v26 = vpop.f32.mrb[2].mxu0 }
 0x1ab   : > { %v1094_v56 = vpop.f32.mrb[3].mxu0 }
 0x1ae   : > { %v1240_v35 = vpop.f32.mrb[4].mxu0 }
 0x1af   : > { %v1636_v29 = vmax.f32 %v1086_v63, %v1240_v35  ;;  %v1242_v1 = vpop.f32.mrb[5].mxu0  ;;  %v4339_v63 = vpack.c.bf16 %v1845_v46, %v1841_v39  ;;  %v1851_v35 = vld [vmem:[#allocation2 + $0x4e8] sm:$0xff]  ;;  %v1870_v46 = vld [vmem:[#allocation2 + $0x580] sm:$0xff] }
 0x1b0   : > { %v1637_v34 = vmax.f32 %v1088_v54, %v1242_v1  ;;  %v1840_v54 = vld [vmem:[#allocation2 + $0x490] sm:$0xff]  ;;  %v1853_v1 = vld [vmem:[#allocation2 + $0x4f8] sm:$0xff] }
 0x1b2   : > { %v1246_v21 = vpop.f32.mrb[6].mxu0 }
 0x1b3   : > { %v1640_v28 = vmax.f32 %v1092_v26, %v1246_v21  ;;  %v1248_v23 = vpop.f32.mrb[7].mxu0  ;;  %v1844_v26 = vld [vmem:[#allocation2 + $0x4b0] sm:$0xff] }
 0x1b4   : > { %v1641_v36 = vmax.f32 %v1094_v56, %v1248_v23  ;;  %v1847_v56 = vld [vmem:[#allocation2 + $0x4c8] sm:$0xff]  ;;  %v4341_v21 = vpack.c.bf16 %v1844_v26, %v1840_v54  ;;  %v1846_v23 = vld [vmem:[#allocation2 + $0x4c0] sm:$0xff]  ;;  %v1881_v54 = vld [vmem:[#allocation2 + $0x5d8] sm:$0xff] }
 0x1b5   : > { %v1885_v26 = vld [vmem:[#allocation2 + $0x5f8] sm:$0xff] }
 0x1b6   : > { %v1394_v58 = vpop.f32.mrb[8].mxu0 }
 0x1b7   : > { %v1396_v0 = vpop.f32.mrb[9].mxu0 }
 0x1ba   : > { %v1400_v37 = vpop.f32.mrb[10].mxu0 }
 0x1bb   : > { %v1402_v9 = vpop.f32.mrb[11].mxu0 }
 0x1be   : > { %v1548_v49 = vpop.f32.mrb[12].mxu0 }
 0x1bf   : > { %v1644_v47 = vmax.f32 %v1394_v58, %v1548_v49  ;;  %v1550_v15 = vpop.f32.mrb[13].mxu0  ;;  %v4215_v58 = vpack.c.bf16 %v1851_v35, %v1847_v56  ;;  %v1852_v49 = vld [vmem:[#allocation2 + $0x4f0] sm:$0xff] }
 0x1c0   : > { %v1645_v31 = vmax.f32 %v1396_v0, %v1550_v15  ;;  %v1859_v15 = vld [vmem:[#allocation2 + $0x528] sm:$0xff] }
 0x1c1   : > { %v1652_v50 = vmax.f32 %v1636_v29, %v1644_v47  ;;  %v1849_v29 = vld [vmem:[#allocation2 + $0x4d8] sm:$0xff]  ;;  %v1855_v47 = vld [vmem:[#allocation2 + $0x508] sm:$0xff] }
 0x1c2   : > { %v1653_v51 = vmax.f32 %v1637_v34, %v1645_v31  ;;  %v1554_v42 = vpop.f32.mrb[14].mxu0  ;;  %v4213_v34 = vpack.c.bf16 %v1842_v19, %v1838_v30  ;;  %v4343_v0 = vpack.c.bf16 %v1853_v1, %v1849_v29  ;;  %v1857_v31 = vld [vmem:[#allocation2 + $0x518] sm:$0xff]  ;;  %v1876_v30 = vld [vmem:[#allocation2 + $0x5b0] sm:$0xff]  ;;  %v1879_v19 = vld [vmem:[#allocation2 + $0x5c8] sm:$0xff] }
 0x1c3   : > { %v1670_v16 = vadd.f32 %v6331_v41, %v1652_v50  ;;  %v1648_v18 = vmax.f32 %v1400_v37, %v1554_v42  ;;  %v1556_v59 = vpop.f32.mrb[15].mxu0  ;;  %v1861_v50 = vld [vmem:[#allocation2 + $0x538] sm:$0xff] }
 0x1c4   : > { %v1649_v57 = vmax.f32 %v1402_v9, %v1556_v59  ;;  %v1671_v2 = vadd.f32 %v6331_v41, %v1653_v51  ;;  %v1848_v9 = vld [vmem:[#allocation2 + $0x4d0] sm:$0xff]  ;;  %v4219_v59 = vpack.c.bf16 %v1859_v15, %v1855_v47  ;;  %v4347_v6 = vpack.c.bf16 %v1861_v50, %v1857_v31  ;;  %v1891_v15 = vld [vmem:[#allocation2 + $0x628] sm:$0xff]  ;;  %v1889_v31 = vld [vmem:[#allocation2 + $0x618] sm:$0xff] }
 0x1c5   : > { %v1678_v38 = vmax.f32 %v1670_v16, 0.0  ;;  %v1656_v17 = vmax.f32 %v1640_v28, %v1648_v18  ;;  %v4345_v42 = vpack.c.bf16 %v1852_v49, %v1848_v9  ;;  %v1858_v16 = vld [vmem:[#allocation2 + $0x520] sm:$0xff]  ;;  %v1884_v9 = vld [vmem:[#allocation2 + $0x5f0] sm:$0xff]  ;;  %v1887_v49 = vld [vmem:[#allocation2 + $0x608] sm:$0xff] }
 0x1c6   : > { %v1657_v40 = vmax.f32 %v1641_v36, %v1649_v57  ;;  %v1679_v4 = vmax.f32 %v1671_v2, 0.0  ;;  %v1850_v36 = vld [vmem:[#allocation2 + $0x4e0] sm:$0xff]  ;;  %v1863_v57 = vld [vmem:[#allocation2 + $0x548] sm:$0xff]  ;;  %v4221_v44 = vpack.c.bf16 %v1858_v16, %v1854_v14  ;;  %v1893_v50 = vld [vmem:[#allocation2 + $0x638] sm:$0xff] }
 0x1c7   : > { %1686 = vst [vmem:[%s6340_s26] sm:$0xff] %v1678_v38  ;;  %v1674_v10 = vadd.f32 %v6342_v62, %v1656_v17  ;;  %v4217_v51 = vpack.c.bf16 %v1850_v36, %v1846_v23  ;;  %v1867_v2 = vld [vmem:[#allocation2 + $0x568] sm:$0xff]  ;;  %v1862_v17 = vld [vmem:[#allocation2 + $0x540] sm:$0xff] }
 0x1c8   : > { %1687 = vst [vmem:[%s6340_s26 + $0x8] sm:$0xff] %v1679_v4  ;;  %2014 = vmatprep.mubr.f32.mxu0 %v1679_v4  ;;  %2168 = vmatprep.mubr.f32.mxu1 %v1679_v4  ;;  %v1675_v24 = vadd.f32 %v6342_v62, %v1657_v40  ;;  %v1866_v40 = vld [vmem:[#allocation2 + $0x560] sm:$0xff]  ;;  %v4223_v4 = vpack.c.bf16 %v1867_v2, %v1863_v57  ;;  %v1892_v57 = vld [vmem:[#allocation2 + $0x630] sm:$0xff]  ;;  %v1895_v2 = vld [vmem:[#allocation2 + $0x648] sm:$0xff] }
 0x1c9   : > { %2015 = vmatmul.mubr.f32.vlgmr.msra.gmra.mrb[16].mxu0 %v1678_v38  ;;  %2169 = vmatmul.mubr.f32.vlgmr.msra.gmra.mrb[16].mxu1 %v1678_v38  ;;  %v1682_v7 = vmax.f32 %v1674_v10, 0.0  ;;  %v4349_v38 = vpack.c.bf16 %v1860_v55, %v1856_v48  ;;  %v1873_v10 = vld [vmem:[#allocation2 + $0x598] sm:$0xff]  ;;  %v4225_v27 = vpack.c.bf16 %v1866_v40, %v1862_v17  ;;  %v1882_v23 = vld [vmem:[#allocation2 + $0x5e0] sm:$0xff]  ;;  %v4363_v48 = vpack.c.bf16 %v1893_v50, %v1889_v31  ;;  %v1888_v55 = vld [vmem:[#allocation2 + $0x610] sm:$0xff] }
 0x1ca   : > { %4206 = vmatpush1.bf16.msra.mxu0 %v4205_v22  ;;  %4334 = vmatpush1.bf16.msra.mxu1 %v4333_v8  ;;  %v1683_v5 = vmax.f32 %v1675_v24, 0.0  ;;  %v4351_v22 = vpack.c.bf16 %v1869_v43, %v1865_v60  ;;  %v1864_v8 = vld [vmem:[#allocation2 + $0x550] sm:$0xff]  ;;  %v1886_v16 = vld [vmem:[#allocation2 + $0x600] sm:$0xff]  ;;  %v1899_v43 = vld [vmem:[#allocation2 + $0x668] sm:$0xff] }
 0x1cb   : > { %4208 = vmatprep.subr.bf16.mxu0 %v4207_v61  ;;  %4336 = vmatprep.subr.bf16.mxu1 %v4335_v25  ;;  %1690 = vst [vmem:[%s6340_s26 + $0x20] sm:$0xff] %v1682_v7  ;;  %v1875_v25 = vld [vmem:[#allocation2 + $0x5a8] sm:$0xff]  ;;  %v4353_v39 = vpack.c.bf16 %v1868_v12, %v1864_v8  ;;  %v1898_v8 = vld [vmem:[#allocation2 + $0x660] sm:$0xff]  ;;  %v4239_v12 = vpack.c.bf16 %v1899_v43, %v1895_v2 }
 0x1cc   : > { %1691 = vst [vmem:[%s6340_s26 + $0x28] sm:$0xff] %v1683_v5  ;;  %2020 = vmatprep.mubr.f32.mxu0 %v1683_v5  ;;  %2174 = vmatprep.mubr.f32.mxu1 %v1683_v5  ;;  %v4227_v5 = vpack.c.bf16 %v1875_v25, %v1871_v33  ;;  %v1896_v25 = vld [vmem:[#allocation2 + $0x650] sm:$0xff] }
 0x1cd   : > { %2021 = vmatmul.mubr.f32.gmra.mrb[18].mxu0 %v1682_v7  ;;  %2175 = vmatmul.mubr.f32.gmra.mrb[18].mxu1 %v1682_v7  ;;  %v1874_v7 = vld [vmem:[#allocation2 + $0x5a0] sm:$0xff] }
 0x1ce   : > { %4210 = vmatpush1.bf16.msra.mxu0 %v4209_v20  ;;  %4338 = vmatpush1.bf16.msra.mxu1 %v4337_v52  ;;  %v4355_v20 = vpack.c.bf16 %v1877_v13, %v1873_v10  ;;  %v1872_v52 = vld [vmem:[#allocation2 + $0x590] sm:$0xff]  ;;  %v4229_v1 = vpack.c.bf16 %v1874_v7, %v1870_v46  ;;  %v1903_v13 = vld [vmem:[#allocation2 + $0x688] sm:$0xff]  ;;  %v1905_v46 = vld [vmem:[#allocation2 + $0x698] sm:$0xff] }
 0x1cf   : > { %4212 = vmatprep.subr.bf16.mxu0 %v4211_v11  ;;  %4340 = vmatprep.subr.bf16.mxu1 %v4339_v63  ;;  %v1883_v63 = vld [vmem:[#allocation2 + $0x5e8] sm:$0xff]  ;;  %v1900_v10 = vld [vmem:[#allocation2 + $0x670] sm:$0xff]  ;;  %v1909_v7 = vld [vmem:[#allocation2 + $0x6b8] sm:$0xff] }
 0x1d0   : > { %v4231_v36 = vpack.c.bf16 %v1883_v63, %v1879_v19  ;;  %v4369_v19 = vpack.c.bf16 %v1900_v10, %v1896_v25  ;;  %v1926_v10 = vld [vmem:[#allocation2 + $0x740] sm:$0xff] }
 0x1d2   : > { %4214 = vmatpush1.bf16.msra.mxu0 %v4213_v34  ;;  %4342 = vmatpush1.bf16.msra.mxu1 %v4341_v21  ;;  %v4357_v34 = vpack.c.bf16 %v1876_v30, %v1872_v52  ;;  %v1878_v21 = vld [vmem:[#allocation2 + $0x5c0] sm:$0xff] }
 0x1d3   : > { %4216 = vmatprep.subr.bf16.mxu0 %v4215_v58  ;;  %4344 = vmatprep.subr.bf16.mxu1 %v4343_v0  ;;  %v4359_v58 = vpack.c.bf16 %v1885_v26, %v1881_v54  ;;  %v1880_v0 = vld [vmem:[#allocation2 + $0x5d0] sm:$0xff]  ;;  %v4371_v26 = vpack.c.bf16 %v1909_v7, %v1905_v46 }
 0x1d4   : > { %v6351_v28 = vpop.f32.mrb[0].mxu1  ;;  %v4361_v14 = vpack.c.bf16 %v1884_v9, %v1880_v0  ;;  %v1911_v0 = vld [vmem:[#allocation2 + $0x6c8] sm:$0xff]  ;;  %v1928_v46 = vld [vmem:[#allocation2 + $0x750] sm:$0xff] }
 0x1d5   : > { %v6353_v37 = vpop.f32.mrb[1].mxu1  ;;  %v1932_v7 = vld [vmem:[#allocation2 + $0x770] sm:$0xff] }
 0x1d6   : > { %4218 = vmatpush1.bf16.msra.mxu0 %v4217_v51  ;;  %4346 = vmatpush1.bf16.msra.mxu1 %v4345_v42  ;;  %v4233_v42 = vpack.c.bf16 %v1882_v23, %v1878_v21 }
 0x1d7   : > { %4220 = vmatprep.subr.bf16.mxu0 %v4219_v59  ;;  %4348 = vmatprep.subr.bf16.mxu1 %v4347_v6  ;;  %v1890_v59 = vld [vmem:[#allocation2 + $0x620] sm:$0xff]  ;;  %v4235_v6 = vpack.c.bf16 %v1891_v15, %v1887_v49 }
 0x1d8   : > { %v6355_v32 = vpop.f32.mrb[2].mxu1  ;;  %v4237_v40 = vpack.c.bf16 %v1890_v59, %v1886_v16 }
 0x1d9   : > { %v6357_v18 = vpop.f32.mrb[3].mxu1 }
 0x1da   : > { %4222 = vmatpush1.bf16.msra.mxu0 %v4221_v44  ;;  %4350 = vmatpush1.bf16.msra.mxu1 %v4349_v38  ;;  %v1897_v44 = vld [vmem:[#allocation2 + $0x658] sm:$0xff] }
 0x1db   : > { %4224 = vmatprep.subr.bf16.mxu0 %v4223_v4  ;;  %4352 = vmatprep.subr.bf16.mxu1 %v4351_v22  ;;  %v1901_v38 = vld [vmem:[#allocation2 + $0x678] sm:$0xff]  ;;  %v4365_v4 = vpack.c.bf16 %v1892_v57, %v1888_v55  ;;  %v1894_v22 = vld [vmem:[#allocation2 + $0x640] sm:$0xff]  ;;  %v1919_v55 = vld [vmem:[#allocation2 + $0x708] sm:$0xff] }
 0x1dc   : > { %v4367_v33 = vpack.c.bf16 %v1901_v38, %v1897_v44  ;;  %v4241_v30 = vpack.c.bf16 %v1898_v8, %v1894_v22  ;;  %v1931_v8 = vld [vmem:[#allocation2 + $0x768] sm:$0xff] }
 0x1de   : > { %4226 = vmatpush1.bf16.msra.mxu0 %v4225_v27  ;;  %4354 = vmatpush1.bf16.msra.mxu1 %v4353_v39  ;;  %v1907_v39 = vld [vmem:[#allocation2 + $0x6a8] sm:$0xff] }
 0x1df   : > { %4228 = vmatprep.subr.bf16.mxu0 %v4227_v5  ;;  %4356 = vmatprep.subr.bf16.mxu1 %v4355_v20  ;;  %v4243_v54 = vpack.c.bf16 %v1907_v39, %v1903_v13  ;;  %v1930_v13 = vld [vmem:[#allocation2 + $0x760] sm:$0xff] }
 0x1e0   : > { %v6359_v61 = vpop.f32.mrb[4].mxu1 }
 0x1e1   : > { %v1638_v45 = vmax.f32 %v6351_v28, %v6359_v61  ;;  %v6363_v53 = vpop.f32.mrb[5].mxu1  ;;  %v1915_v28 = vld [vmem:[#allocation2 + $0x6e8] sm:$0xff]  ;;  %v1913_v61 = vld [vmem:[#allocation2 + $0x6d8] sm:$0xff] }
 0x1e2   : > { %v1639_v24 = vmax.f32 %v6353_v37, %v6363_v53  ;;  %4230 = vmatpush1.bf16.msra.mxu0 %v4229_v1  ;;  %4358 = vmatpush1.bf16.msra.mxu1 %v4357_v34  ;;  %v1902_v1 = vld [vmem:[#allocation2 + $0x680] sm:$0xff]  ;;  %v4247_v16 = vpack.c.bf16 %v1915_v28, %v1911_v0  ;;  %v1945_v0 = vld [vmem:[#allocation2 + $0x7d8] sm:$0xff] }
 0x1e3   : > { %4232 = vmatprep.subr.bf16.mxu0 %v4231_v36  ;;  %4360 = vmatprep.subr.bf16.mxu1 %v4359_v58  ;;  %v1906_v34 = vld [vmem:[#allocation2 + $0x6a0] sm:$0xff]  ;;  %v1904_v36 = vld [vmem:[#allocation2 + $0x690] sm:$0xff] }
 0x1e4   : > { %v6367_v11 = vpop.f32.mrb[6].mxu1  ;;  %v1908_v58 = vld [vmem:[#allocation2 + $0x6b0] sm:$0xff]  ;;  %v4245_v53 = vpack.c.bf16 %v1906_v34, %v1902_v1  ;;  %v1942_v28 = vld [vmem:[#allocation2 + $0x7c0] sm:$0xff] }
 0x1e5   : > { %v1642_v56 = vmax.f32 %v6355_v32, %v6367_v11  ;;  %v6371_v35 = vpop.f32.mrb[7].mxu1  ;;  %v1923_v32 = vld [vmem:[#allocation2 + $0x728] sm:$0xff]  ;;  %v1921_v11 = vld [vmem:[#allocation2 + $0x718] sm:$0xff] }
 0x1e6   : > { %v1643_v29 = vmax.f32 %v6357_v18, %v6371_v35  ;;  %4234 = vmatpush1.bf16.msra.mxu0 %v4233_v42  ;;  %4362 = vmatpush1.bf16.msra.mxu1 %v4361_v14  ;;  %v1914_v42 = vld [vmem:[#allocation2 + $0x6e0] sm:$0xff]  ;;  %v4251_v44 = vpack.c.bf16 %v1923_v32, %v1919_v55 }
 0x1e7   : > { %4236 = vmatprep.subr.bf16.mxu0 %v4235_v6  ;;  %4364 = vmatprep.subr.bf16.mxu1 %v4363_v48  ;;  %v1912_v6 = vld [vmem:[#allocation2 + $0x6d0] sm:$0xff] }
 0x1e8   : > { %v1471_v47 = vpop.f32.mrb[8].mxu1  ;;  %v1916_v48 = vld [vmem:[#allocation2 + $0x6f0] sm:$0xff] }
 0x1e9   : > { %v1473_v51 = vpop.f32.mrb[9].mxu1  ;;  %v4377_v35 = vpack.c.bf16 %v1916_v48, %v1912_v6 }
 0x1ea   : > { %4238 = vmatpush1.bf16.msra.mxu0 %v4237_v40  ;;  %4366 = vmatpush1.bf16.msra.mxu1 %v4365_v4  ;;  %v1924_v40 = vld [vmem:[#allocation2 + $0x730] sm:$0xff]  ;;  %v1927_v4 = vld [vmem:[#allocation2 + $0x748] sm:$0xff] }
 0x1eb   : > { %4240 = vmatprep.subr.bf16.mxu0 %v4239_v12  ;;  %4368 = vmatprep.subr.bf16.mxu1 %v4367_v33  ;;  %v1933_v12 = vld [vmem:[#allocation2 + $0x778] sm:$0xff] }
 0x1ec   : > { %v1477_v60 = vpop.f32.mrb[10].mxu1 }
 0x1ed   : > { %v1479_v17 = vpop.f32.mrb[11].mxu1 }
 0x1ee   : > { %4242 = vmatpush1.bf16.msra.mxu0 %v4241_v30  ;;  %4370 = vmatpush1.bf16.msra.mxu1 %v4369_v19  ;;  %v1941_v30 = vld [vmem:[#allocation2 + $0x7b8] sm:$0xff]  ;;  %v4257_v19 = vpack.c.bf16 %v1930_v13, %v1926_v10 }
 0x1ef   : > { %4244 = vmatprep.subr.bf16.mxu0 %v4243_v54  ;;  %4372 = vmatprep.subr.bf16.mxu1 %v4371_v26  ;;  %v1934_v54 = vld [vmem:[#allocation2 + $0x780] sm:$0xff] }
 0x1f0   : > { %v1625_v27 = vpop.f32.mrb[12].mxu1  ;;  %v1938_v26 = vld [vmem:[#allocation2 + $0x7a0] sm:$0xff] }
 0x1f1   : > { %v1646_v5 = vmax.f32 %v1471_v47, %v1625_v27  ;;  %v1627_v20 = vpop.f32.mrb[13].mxu1  ;;  %v4255_v27 = vpack.c.bf16 %v1931_v8, %v1927_v4 }
 0x1f2   : > { %v1647_v52 = vmax.f32 %v1473_v51, %v1627_v20  ;;  %v1910_v51 = vld [vmem:[#allocation2 + $0x6c0] sm:$0xff]  ;;  %4246 = vmatpush1.bf16.msra.mxu0 %v4245_v53  ;;  %v1939_v20 = vld [vmem:[#allocation2 + $0x7a8] sm:$0xff] }
 0x1f3   : > { %v1654_v63 = vmax.f32 %v1638_v45, %v1646_v5  ;;  %v1917_v45 = vld [vmem:[#allocation2 + $0x6f8] sm:$0xff]  ;;  %v4249_v18 = vpack.c.bf16 %v1914_v42, %v1910_v51  ;;  %4248 = vmatprep.subr.bf16.mxu0 %v4247_v16  ;;  %v1935_v5 = vld [vmem:[#allocation2 + $0x788] sm:$0xff] }
 0x1f4   : > { %v1655_v21 = vmax.f32 %v1639_v24, %v1647_v52  ;;  %v1631_v23 = vpop.f32.mrb[14].mxu1  ;;  %v4373_v24 = vpack.c.bf16 %v1908_v58, %v1904_v36  ;;  %v4375_v59 = vpack.c.bf16 %v1917_v45, %v1913_v61  ;;  %v1937_v52 = vld [vmem:[#allocation2 + $0x798] sm:$0xff]  ;;  %v4259_v1 = vpack.c.bf16 %v1939_v20, %v1935_v5  ;;  %v1943_v36 = vld [vmem:[#allocation2 + $0x7c8] sm:$0xff] }
 0x1f5   : > { %v1672_v9 = vadd.f32 %v6331_v41, %v1654_v63  ;;  %v1650_v49 = vmax.f32 %v1477_v60, %v1631_v23  ;;  %v1633_v47 = vpop.f32.mrb[15].mxu1  ;;  %v1922_v60 = vld [vmem:[#allocation2 + $0x720] sm:$0xff]  ;;  %v4385_v63 = vpack.c.bf16 %v1932_v7, %v1928_v46  ;;  %v4387_v34 = vpack.c.bf16 %v1941_v30, %v1937_v52  ;;  %v1940_v23 = vld [vmem:[#allocation2 + $0x7b0] sm:$0xff]  ;;  %v1947_v58 = vld [vmem:[#allocation2 + $0x7e8] sm:$0xff] }
 0x1f6   : > { %v1673_v15 = vadd.f32 %v6331_v41, %v1655_v21  ;;  %v1651_v31 = vmax.f32 %v1479_v17, %v1633_v47  ;;  %4374 = vmatpush1.bf16.msra.mxu1 %v4373_v24  ;;  %v1920_v17 = vld [vmem:[#allocation2 + $0x710] sm:$0xff]  ;;  %4250 = vmatpush1.bf16.msra.mxu0 %v4249_v18  ;;  %v4263_v61 = vpack.c.bf16 %v1947_v58, %v1943_v36  ;;  %v2266_v18 = vld [vmem:[%s7173_s4] sm:$0xff] }
 0x1f7   : > { %v6383_v50 = vmax.f32 %v1672_v9, 0.0  ;;  %v1658_v37 = vmax.f32 %v1642_v56, %v1650_v49  ;;  %v1925_v56 = vld [vmem:[#allocation2 + $0x738] sm:$0xff]  ;;  %4376 = vmatprep.subr.bf16.mxu1 %v4375_v59  ;;  %v4381_v25 = vpack.c.bf16 %v1924_v40, %v1920_v17  ;;  %4252 = vmatprep.subr.bf16.mxu0 %v4251_v44  ;;  %v1936_v21 = vld [vmem:[#allocation2 + $0x790] sm:$0xff]  ;;  %v4261_v49 = vpack.c.bf16 %v1938_v26, %v1934_v54 }
 0x1f8   : > { %v1681_v14 = vmax.f32 %v1673_v15, 0.0  ;;  %v1659_v41 = vmax.f32 %v1643_v29, %v1651_v31  ;;  %v1918_v29 = vld [vmem:[#allocation2 + $0x700] sm:$0xff]  ;;  %v4379_v38 = vpack.c.bf16 %v1925_v56, %v1921_v11  ;;  %v1949_v9 = vld [vmem:[#allocation2 + $0x7f8] sm:$0xff]  ;;  %v4389_v47 = vpack.c.bf16 %v1940_v23, %v1936_v21  ;;  %v1944_v31 = vld [vmem:[#allocation2 + $0x7d0] sm:$0xff] }
 0x1f9   : > { %1688 = vst [vmem:[%s6340_s26 + $0x10] sm:$0xff] %v6383_v50  ;;  %v1676_v57 = vadd.f32 %v6342_v62, %v1658_v37  ;;  %v4253_v33 = vpack.c.bf16 %v1922_v60, %v1918_v29  ;;  %v4391_v45 = vpack.c.bf16 %v1949_v9, %v1945_v0  ;;  %v1946_v15 = vld [vmem:[#allocation2 + $0x7e0] sm:$0xff]  ;;  %v1948_v37 = vld [vmem:[#allocation2 + $0x7f0] sm:$0xff]  ;;  %v2267_v29 = vld [vmem:[%s7173_s4 + $0x8] sm:$0xff] }
 0x1fa   : > { %1689 = vst [vmem:[%s6340_s26 + $0x18] sm:$0xff] %v1681_v14  ;;  %2091 = vmatprep.mubr.f32.mxu0 %v1681_v14  ;;  %2245 = vmatprep.mubr.f32.mxu1 %v1681_v14  ;;  %v1677_v2 = vadd.f32 %v6342_v62, %v1659_v41  ;;  %v1929_v62 = vld [vmem:[#allocation2 + $0x758] sm:$0xff]  ;;  %v4265_v53 = vpack.c.bf16 %v1946_v15, %v1942_v28 }
 0x1fb   : > { %v6396_v43 = vmax.f32 %v1676_v57, 0.0  ;;  %4378 = vmatpush1.bf16.msra.mxu1 %v4377_v35  ;;  %v4383_v39 = vpack.c.bf16 %v1933_v12, %v1929_v62  ;;  %4254 = vmatpush1.bf16.msra.mxu0 %v4253_v33  ;;  %v4393_v24 = vpack.c.bf16 %v1948_v37, %v1944_v31  ;;  %v2268_v35 = vld [vmem:[%s7173_s4 + $0x10] sm:$0xff]  ;;  %v2269_v60 = vld [vmem:[%s7173_s4 + $0x18] sm:$0xff] }
 0x1fc   : > { %v1685_v22 = vmax.f32 %v1677_v2, 0.0  ;;  %4380 = vmatprep.subr.bf16.mxu1 %v4379_v38  ;;  %4256 = vmatprep.subr.bf16.mxu0 %v4255_v27  ;;  %v2259_v2 = vld [vmem:[%s7172_s3 + $0x8] sm:$0xff] }
 0x1fd   : > { %1692 = vst [vmem:[%s6340_s26 + $0x30] sm:$0xff] %v6396_v43 }
 0x1fe   : > { %1693 = vst [vmem:[%s6340_s26 + $0x38] sm:$0xff] %v1685_v22 }
 0x1ff   : > { %4382 = vmatpush1.bf16.msra.mxu1 %v4381_v25  ;;  %4258 = vmatpush1.bf16.msra.mxu0 %v4257_v19 }
 0x200   : > { %4384 = vmatprep.subr.bf16.mxu1 %v4383_v39  ;;  %4260 = vmatprep.subr.bf16.mxu0 %v4259_v1 }
 0x203   : > { %4386 = vmatpush1.bf16.msra.mxu1 %v4385_v63  ;;  %4262 = vmatpush1.bf16.msra.mxu0 %v4261_v49 }
 0x204   : > { %4388 = vmatprep.subr.bf16.mxu1 %v4387_v34  ;;  %4264 = vmatprep.subr.bf16.mxu0 %v4263_v61 }
 0x207   : > { %4390 = vmatpush1.bf16.msra.mxu1 %v4389_v47  ;;  %4266 = vmatpush1.bf16.msra.mxu0 %v4265_v53 }
 0x208   : > { %4392 = vmatprep.subr.bf16.mxu1 %v4391_v45 }
 0x20a   : > { %2092 = vmatmul.mubr.f32.vlgmr.msra.gmra.mrb[16].mxu0 %v6383_v50 }
 0x20b   : > { %4394 = vmatpush1.bf16.msra.mxu1 %v4393_v24  ;;  %2097 = vmatprep.mubr.f32.mxu0 %v1685_v22 }
 0x20e   : > { %2246 = vmatmul.mubr.f32.vlgmr.msra.gmra.mrb[16].mxu1 %v6383_v50  ;;  %2098 = vmatmul.mubr.f32.gmra.mrb[18].mxu0 %v6396_v43 }
 0x20f   : > { %2251 = vmatprep.mubr.f32.mxu1 %v1685_v22  ;;  %4062 = vmatprep.mubr.msk.f32.mxu0 %vm2451_vm2, %v2259_v2 }
 0x212   : > { %2252 = vmatmul.mubr.f32.gmra.mrb[18].mxu1 %v6396_v43 }
 0x213   : > { %4066 = vmatprep.mubr.msk.f32.mxu1 %vm2451_vm2, %v2259_v2 }
 0x2dd   : > { %v2093_v51 = vpop.f32.mrb[16].mxu0 }
 0x2de   : > { %v2095_v14 = vpop.f32.mrb[17].mxu0 }
 0x2df   : > { %v4935_v59 = vpack.i.bf16 %v2095_v14, %v2093_v51 }
 0x2e1   : > { %v2247_v42 = vpop.f32.mrb[16].mxu1  ;;  %v2099_v6 = vpop.f32.mrb[18].mxu0 }
 0x2e2   : > { %v2249_v41 = vpop.f32.mrb[17].mxu1  ;;  %v2101_v55 = vpop.f32.mrb[19].mxu0  ;;  %v4397_v50 = vpack.c.bf16 %v2099_v6, %v2093_v51 }
 0x2e3   : > { %v4930_v16 = vpack.i.bf16 %v2249_v41, %v2247_v42  ;;  %v5005_v57 = vpack.i.bf16 %v2101_v55, %v2099_v6 }
 0x2e5   : > { %4931 = vrot.lane.b32.xlu1 %v4930_v16, %s5403_s27  ;;  %v2253_v48 = vpop.f32.mrb[18].mxu1 }
 0x2e6   : > { %v2255_v32 = vpop.f32.mrb[19].mxu1  ;;  %v6405_v11 = vpack.c.bf16 %v2253_v48, %v2247_v42 }
 0x2e7   : > { %v5000_v56 = vpack.i.bf16 %v2255_v32, %v2253_v48 }
 0x2e8   : > { %4396 = vmatprep.subr.bf16.mxu0 %v6405_v11 }
 0x2e9   : > { %5001 = vrot.lane.b32.xlu0 %v5000_v56, %s5403_s27  ;;  %4936 = vrot.lane.b32.xlu1 %v4935_v59, %s5403_s27 }
 0x2ea   : > { %4398 = vmatpush1.bf16.msra.mxu0 %v4397_v50 }
 0x2ed   : > { %4941 = vrot.lane.b32.xlu1 %v4935_v59, %s5393_s22  ;;  %5006 = vrot.lane.b32.xlu0 %v5005_v57, %s5403_s27  ;;  %s4089_s27 = sshll.u32 %s7304_s18, 5 }
 0x2f1   : > { %4946 = vrot.lane.b32.xlu1 %v4935_v59, %s5404_s28  ;;  %5011 = vrot.lane.b32.xlu0 %v5005_v57, %s5393_s22 }
 0x2f5   : > { %4951 = vrot.lane.b32.xlu1 %v4930_v16, %s5393_s22  ;;  %5016 = vrot.lane.b32.xlu0 %v5005_v57, %s5404_s28 }
 0x2f9   : > { %4956 = vrot.lane.b32.xlu1 %v4930_v16, %s5404_s28  ;;  %5021 = vrot.lane.b32.xlu0 %v5000_v56, %s5393_s22 }
 0x2fd   : > { %4961 = vrot.lane.b32.xlu1 %v4930_v16, %s5395_s24  ;;  %5026 = vrot.lane.b32.xlu0 %v5000_v56, %s5404_s28 }
 0x301   : > { %4966 = vrot.lane.b32.xlu1 %v4935_v59, %s5395_s24  ;;  %5031 = vrot.lane.b32.xlu0 %v5000_v56, %s5395_s24 }
 0x305   : > { %4971 = vrot.lane.b32.xlu1 %v4935_v59, %s5405_s29  ;;  %5036 = vrot.lane.b32.xlu0 %v5005_v57, %s5395_s24  ;;  %s5410_s24 = smov 122  }
 0x309   : > { %4976 = vrot.lane.b32.xlu1 %v4930_v16, %s5405_s29  ;;  %5041 = vrot.lane.b32.xlu0 %v5005_v57, %s5405_s29 }
 0x30d   : > { %4981 = vrot.lane.b32.xlu1 %v4930_v16, %s5406_s30  ;;  %5046 = vrot.lane.b32.xlu0 %v5000_v56, %s5405_s29 }
 0x311   : > { %4986 = vrot.lane.b32.xlu1 %v4935_v59, %s5406_s30  ;;  %5051 = vrot.lane.b32.xlu0 %v5000_v56, %s5406_s30 }
 0x315   : > { %4991 = vrot.lane.b32.xlu1 %v4935_v59, %s5407_s12  ;;  %5056 = vrot.lane.b32.xlu0 %v5005_v57, %s5406_s30 }
 0x319   : > { %4996 = vrot.lane.b32.xlu1 %v4930_v16, %s5407_s12  ;;  %5061 = vrot.lane.b32.xlu0 %v5005_v57, %s5407_s12 }
 0x31d   : > { %2656 = vperm.xlu1 %4929, %v2266_v18   ;;  %5066 = vrot.lane.b32.xlu0 %v5000_v56, %s5407_s12  ;;  %s6721_s12 = scalar_lea.vmem %s7179_s10, %s4089_s27 }
 0x321   : > { %2666 = vperm.xlu1 %4929, %v2268_v35   ;;  %2661 = vperm.xlu0 %4928, %v2267_v29  }
 0x325   : > { %2671 = vperm.xlu0 %4928, %v2269_v60  }
 0x357   : > { %v4932_v43 = vpop.permute.xlu1 %4931 }
 0x358   : > { %v4934_v44 = vunpack.i.h.bf16 %v4932_v43  ;;  %v4933_v38 = vunpack.i.l.bf16 %v4932_v43 }
 0x35a   : > { %v2299_v8 = vsel %vm2282_vm3, %v4933_v38, %v4934_v44 }
 0x35b   : > { %v5002_v17 = vpop.permute.xlu0 %5001  ;;  %v4937_v40 = vpop.permute.xlu1 %4936 }
 0x35c   : > { %v5004_v4 = vunpack.i.h.bf16 %v5002_v17  ;;  %v5003_v22 = vunpack.i.l.bf16 %v5002_v17  ;;  %v4939_v12 = vunpack.i.h.bf16 %v4937_v40  ;;  %v4938_v33 = vunpack.i.l.bf16 %v4937_v40 }
 0x35e   : > { %v2300_v62 = vsel %vm2282_vm3, %v5003_v22, %v5004_v4  ;;  %v2283_v46 = vsel %vm2282_vm3, %v4938_v33, %v4939_v12 }
 0x35f   : > { %v6439_v25 = vpack.c.bf16 %v2300_v62, %v2299_v8  ;;  %v4942_v10 = vpop.permute.xlu1 %4941  ;;  %v5007_v13 = vpop.permute.xlu0 %5006 }
 0x360   : > { %v5009_v27 = vunpack.i.h.bf16 %v5007_v13  ;;  %v5008_v39 = vunpack.i.l.bf16 %v5007_v13  ;;  %v4944_v7 = vunpack.i.h.bf16 %v4942_v10  ;;  %v4943_v5 = vunpack.i.l.bf16 %v4942_v10 }
 0x361   : > { %4432 = vmatprep.subr.bf16.mxu1 %v6439_v25 }
 0x362   : > { %v2284_v20 = vsel %vm2282_vm3, %v5008_v39, %v5009_v27  ;;  %v2311_v34 = vsel %vm530_vm1, %v4943_v5, %v4944_v7 }
 0x363   : > { %v4409_v52 = vpack.c.bf16 %v2284_v20, %v2283_v46  ;;  %v4947_v30 = vpop.permute.xlu1 %4946  ;;  %v5012_v19 = vpop.permute.xlu0 %5011 }
 0x364   : > { %v5014_v63 = vunpack.i.h.bf16 %v5012_v19  ;;  %v5013_v54 = vunpack.i.l.bf16 %v5012_v19  ;;  %v4949_v26 = vunpack.i.h.bf16 %v4947_v30  ;;  %v4948_v1 = vunpack.i.l.bf16 %v4947_v30 }
 0x365   : > { %4434 = vmatpush1.bf16.msra.mxu1 %v4409_v52 }
 0x366   : > { %v2312_v21 = vsel %vm530_vm1, %v5013_v54, %v5014_v63  ;;  %v2324_v49 = vsel %vm2323_vm4, %v4948_v1, %v4949_v26 }
 0x367   : > { %v4952_v23 = vpop.permute.xlu1 %4951  ;;  %v5017_v36 = vpop.permute.xlu0 %5016  ;;  %v4399_v58 = vpack.c.bf16 %v2312_v21, %v2311_v34 }
 0x368   : > { %v5019_v0 = vunpack.i.h.bf16 %v5017_v36  ;;  %v5018_v9 = vunpack.i.l.bf16 %v5017_v36  ;;  %v4954_v47 = vunpack.i.h.bf16 %v4952_v23  ;;  %v4953_v28 = vunpack.i.l.bf16 %v4952_v23 }
 0x369   : > { %4400 = vmatprep.subr.bf16.mxu0 %v4399_v58 }
 0x36a   : > { %v2325_v61 = vsel %vm2323_vm4, %v5018_v9, %v5019_v0  ;;  %4402 = vmatpush1.bf16.msra.mxu0 %v6405_v11  ;;  %v2336_v42 = vsel %vm530_vm1, %v4953_v28, %v4954_v47  ;;  %v2691_v47 = vld [vmem:[%s7177_s8 + $0x28] sm:$0xff] }
 0x36b   : > { %v4411_v45 = vpack.c.bf16 %v2325_v61, %v2324_v49  ;;  %v4957_v15 = vpop.permute.xlu1 %4956  ;;  %v5022_v31 = vpop.permute.xlu0 %5021  ;;  %v2687_v49 = vld [vmem:[%s7177_s8 + $0x8] sm:$0xff] }
 0x36c   : > { %v5024_v37 = vunpack.i.h.bf16 %v5022_v31  ;;  %v5023_v53 = vunpack.i.l.bf16 %v5022_v31  ;;  %v4959_v24 = vunpack.i.h.bf16 %v4957_v15  ;;  %v4958_v51 = vunpack.i.l.bf16 %v4957_v15  ;;  %v2686_v31 = vld [vmem:[%s7177_s8] sm:$0xff] }
 0x36d   : > { %4436 = vmatprep.subr.bf16.mxu1 %v4411_v45 }
 0x36e   : > { %4438 = vmatpush1.bf16.msra.mxu1 %v6439_v25  ;;  %v2337_v14 = vsel %vm530_vm1, %v5023_v53, %v5024_v37  ;;  %v2348_v11 = vsel %vm2323_vm4, %v4958_v51, %v4959_v24  ;;  %v2690_v37 = vld [vmem:[%s7177_s8 + $0x20] sm:$0xff] }
 0x36f   : > { %v4962_v41 = vpop.permute.xlu1 %4961  ;;  %v5027_v16 = vpop.permute.xlu0 %5026  ;;  %v4403_v59 = vpack.c.bf16 %v2337_v14, %v2336_v42  ;;  %v4467_v42 = vpack.c.bf16 %v2691_v47, %v2687_v49  ;;  %v2710_v49 = vld [vmem:[%s7177_s8 + $0xc0] sm:$0xff] }
 0x370   : > { %v5029_v6 = vunpack.i.h.bf16 %v5027_v16  ;;  %v5028_v48 = vunpack.i.l.bf16 %v5027_v16  ;;  %v4964_v55 = vunpack.i.h.bf16 %v4962_v41  ;;  %v4963_v32 = vunpack.i.l.bf16 %v4962_v41  ;;  %v2695_v16 = vld [vmem:[%s7177_s8 + $0x48] sm:$0xff]  ;;  %v2714_v47 = vld [vmem:[%s7177_s8 + $0xe0] sm:$0xff] }
 0x371   : > { %4404 = vmatprep.subr.bf16.mxu0 %v4403_v59  ;;  %v2699_v59 = vld [vmem:[%s7177_s8 + $0x68] sm:$0xff] }
 0x372   : > { %4406 = vmatpush1.bf16.msra.mxu0 %v4399_v58  ;;  %v2349_v50 = vsel %vm2323_vm4, %v5028_v48, %v5029_v6  ;;  %v2372_v29 = vsel %vm549_vm5, %v4963_v32, %v4964_v55  ;;  %v4469_v6 = vpack.c.bf16 %v2690_v37, %v2686_v31  ;;  %v2696_v37 = vld [vmem:[%s7177_s8 + $0x50] sm:$0xff] }
 0x373   : > { %v4967_v56 = vpop.permute.xlu1 %4966  ;;  %v5032_v57 = vpop.permute.xlu0 %5031  ;;  %4408 = vmatprep.subr.bf16.mxu0 %v6439_v25  ;;  %v4415_v2 = vpack.c.bf16 %v2349_v50, %v2348_v11  ;;  %v6489_v50 = vld [vmem:[%s7172_s3] sm:$0xff] }
 0x374   : > { %v5034_v18 = vunpack.i.h.bf16 %v5032_v57  ;;  %v5033_v35 = vunpack.i.l.bf16 %v5032_v57  ;;  %v4969_v60 = vunpack.i.h.bf16 %v4967_v56  ;;  %v4968_v43 = vunpack.i.l.bf16 %v4967_v56 }
 0x375   : > { %4440 = vmatprep.subr.bf16.mxu1 %v4415_v2 }
 0x376   : > { %v2373_v44 = vsel %vm549_vm5, %v5033_v35, %v5034_v18  ;;  %4410 = vmatpush1.bf16.msra.mxu0 %v4409_v52  ;;  %4442 = vmatpush1.bf16.msra.mxu1 %v4411_v45  ;;  %v2360_v8 = vsel %vm549_vm5, %v4968_v43, %v4969_v60  ;;  %v6494_v18 = vld [vmem:[%s7172_s3 + $0x18] sm:$0xff]  ;;  %v4471_v35 = vpack.c.bf16 %v2699_v59, %v2695_v16  ;;  %v2694_v43 = vld [vmem:[%s7177_s8 + $0x40] sm:$0xff]  ;;  %v2727_v59 = vld [vmem:[%s7177_s8 + $0x148] sm:$0xff] }
 0x377   : > { %v4419_v38 = vpack.c.bf16 %v2373_v44, %v2372_v29  ;;  %v4972_v17 = vpop.permute.xlu1 %4971  ;;  %v5037_v40 = vpop.permute.xlu0 %5036  ;;  %4412 = vmatprep.subr.bf16.mxu0 %v4411_v45  ;;  %v2698_v44 = vld [vmem:[%s7177_s8 + $0x60] sm:$0xff] }
 0x378   : > { %v5039_v4 = vunpack.i.h.bf16 %v5037_v40  ;;  %v5038_v22 = vunpack.i.l.bf16 %v5037_v40  ;;  %v4974_v62 = vunpack.i.h.bf16 %v4972_v17  ;;  %v4973_v12 = vunpack.i.l.bf16 %v4972_v17  ;;  %v2707_v17 = vld [vmem:[%s7177_s8 + $0xa8] sm:$0xff]  ;;  %v2722_v16 = vld [vmem:[%s7177_s8 + $0x120] sm:$0xff] }
 0x379   : > { %4444 = vmatprep.subr.bf16.mxu1 %v4419_v38 }
 0x37a   : > { %v2361_v33 = vsel %vm549_vm5, %v5038_v22, %v5039_v4  ;;  %4414 = vmatpush1.bf16.msra.mxu0 %v6439_v25  ;;  %v2385_v7 = vsel %vm2384_vm6, %v4973_v12, %v4974_v62  ;;  %vm2409_vm5 = vcmask 850944   ;;  %v6516_v62 = vld [vmem:[%s7172_s3 + $0x10] sm:$0xff] }
 0x37b   : > { %v4421_v10 = vpack.c.bf16 %v2361_v33, %v2360_v8  ;;  %v4977_v13 = vpop.permute.xlu1 %4976  ;;  %v5042_v27 = vpop.permute.xlu0 %5041  ;;  %4416 = vmatprep.subr.bf16.mxu0 %v4415_v2 }
 0x37c   : > { %v5044_v39 = vunpack.i.h.bf16 %v5042_v27  ;;  %v5043_v46 = vunpack.i.l.bf16 %v5042_v27  ;;  %v4979_v5 = vunpack.i.h.bf16 %v4977_v13  ;;  %v4978_v20 = vunpack.i.l.bf16 %v4977_v13  ;;  %v2689_v13 = vld [vmem:[%s7177_s8 + $0x18] sm:$0xff] }
 0x37d   : > { %4446 = vmatpush1.bf16.msra.mxu1 %v4421_v10  ;;  %v4473_v27 = vpack.c.bf16 %v2698_v44, %v2694_v43  ;;  %v2712_v43 = vld [vmem:[%s7177_s8 + $0xd0] sm:$0xff] }
 0x37e   : > { %v2386_v52 = vsel %vm2384_vm6, %v5043_v46, %v5044_v39  ;;  %4418 = vmatpush1.bf16.msra.mxu0 %v4411_v45  ;;  %v2397_v34 = vsel %vm2384_vm6, %v4978_v20, %v4979_v5  ;;  %v2702_v20 = vld [vmem:[%s7177_s8 + $0x80] sm:$0xff]  ;;  %v2716_v44 = vld [vmem:[%s7177_s8 + $0xf0] sm:$0xff] }
 0x37f   : > { %v4423_v30 = vpack.c.bf16 %v2386_v52, %v2385_v7  ;;  %v4982_v19 = vpop.permute.xlu1 %4981  ;;  %v5047_v63 = vpop.permute.xlu0 %5046  ;;  %4420 = vmatprep.subr.bf16.mxu0 %v4419_v38  ;;  %v2693_v7 = vld [vmem:[%s7177_s8 + $0x38] sm:$0xff]  ;;  %v2706_v52 = vld [vmem:[%s7177_s8 + $0xa0] sm:$0xff] }
 0x380   : > { %v5049_v25 = vunpack.i.h.bf16 %v5047_v63  ;;  %v5048_v54 = vunpack.i.l.bf16 %v5047_v63  ;;  %v4984_v26 = vunpack.i.h.bf16 %v4982_v19  ;;  %v4983_v1 = vunpack.i.l.bf16 %v4982_v19  ;;  %v2715_v19 = vld [vmem:[%s7177_s8 + $0xe8] sm:$0xff] }
 0x381   : > { %4448 = vmatprep.subr.bf16.mxu1 %v4423_v30 }
 0x382   : > { %4422 = vmatpush1.bf16.msra.mxu0 %v4421_v10  ;;  %4450 = vmatpush1.bf16.msra.mxu1 %v4419_v38  ;;  %v2398_v21 = vsel %vm2384_vm6, %v5048_v54, %v5049_v25  ;;  %v2422_v45 = vsel %vm2409_vm5, %v4983_v1, %v4984_v26  ;;  %v6521_v10 = vld [vmem:[%s7172_s3 + $0x28] sm:$0xff]  ;;  %v6549_v54 = vld [vmem:[%s7172_s3 + $0x20] sm:$0xff]  ;;  %v6554_v26 = vld [vmem:[%s7172_s3 + $0x38] sm:$0xff] }
 0x383   : > { %v4987_v23 = vpop.permute.xlu1 %4986  ;;  %v5052_v36 = vpop.permute.xlu0 %5051  ;;  %4424 = vmatprep.subr.bf16.mxu0 %v4423_v30  ;;  %v4427_v58 = vpack.c.bf16 %v2398_v21, %v2397_v34  ;;  %v4499_v34 = vpack.c.bf16 %v2693_v7, %v2689_v13  ;;  %v2688_v21 = vld [vmem:[%s7177_s8 + $0x10] sm:$0xff]  ;;  %v2735_v7 = vld [vmem:[%s7177_s8 + $0x188] sm:$0xff] }
 0x384   : > { %v5054_v0 = vunpack.i.h.bf16 %v5052_v36  ;;  %v5053_v9 = vunpack.i.l.bf16 %v5052_v36  ;;  %v4989_v28 = vunpack.i.h.bf16 %v4987_v23  ;;  %v4988_v61 = vunpack.i.l.bf16 %v4987_v23  ;;  %v2692_v23 = vld [vmem:[%s7177_s8 + $0x30] sm:$0xff]  ;;  %v2697_v36 = vld [vmem:[%s7177_s8 + $0x58] sm:$0xff] }
 0x385   : > { %4452 = vmatprep.subr.bf16.mxu1 %v4427_v58 }
 0x386   : > { %4426 = vmatpush1.bf16.msra.mxu0 %v4419_v38  ;;  %4454 = vmatpush1.bf16.msra.mxu1 %v4423_v30  ;;  %v2423_v15 = vsel %vm2409_vm5, %v5053_v9, %v5054_v0  ;;  %v2410_v48 = vsel %vm2409_vm5, %v4988_v61, %v4989_v28  ;;  %v2703_v38 = vld [vmem:[%s7177_s8 + $0x88] sm:$0xff]  ;;  %v2701_v0 = vld [vmem:[%s7177_s8 + $0x78] sm:$0xff] }
 0x387   : > { %v4992_v53 = vpop.permute.xlu1 %4991  ;;  %v5057_v24 = vpop.permute.xlu0 %5056  ;;  %4428 = vmatprep.subr.bf16.mxu0 %v4427_v58  ;;  %v4455_v51 = vpack.c.bf16 %v2423_v15, %v2422_v45  ;;  %v4475_v5 = vpack.c.bf16 %v2707_v17, %v2703_v38  ;;  %v4477_v58 = vpack.c.bf16 %v2706_v52, %v2702_v20  ;;  %v2719_v28 = vld [vmem:[%s7177_s8 + $0x108] sm:$0xff]  ;;  %v2264_v45 = vld [vmem:[%s7172_s3 + $0x30] sm:$0xff]  ;;  %v4501_v15 = vpack.c.bf16 %v2692_v23, %v2688_v21  ;;  %v2721_v17 = vld [vmem:[%s7177_s8 + $0x118] sm:$0xff] }
 0x388   : > { %v5059_v14 = vunpack.i.h.bf16 %v5057_v24  ;;  %v5058_v41 = vunpack.i.l.bf16 %v5057_v24  ;;  %v4994_v55 = vunpack.i.h.bf16 %v4992_v53  ;;  %v4993_v32 = vunpack.i.l.bf16 %v4992_v53  ;;  %v2723_v61 = vld [vmem:[%s7177_s8 + $0x128] sm:$0xff]  ;;  %v2700_v53 = vld [vmem:[%s7177_s8 + $0x70] sm:$0xff]  ;;  %v2705_v24 = vld [vmem:[%s7177_s8 + $0x98] sm:$0xff] }
 0x389   : > { %4456 = vmatprep.subr.bf16.mxu1 %v4455_v51  ;;  %v4503_v31 = vpack.c.bf16 %v2701_v0, %v2697_v36  ;;  %v2737_v20 = vld [vmem:[%s7177_s8 + $0x198] sm:$0xff]  ;;  %v2743_v21 = vld [vmem:[%s7177_s8 + $0x1c8] sm:$0xff] }
 0x38a   : > { %v2411_v11 = vsel %vm2409_vm5, %v5058_v41, %v5059_v14  ;;  %4430 = vmatpush1.bf16.msra.mxu0 %v4423_v30  ;;  %v2435_v22 = vsel %vm2434_vm7, %v4993_v32, %v4994_v55  ;;  %v2711_v30 = vld [vmem:[%s7177_s8 + $0xc8] sm:$0xff]  ;;  %v4483_v14 = vpack.c.bf16 %v2723_v61, %v2719_v28  ;;  %v2718_v41 = vld [vmem:[%s7177_s8 + $0x100] sm:$0xff]  ;;  %v2704_v32 = vld [vmem:[%s7177_s8 + $0x90] sm:$0xff] }
 0x38b   : > { %v4457_v56 = vpack.c.bf16 %v2411_v11, %v2410_v48  ;;  %v4997_v57 = vpop.permute.xlu1 %4996  ;;  %v5062_v2 = vpop.permute.xlu0 %5061  ;;  %4468 = vmatprep.subr.bf16.mxu0 %v4467_v42  ;;  %v4479_v9 = vpack.c.bf16 %v2715_v19, %v2711_v30  ;;  %v2709_v42 = vld [vmem:[%s7177_s8 + $0xb8] sm:$0xff]  ;;  %v4505_v48 = vpack.c.bf16 %v2700_v53, %v2696_v37  ;;  %v2708_v11 = vld [vmem:[%s7177_s8 + $0xb0] sm:$0xff]  ;;  %v2734_v19 = vld [vmem:[%s7177_s8 + $0x180] sm:$0xff] }
 0x38c   : > { %v5064_v29 = vunpack.i.h.bf16 %v5062_v2  ;;  %v5063_v60 = vunpack.i.l.bf16 %v5062_v2  ;;  %v4999_v40 = vunpack.i.h.bf16 %v4997_v57  ;;  %v4998_v4 = vunpack.i.l.bf16 %v4997_v57  ;;  %v2717_v57 = vld [vmem:[%s7177_s8 + $0xf8] sm:$0xff]  ;;  %v2747_v23 = vld [vmem:[%s7177_s8 + $0x1e8] sm:$0xff]  ;;  %v2744_v61 = vld [vmem:[%s7177_s8 + $0x1d0] sm:$0xff] }
 0x38d   : > { %4458 = vmatpush1.bf16.msra.mxu1 %v4457_v56  ;;  %2529 = vmatmul.mubr.f32.vlgmr.msra.gmra.mrb[20].mxu0 %v6489_v50  ;;  %v4507_v55 = vpack.c.bf16 %v2709_v42, %v2705_v24  ;;  %v4485_v56 = vpack.c.bf16 %v2722_v16, %v2718_v41  ;;  %v2741_v30 = vld [vmem:[%s7177_s8 + $0x1b8] sm:$0xff] }
 0x38e   : > { %v2436_v8 = vsel %vm2434_vm7, %v5063_v60, %v5064_v29  ;;  %4063 = vmatprep.mubr.msk.f32.mxu0 %vm2451_vm2, %v6494_v18  ;;  %4470 = vmatpush1.bf16.msra.mxu0 %v4469_v6  ;;  %v2447_v63 = vsel %vm2434_vm7, %v4998_v4, %v4999_v40  ;;  %v2731_v6 = vld [vmem:[%s7177_s8 + $0x168] sm:$0xff]  ;;  %v4509_v29 = vpack.c.bf16 %v2708_v11, %v2704_v32  ;;  %v2725_v40 = vld [vmem:[%s7177_s8 + $0x138] sm:$0xff] }
 0x38f   : > { %v5067_v12 = vpop.permute.xlu0 %5066  ;;  %v4459_v33 = vpack.c.bf16 %v2436_v8, %v2435_v22  ;;  %4472 = vmatprep.subr.bf16.mxu0 %v4471_v35  ;;  %v4487_v2 = vpack.c.bf16 %v2731_v6, %v2727_v59  ;;  %v2730_v35 = vld [vmem:[%s7177_s8 + $0x160] sm:$0xff]  ;;  %v4513_v4 = vpack.c.bf16 %v2716_v44, %v2712_v43  ;;  %v4515_v22 = vpack.c.bf16 %v2725_v40, %v2721_v17  ;;  %v2720_v8 = vld [vmem:[%s7177_s8 + $0x110] sm:$0xff]  ;;  %v2745_v36 = vld [vmem:[%s7177_s8 + $0x1d8] sm:$0xff] }
 0x390   : > { %v5069_v39 = vunpack.i.h.bf16 %v5067_v12  ;;  %v5068_v46 = vunpack.i.l.bf16 %v5067_v12  ;;  %v2729_v12 = vld [vmem:[%s7177_s8 + $0x158] sm:$0xff] }
 0x391   : > { %4460 = vmatprep.subr.bf16.mxu1 %v4459_v33  ;;  %2535 = vmatmul.mubr.f32.gmra.mrb[22].mxu0 %v6516_v62  ;;  %v2749_v0 = vld [vmem:[%s7177_s8 + $0x1f8] sm:$0xff] }
 0x392   : > { %4462 = vmatpush1.bf16.msra.mxu1 %v4455_v51  ;;  %v2448_v25 = vsel %vm2434_vm7, %v5068_v46, %v5069_v39  ;;  %4064 = vmatprep.mubr.msk.f32.mxu0 %vm2451_vm2, %v6521_v10  ;;  %v4481_v51 = vpack.c.bf16 %v2714_v47, %v2710_v49  ;;  %v2732_v39 = vld [vmem:[%s7177_s8 + $0x170] sm:$0xff]  ;;  %v2746_v49 = vld [vmem:[%s7177_s8 + $0x1e0] sm:$0xff]  ;;  %v4527_v47 = vpack.c.bf16 %v2749_v0, %v2745_v36 }
 0x393   : > { %v4463_v1 = vpack.c.bf16 %v2448_v25, %v2447_v63  ;;  %4474 = vmatpush1.bf16.msra.mxu0 %v4473_v27  ;;  %v2728_v27 = vld [vmem:[%s7177_s8 + $0x150] sm:$0xff]  ;;  %v2738_v63 = vld [vmem:[%s7177_s8 + $0x1a0] sm:$0xff]  ;;  %v4523_v25 = vpack.c.bf16 %v2741_v30, %v2737_v20 }
 0x394   : > { %4476 = vmatprep.subr.bf16.mxu0 %v4475_v5  ;;  %v4521_v46 = vpack.c.bf16 %v2732_v39, %v2728_v27  ;;  %v2739_v5 = vld [vmem:[%s7177_s8 + $0x1a8] sm:$0xff] }
 0x395   : > { %4464 = vmatprep.subr.bf16.mxu1 %v4463_v1  ;;  %2541 = vmatmul.mubr.f32.gmra.mrb[24].mxu0 %v6549_v54  ;;  %v4491_v52 = vpack.c.bf16 %v2739_v5, %v2735_v7  ;;  %v2740_v1 = vld [vmem:[%s7177_s8 + $0x1b0] sm:$0xff] }
 0x396   : > { %4466 = vmatpush1.bf16.msra.mxu1 %v4459_v33  ;;  %4065 = vmatprep.mubr.msk.f32.mxu0 %vm2451_vm2, %v6554_v26  ;;  %v2733_v33 = vld [vmem:[%s7177_s8 + $0x178] sm:$0xff] }
 0x397   : > { %4500 = vmatprep.subr.bf16.mxu1 %v4499_v34  ;;  %4478 = vmatpush1.bf16.msra.mxu0 %v4477_v58  ;;  %v4519_v13 = vpack.c.bf16 %v2733_v33, %v2729_v12  ;;  %v4495_v58 = vpack.c.bf16 %v2747_v23, %v2743_v21 }
 0x398   : > { %4480 = vmatprep.subr.bf16.mxu0 %v4479_v9  ;;  %v2742_v9 = vld [vmem:[%s7177_s8 + $0x1c0] sm:$0xff] }
 0x399   : > { %2618 = vmatmul.mubr.f32.vlgmr.msra.gmra.mrb[20].mxu1 %v6489_v50  ;;  %2547 = vmatmul.mubr.f32.gmra.mrb[26].mxu0 %v2264_v45  ;;  %v2713_v50 = vld [vmem:[%s7177_s8 + $0xd8] sm:$0xff]  ;;  %v4497_v28 = vpack.c.bf16 %v2746_v49, %v2742_v9 }
 0x39a   : > { %4067 = vmatprep.mubr.msk.f32.mxu1 %vm2451_vm2, %v6494_v18  ;;  %4502 = vmatpush1.bf16.msra.mxu1 %v4501_v15  ;;  %v2726_v18 = vld [vmem:[%s7177_s8 + $0x140] sm:$0xff]  ;;  %v4511_v60 = vpack.c.bf16 %v2717_v57, %v2713_v50 }
 0x39b   : > { %4504 = vmatprep.subr.bf16.mxu1 %v4503_v31  ;;  %4482 = vmatpush1.bf16.msra.mxu0 %v4481_v51  ;;  %v4489_v38 = vpack.c.bf16 %v2730_v35, %v2726_v18 }
 0x39c   : > { %4484 = vmatprep.subr.bf16.mxu0 %v4483_v14  ;;  %2814 = vmatprep.mubr.f32.mxu0 %v7245_v3  ;;  %v2657_v57 = vpop.permute.xlu1 %2656 }
 0x39d   : > { %2624 = vmatmul.mubr.f32.gmra.mrb[22].mxu1 %v6516_v62  ;;  %v2724_v62 = vld [vmem:[%s7177_s8 + $0x130] sm:$0xff] }
 0x39e   : > { %4068 = vmatprep.mubr.msk.f32.mxu1 %vm2451_vm2, %v6521_v10  ;;  %4506 = vmatpush1.bf16.msra.mxu1 %v4505_v48  ;;  %v4517_v10 = vpack.c.bf16 %v2724_v62, %v2720_v8 }
 0x39f   : > { %4508 = vmatprep.subr.bf16.mxu1 %v4507_v55  ;;  %4486 = vmatpush1.bf16.msra.mxu0 %v4485_v56 }
 0x3a0   : > { %4488 = vmatprep.subr.bf16.mxu0 %v4487_v2  ;;  %v2662_v44 = vpop.permute.xlu0 %2661  ;;  %v2667_v62 = vpop.permute.xlu1 %2666 }
 0x3a1   : > { %2630 = vmatmul.mubr.f32.gmra.mrb[24].mxu1 %v6549_v54  ;;  %v4493_v54 = vpack.c.bf16 %v2738_v63, %v2734_v19 }
 0x3a2   : > { %4069 = vmatprep.mubr.msk.f32.mxu1 %vm2451_vm2, %v6554_v26  ;;  %4510 = vmatpush1.bf16.msra.mxu1 %v4509_v29  ;;  %v2736_v26 = vld [vmem:[%s7177_s8 + $0x190] sm:$0xff]  ;;  %vm3318_vm2 = vcmask 261120  }
 0x3a3   : > { %4512 = vmatprep.subr.bf16.mxu1 %v4511_v60  ;;  %4490 = vmatpush1.bf16.msra.mxu0 %v4489_v38  ;;  %v4525_v34 = vpack.c.bf16 %v2740_v1, %v2736_v26 }
 0x3a4   : > { %4492 = vmatprep.subr.bf16.mxu0 %v4491_v52  ;;  %v2672_v39 = vpop.permute.xlu0 %2671 }
 0x3a5   : > { %2636 = vmatmul.mubr.f32.gmra.mrb[26].mxu1 %v2264_v45  ;;  %v2748_v45 = vld [vmem:[%s7177_s8 + $0x1f0] sm:$0xff] }
 0x3a6   : > { %4514 = vmatpush1.bf16.msra.mxu1 %v4513_v4  ;;  %2903 = vmatprep.mubr.f32.mxu1 %v7245_v3  ;;  %v4529_v15 = vpack.c.bf16 %v2748_v45, %v2744_v61 }
 0x3a7   : > { %4516 = vmatprep.subr.bf16.mxu1 %v4515_v22  ;;  %4494 = vmatpush1.bf16.msra.mxu0 %v4493_v54 }
 0x3a8   : > { %4496 = vmatprep.subr.bf16.mxu0 %v4495_v58 }
 0x3aa   : > { %4518 = vmatpush1.bf16.msra.mxu1 %v4517_v10 }
 0x3ab   : > { %4520 = vmatprep.subr.bf16.mxu1 %v4519_v13  ;;  %4498 = vmatpush1.bf16.msra.mxu0 %v4497_v28 }
 0x3ae   : > { %4522 = vmatpush1.bf16.msra.mxu1 %v4521_v46 }
 0x3af   : > { %4524 = vmatprep.subr.bf16.mxu1 %v4523_v25 }
 0x3b2   : > { %4526 = vmatpush1.bf16.msra.mxu1 %v4525_v34 }
 0x3b3   : > { %4528 = vmatprep.subr.bf16.mxu1 %v4527_v47 }
 0x3b6   : > { %4530 = vmatpush1.bf16.msra.mxu1 %v4529_v15 }
 0x460   : > { %v2530_v31 = vpop.f32.mrb[20].mxu0 }
 0x461   : > { %v2532_v37 = vpop.f32.mrb[21].mxu0 }
 0x462   : > { %v2642_v53 = vmax.f32 %v2530_v31, %v2532_v37 }
 0x464   : > { %v2536_v24 = vpop.f32.mrb[22].mxu0 }
 0x465   : > { %v2538_v51 = vpop.f32.mrb[23].mxu0 }
 0x466   : > { %v2643_v42 = vmax.f32 %v2536_v24, %v2538_v51 }
 0x468   : > { %v2542_v14 = vpop.f32.mrb[24].mxu0 }
 0x469   : > { %v2544_v41 = vpop.f32.mrb[25].mxu0 }
 0x46a   : > { %v2644_v16 = vmax.f32 %v2542_v14, %v2544_v41  ;;  %v2952_v14 = vld [vmem:[%s7175_s6] sm:$0xff]  ;;  %v2954_v41 = vld [vmem:[%s7175_s6 + $0x10] sm:$0xff] }
 0x46c   : > { %v2619_v59 = vpop.f32.mrb[20].mxu1  ;;  %v2548_v6 = vpop.f32.mrb[26].mxu0 }
 0x46d   : > { %v2621_v48 = vpop.f32.mrb[21].mxu1  ;;  %v2550_v55 = vpop.f32.mrb[27].mxu0 }
 0x46e   : > { %v2646_v32 = vmax.f32 %v2619_v59, %v2621_v48  ;;  %v2645_v11 = vmax.f32 %v2548_v6, %v2550_v55  ;;  %v2953_v59 = vld [vmem:[%s7175_s6 + $0x8] sm:$0xff]  ;;  %v2956_v6 = vld [vmem:[%s7175_s6 + $0x20] sm:$0xff] }
 0x470   : > { %v2650_v50 = vmax.f32 %v2642_v53, %v2646_v32  ;;  %v2625_v56 = vpop.f32.mrb[22].mxu1 }
 0x471   : > { %v2627_v2 = vpop.f32.mrb[23].mxu1 }
 0x472   : > { %v2674_v18 = vadd.f32 %v2657_v57, %v2650_v50  ;;  %v2647_v35 = vmax.f32 %v2625_v56, %v2627_v2  ;;  %v2958_v2 = vld [vmem:[%s7175_s6 + $0x30] sm:$0xff] }
 0x474   : > { %v2678_v29 = vmax.f32 %v2674_v18, 0.0  ;;  %v2651_v60 = vmax.f32 %v2643_v42, %v2647_v35  ;;  %v2631_v43 = vpop.f32.mrb[24].mxu1  ;;  %v2929_v42 = vld [vmem:[%s7174_s5 + $0x8] sm:$0xff] }
 0x475   : > { %v2633_v38 = vpop.f32.mrb[25].mxu1 }
 0x476   : > { %2682 = vst [vmem:[%s6721_s12] sm:$0xff] %v2678_v29  ;;  %v2648_v17 = vmax.f32 %v2631_v43, %v2633_v38  ;;  %2815 = vmatmul.mubr.f32.vlgmr.msra.gmra.mrb[28].mxu0 %v2678_v29  ;;  %2904 = vmatmul.mubr.f32.vlgmr.msra.gmra.mrb[28].mxu1 %v2678_v29  ;;  %v2675_v40 = vadd.f32 %v2662_v44, %v2651_v60  ;;  %v2957_v44 = vld [vmem:[%s7175_s6 + $0x28] sm:$0xff] }
 0x477   : > { %2820 = vmatprep.mubr.f32.mxu0 %v7245_v3  ;;  %2909 = vmatprep.mubr.f32.mxu1 %v7245_v3 }
 0x478   : > { %v2652_v4 = vmax.f32 %v2644_v16, %v2648_v17  ;;  %v2637_v22 = vpop.f32.mrb[26].mxu1  ;;  %v2679_v8 = vmax.f32 %v2675_v40, 0.0 }
 0x479   : > { %v2639_v12 = vpop.f32.mrb[27].mxu1 }
 0x47a   : > { %v2649_v33 = vmax.f32 %v2637_v22, %v2639_v12  ;;  %2683 = vst [vmem:[%s6721_s12 + $0x8] sm:$0xff] %v2679_v8  ;;  %2821 = vmatmul.mubr.f32.gmra.mrb[30].mxu0 %v2679_v8  ;;  %2910 = vmatmul.mubr.f32.gmra.mrb[30].mxu1 %v2679_v8  ;;  %v2676_v10 = vadd.f32 %v2667_v62, %v2652_v4 }
 0x47b   : > { %2826 = vmatprep.mubr.f32.mxu0 %v7245_v3  ;;  %2915 = vmatprep.mubr.f32.mxu1 %v7245_v3 }
 0x47c   : > { %v2653_v13 = vmax.f32 %v2645_v11, %v2649_v33  ;;  %v2680_v27 = vmax.f32 %v2676_v10, 0.0  ;;  %v2955_v11 = vld [vmem:[%s7175_s6 + $0x18] sm:$0xff] }
 0x47d   : > { %v2959_v10 = vld [vmem:[%s7175_s6 + $0x38] sm:$0xff] }
 0x47e   : > { %2684 = vst [vmem:[%s6721_s12 + $0x10] sm:$0xff] %v2680_v27  ;;  %2827 = vmatmul.mubr.f32.gmra.mrb[32].mxu0 %v2680_v27  ;;  %2916 = vmatmul.mubr.f32.gmra.mrb[32].mxu1 %v2680_v27  ;;  %v2677_v46 = vadd.f32 %v2672_v39, %v2653_v13 }
 0x47f   : > { %2832 = vmatprep.mubr.f32.mxu0 %v7245_v3  ;;  %2921 = vmatprep.mubr.f32.mxu1 %v7245_v3 }
 0x480   : > { %v2681_v7 = vmax.f32 %v2677_v46, 0.0 }
 0x482   : > { %2685 = vst [vmem:[%s6721_s12 + $0x18] sm:$0xff] %v2681_v7  ;;  %2833 = vmatmul.mubr.f32.gmra.mrb[34].mxu0 %v2681_v7  ;;  %2922 = vmatmul.mubr.f32.gmra.mrb[34].mxu1 %v2681_v7 }
 0x483   : > { %3407 = vmatprep.mubr.f32.mxu0 %v2929_v42  ;;  %3633 = vmatprep.mubr.f32.mxu1 %v2929_v42 }
 0x549   : > { %v2816_v5 = vpop.f32.mrb[28].mxu0  ;;  %v2905_v20 = vpop.f32.mrb[28].mxu1 }
 0x54a   : > { %v2818_v52 = vpop.f32.mrb[29].mxu0  ;;  %v2907_v30 = vpop.f32.mrb[29].mxu1 }
 0x54b   : > { %v6733_v19 = vpack.i.bf16 %v2818_v52, %v2816_v5  ;;  %v6735_v63 = vpack.i.bf16 %v2907_v30, %v2905_v20 }
 0x54d   : > { %v2911_v25 = vpop.f32.mrb[30].mxu1  ;;  %5071 = vrot.lane.b32.xlu1 %v6733_v19, %s5408_s13  ;;  %v2822_v54 = vpop.f32.mrb[30].mxu0 }
 0x54e   : > { %v2824_v26 = vpop.f32.mrb[31].mxu0  ;;  %v2913_v1 = vpop.f32.mrb[31].mxu1  ;;  %v6739_v34 = vpack.c.bf16 %v2911_v25, %v2905_v20  ;;  %v4533_v21 = vpack.c.bf16 %v2822_v54, %v2816_v5 }
 0x54f   : > { %v6741_v23 = vpack.i.bf16 %v2824_v26, %v2822_v54  ;;  %v6743_v36 = vpack.i.bf16 %v2913_v1, %v2911_v25 }
 0x550   : > { %4532 = vmatprep.subr.bf16.mxu0 %v6739_v34 }
 0x551   : > { %v2917_v58 = vpop.f32.mrb[32].mxu1  ;;  %5076 = vrot.lane.b32.xlu1 %v6735_v63, %s5409_s14  ;;  %4534 = vmatpush1.bf16.msra.mxu0 %v4533_v21  ;;  %v2828_v0 = vpop.f32.mrb[32].mxu0 }
 0x552   : > { %5121 = vrot.lane.b32.xlu0 %v6741_v23, %s5408_s13  ;;  %v2830_v9 = vpop.f32.mrb[33].mxu0  ;;  %v2919_v49 = vpop.f32.mrb[33].mxu1 }
 0x553   : > { %v6750_v47 = vpack.i.bf16 %v2830_v9, %v2828_v0  ;;  %v6752_v28 = vpack.i.bf16 %v2919_v49, %v2917_v58 }
 0x555   : > { %5081 = vrot.lane.b32.xlu1 %v6733_v19, %s5393_s22  ;;  %v2834_v61 = vpop.f32.mrb[34].mxu0  ;;  %v2923_v45 = vpop.f32.mrb[34].mxu1 }
 0x556   : > { %5126 = vrot.lane.b32.xlu0 %v6743_v36, %s5409_s14  ;;  %v2836_v15 = vpop.f32.mrb[35].mxu0  ;;  %v2925_v31 = vpop.f32.mrb[35].mxu1  ;;  %v6758_v37 = vpack.c.bf16 %v2923_v45, %v2917_v58  ;;  %v4537_v53 = vpack.c.bf16 %v2834_v61, %v2828_v0 }
 0x557   : > { %v5225_v24 = vpack.i.bf16 %v2836_v15, %v2834_v61  ;;  %v5230_v51 = vpack.i.bf16 %v2925_v31, %v2923_v45 }
 0x558   : > { %4536 = vmatprep.subr.bf16.mxu0 %v6758_v37 }
 0x559   : > { %5086 = vrot.lane.b32.xlu1 %v6735_v63, %s5408_s13  ;;  %4538 = vmatpush1.bf16.msra.mxu0 %v4537_v53 }
 0x55a   : > { %5131 = vrot.lane.b32.xlu0 %v6741_v23, %s5393_s22 }
 0x55d   : > { %5091 = vrot.lane.b32.xlu1 %v6735_v63, %s5393_s22 }
 0x55e   : > { %5136 = vrot.lane.b32.xlu0 %v6743_v36, %s5408_s13 }
 0x561   : > { %5096 = vrot.lane.b32.xlu1 %v6733_v19, %s5410_s24 }
 0x562   : > { %5141 = vrot.lane.b32.xlu0 %v6743_v36, %s5393_s22 }
 0x565   : > { %5101 = vrot.lane.b32.xlu1 %v6735_v63, %s5404_s28 }
 0x566   : > { %5146 = vrot.lane.b32.xlu0 %v6741_v23, %s5410_s24 }
 0x569   : > { %5106 = vrot.lane.b32.xlu1 %v6733_v19, %s5404_s28 }
 0x56a   : > { %5151 = vrot.lane.b32.xlu0 %v6743_v36, %s5404_s28 }
 0x56d   : > { %5111 = vrot.lane.b32.xlu1 %v6733_v19, %s5411_s15 }
 0x56e   : > { %5156 = vrot.lane.b32.xlu0 %v6741_v23, %s5404_s28 }
 0x571   : > { %5116 = vrot.lane.b32.xlu1 %v6735_v63, %s5411_s15 }
 0x572   : > { %5161 = vrot.lane.b32.xlu0 %v6741_v23, %s5411_s15 }
 0x575   : > { %5171 = vrot.lane.b32.xlu1 %v6750_v47, %s5408_s13 }
 0x576   : > { %5166 = vrot.lane.b32.xlu0 %v6743_v36, %s5411_s15 }
 0x579   : > { %5176 = vrot.lane.b32.xlu1 %v6752_v28, %s5409_s14 }
 0x57a   : > { %5226 = vrot.lane.b32.xlu0 %v5225_v24, %s5408_s13 }
 0x57d   : > { %5181 = vrot.lane.b32.xlu1 %v6750_v47, %s5393_s22 }
 0x57e   : > { %5231 = vrot.lane.b32.xlu0 %v5230_v51, %s5409_s14 }
 0x581   : > { %5186 = vrot.lane.b32.xlu1 %v6752_v28, %s5408_s13 }
 0x582   : > { %5236 = vrot.lane.b32.xlu0 %v5225_v24, %s5393_s22 }
 0x585   : > { %5191 = vrot.lane.b32.xlu1 %v6752_v28, %s5393_s22 }
 0x586   : > { %5241 = vrot.lane.b32.xlu0 %v5230_v51, %s5408_s13 }
 0x589   : > { %5196 = vrot.lane.b32.xlu1 %v6750_v47, %s5410_s24 }
 0x58a   : > { %5246 = vrot.lane.b32.xlu0 %v5230_v51, %s5393_s22  ;;  %s5413_s22 = smov 115  }
 0x58d   : > { %5201 = vrot.lane.b32.xlu1 %v6752_v28, %s5404_s28 }
 0x58e   : > { %5251 = vrot.lane.b32.xlu0 %v5225_v24, %s5410_s24 }
 0x591   : > { %5206 = vrot.lane.b32.xlu1 %v6750_v47, %s5404_s28 }
 0x592   : > { %5256 = vrot.lane.b32.xlu0 %v5230_v51, %s5404_s28 }
 0x595   : > { %5211 = vrot.lane.b32.xlu1 %v6733_v19, %s5412_s16 }
 0x596   : > { %5261 = vrot.lane.b32.xlu0 %v5225_v24, %s5404_s28 }
 0x599   : > { %5216 = vrot.lane.b32.xlu1 %v6750_v47, %s5411_s15 }
 0x59a   : > { %5266 = vrot.lane.b32.xlu0 %v6741_v23, %s5412_s16 }
 0x59d   : > { %5221 = vrot.lane.b32.xlu1 %v6752_v28, %s5411_s15 }
 0x59e   : > { %5276 = vrot.lane.b32.xlu0 %v5225_v24, %s5411_s15 }
 0x5a1   : > { %5271 = vrot.lane.b32.xlu1 %v6735_v63, %s5413_s22 }
 0x5a2   : > { %5281 = vrot.lane.b32.xlu0 %v6743_v36, %s5413_s22 }
 0x5a5   : > { %5286 = vrot.lane.b32.xlu1 %v6750_v47, %s5412_s16 }
 0x5a6   : > { %5301 = vrot.lane.b32.xlu0 %v5230_v51, %s5411_s15 }
 0x5a9   : > { %5291 = vrot.lane.b32.xlu1 %v6752_v28, %s5413_s22 }
 0x5aa   : > { %5306 = vrot.lane.b32.xlu0 %v5225_v24, %s5412_s16 }
 0x5ad   : > { %5296 = vrot.lane.b32.xlu1 %v6735_v63, %s5412_s16 }
 0x5ae   : > { %5311 = vrot.lane.b32.xlu0 %v5230_v51, %s5413_s22 }
 0x5b1   : > { %5321 = vrot.lane.b32.xlu1 %v6752_v28, %s5412_s16 }
 0x5b2   : > { %5316 = vrot.lane.b32.xlu0 %v6743_v36, %s5412_s16 }
 0x5b5   : > { %5331 = vrot.lane.b32.xlu1 %v6733_v19, %s5394_s23 }
 0x5b6   : > { %5326 = vrot.lane.b32.xlu0 %v5230_v51, %s5412_s16 }
 0x5b9   : > { %5341 = vrot.lane.b32.xlu1 %v6750_v47, %s5394_s23 }
 0x5ba   : > { %5336 = vrot.lane.b32.xlu0 %v6741_v23, %s5394_s23 }
 0x5bd   : > { %3821 = vperm.xlu1 %4929, %v2952_v14  }
 0x5be   : > { %5346 = vrot.lane.b32.xlu0 %v5225_v24, %s5394_s23 }
 0x5bf   : > { %v5072_v16 = vpop.permute.xlu1 %5071 }
 0x5c0   : > { %v5074_v48 = vunpack.i.h.bf16 %v5072_v16  ;;  %v5073_v55 = vunpack.i.l.bf16 %v5072_v16 }
 0x5c1   : > { %3831 = vperm.xlu1 %4929, %v2954_v41  }
 0x5c2   : > { %3826 = vperm.xlu0 %4928, %v2953_v59   ;;  %v3018_v18 = vsel %vm3017_vm8, %v5073_v55, %v5074_v48 }
 0x5c3   : > { %v5077_v32 = vpop.permute.xlu1 %5076 }
 0x5c4   : > { %v5122_v50 = vpop.permute.xlu0 %5121  ;;  %v5079_v35 = vunpack.i.h.bf16 %v5077_v32  ;;  %v5078_v29 = vunpack.i.l.bf16 %v5077_v32 }
 0x5c5   : > { %v5124_v56 = vunpack.i.h.bf16 %v5122_v50  ;;  %v5123_v57 = vunpack.i.l.bf16 %v5122_v50  ;;  %3841 = vperm.xlu1 %4929, %v2956_v6  }
 0x5c6   : > { %3836 = vperm.xlu0 %4928, %v2955_v11   ;;  %v2985_v22 = vsel %vm2984_vm9, %v5078_v29, %v5079_v35 }
 0x5c7   : > { %v3019_v60 = vsel %vm3017_vm8, %v5123_v57, %v5124_v56  ;;  %v5082_v43 = vpop.permute.xlu1 %5081 }
 0x5c8   : > { %v6859_v38 = vpack.c.bf16 %v3019_v60, %v3018_v18  ;;  %v5127_v17 = vpop.permute.xlu0 %5126  ;;  %v5084_v8 = vunpack.i.h.bf16 %v5082_v43  ;;  %v5083_v62 = vunpack.i.l.bf16 %v5082_v43 }
 0x5c9   : > { %v5129_v40 = vunpack.i.h.bf16 %v5127_v17  ;;  %v5128_v4 = vunpack.i.l.bf16 %v5127_v17  ;;  %3851 = vperm.xlu1 %4929, %v2958_v2  }
 0x5ca   : > { %4604 = vmatprep.subr.bf16.mxu1 %v6859_v38  ;;  %3846 = vperm.xlu0 %4928, %v2957_v44   ;;  %v3042_v5 = vsel %vm530_vm1, %v5083_v62, %v5084_v8 }
 0x5cb   : > { %v2986_v12 = vsel %vm2984_vm9, %v5128_v4, %v5129_v40  ;;  %v5087_v33 = vpop.permute.xlu1 %5086 }
 0x5cc   : > { %v6867_v13 = vpack.c.bf16 %v2986_v12, %v2985_v22  ;;  %v5132_v27 = vpop.permute.xlu0 %5131  ;;  %v5089_v41 = vunpack.i.h.bf16 %v5087_v33  ;;  %v5088_v16 = vunpack.i.l.bf16 %v5087_v33 }
 0x5cd   : > { %v5134_v39 = vunpack.i.h.bf16 %v5132_v27  ;;  %v5133_v46 = vunpack.i.l.bf16 %v5132_v27 }
 0x5ce   : > { %4606 = vmatpush1.bf16.msra.mxu1 %v6867_v13  ;;  %3856 = vperm.xlu0 %4928, %v2959_v10   ;;  %v3066_v29 = vsel %vm3017_vm8, %v5088_v16, %v5089_v41 }
 0x5cf   : > { %v6870_v7 = vpop.permute.xlu1 %5091  ;;  %v3043_v20 = vsel %vm530_vm1, %v5133_v46, %v5134_v39 }
 0x5d0   : > { %v5137_v52 = vpop.permute.xlu0 %5136  ;;  %v6874_v30 = vpack.c.bf16 %v3043_v20, %v3042_v5  ;;  %v5094_v60 = vunpack.i.h.bf16 %v6870_v7  ;;  %v5093_v43 = vunpack.i.l.bf16 %v6870_v7 }
 0x5d1   : > { %v5139_v15 = vunpack.i.h.bf16 %v5137_v52  ;;  %v5138_v31 = vunpack.i.l.bf16 %v5137_v52 }
 0x5d2   : > { %4540 = vmatprep.subr.bf16.mxu0 %v6874_v30  ;;  %v3090_v20 = vsel %vm530_vm1, %v5093_v43, %v5094_v60 }
 0x5d3   : > { %4542 = vmatpush1.bf16.msra.mxu0 %v6739_v34  ;;  %v6878_v19 = vpop.permute.xlu1 %5096  ;;  %v3067_v32 = vsel %vm3017_vm8, %v5138_v31, %v5139_v15 }
 0x5d4   : > { %v5142_v63 = vpop.permute.xlu0 %5141  ;;  %v6911_v40 = vpack.c.bf16 %v3067_v32, %v3066_v29  ;;  %v5099_v52 = vunpack.i.h.bf16 %v6878_v19 }
 0x5d5   : > { %v5144_v11 = vunpack.i.h.bf16 %v5142_v63  ;;  %v5143_v50 = vunpack.i.l.bf16 %v5142_v63  ;;  %v5098_v63 = vunpack.i.l.bf16 %v6878_v19 }
 0x5d7   : > { %v6880_v25 = vpop.permute.xlu1 %5101  ;;  %v3091_v12 = vsel %vm530_vm1, %v5143_v50, %v5144_v11 }
 0x5d8   : > { %v6882_v54 = vpop.permute.xlu0 %5146  ;;  %v5104_v32 = vunpack.i.h.bf16 %v6880_v25  ;;  %v5103_v11 = vunpack.i.l.bf16 %v6880_v25 }
 0x5d9   : > { %v5149_v8 = vunpack.i.h.bf16 %v6882_v54  ;;  %v5148_v62 = vunpack.i.l.bf16 %v6882_v54 }
 0x5da   : > { %v3163_v60 = vsel %vm2323_vm4, %v5103_v11, %v5104_v32 }
 0x5db   : > { %v6884_v26 = vpop.permute.xlu1 %5106 }
 0x5dc   : > { %v6886_v1 = vpop.permute.xlu0 %5151  ;;  %v5109_v43 = vunpack.i.h.bf16 %v6884_v26 }
 0x5df   : > { %v6888_v21 = vpop.permute.xlu1 %5111 }
 0x5e0   : > { %v6890_v23 = vpop.permute.xlu0 %5156 }
 0x5e3   : > { %v6892_v36 = vpop.permute.xlu1 %5116 }
 0x5e4   : > { %v6894_v58 = vpop.permute.xlu0 %5161 }
 0x5e7   : > { %v5172_v34 = vpop.permute.xlu1 %5171 }
 0x5e8   : > { %v6896_v0 = vpop.permute.xlu0 %5166  ;;  %v5174_v9 = vunpack.i.h.bf16 %v5172_v34  ;;  %v5173_v49 = vunpack.i.l.bf16 %v5172_v34 }
 0x5ea   : > { %v3020_v53 = vsel %vm3017_vm8, %v5173_v49, %v5174_v9  ;;  %v4547_v9 = vpack.c.bf16 %v3091_v12, %v3090_v20  ;;  %v3116_v49 = vsel %vm3114_vm10, %v5148_v62, %v5149_v8 }
 0x5eb   : > { %v5177_v47 = vpop.permute.xlu1 %5176 }
 0x5ec   : > { %v5227_v28 = vpop.permute.xlu0 %5226  ;;  %v5179_v24 = vunpack.i.h.bf16 %v5177_v47  ;;  %v5178_v51 = vunpack.i.l.bf16 %v5177_v47 }
 0x5ed   : > { %v5229_v61 = vunpack.i.h.bf16 %v5227_v28  ;;  %v5228_v45 = vunpack.i.l.bf16 %v5227_v28 }
 0x5ee   : > { %v2987_v56 = vsel %vm2984_vm9, %v5178_v51, %v5179_v24  ;;  %v3115_v51 = vsel %vm3114_vm10, %v5098_v63, %v5099_v52  ;;  %v5114_v52 = vunpack.i.h.bf16 %v6888_v21  ;;  %v5113_v63 = vunpack.i.l.bf16 %v6888_v21 }
 0x5ef   : > { %v3021_v42 = vsel %vm3017_vm8, %v5228_v45, %v5229_v61  ;;  %v5182_v14 = vpop.permute.xlu1 %5181  ;;  %v6934_v41 = vpack.c.bf16 %v3116_v49, %v3115_v51  ;;  %v5168_v51 = vunpack.i.l.bf16 %v6896_v0 }
 0x5f0   : > { %v6900_v59 = vpack.c.bf16 %v3021_v42, %v3020_v53  ;;  %v5232_v6 = vpop.permute.xlu0 %5231  ;;  %v5184_v57 = vunpack.i.h.bf16 %v5182_v14  ;;  %v5183_v2 = vunpack.i.l.bf16 %v5182_v14  ;;  %v5154_v42 = vunpack.i.h.bf16 %v6886_v1 }
 0x5f1   : > { %v5234_v48 = vunpack.i.h.bf16 %v5232_v6  ;;  %v5233_v55 = vunpack.i.l.bf16 %v5232_v6  ;;  %v5153_v14 = vunpack.i.l.bf16 %v6886_v1 }
 0x5f2   : > { %4608 = vmatprep.subr.bf16.mxu1 %v6900_v59  ;;  %v3044_v39 = vsel %vm530_vm1, %v5183_v2, %v5184_v57  ;;  %v5159_v2 = vunpack.i.h.bf16 %v6890_v23 }
 0x5f3   : > { %v2988_v18 = vsel %vm2984_vm9, %v5233_v55, %v5234_v48  ;;  %v5187_v35 = vpop.permute.xlu1 %5186 }
 0x5f4   : > { %v6909_v44 = vpack.c.bf16 %v2988_v18, %v2987_v56  ;;  %v5237_v17 = vpop.permute.xlu0 %5236  ;;  %v5189_v33 = vunpack.i.h.bf16 %v5187_v35  ;;  %v5188_v10 = vunpack.i.l.bf16 %v5187_v35  ;;  %v3164_v18 = vsel %vm2323_vm4, %v5153_v14, %v5154_v42 }
 0x5f5   : > { %v5239_v4 = vunpack.i.h.bf16 %v5237_v17  ;;  %v5238_v22 = vunpack.i.l.bf16 %v5237_v17  ;;  %v5108_v17 = vunpack.i.l.bf16 %v6884_v26 }
 0x5f6   : > { %4610 = vmatpush1.bf16.msra.mxu1 %v6909_v44  ;;  %v3068_v47 = vsel %vm3017_vm8, %v5188_v10, %v5189_v33  ;;  %v6955_v33 = vpack.c.bf16 %v3164_v18, %v3163_v60 }
 0x5f7   : > { %4612 = vmatprep.subr.bf16.mxu1 %v6911_v40  ;;  %v5192_v27 = vpop.permute.xlu1 %5191  ;;  %v3045_v46 = vsel %vm530_vm1, %v5238_v22, %v5239_v4  ;;  %v3139_v20 = vsel %vm2323_vm4, %v5108_v17, %v5109_v43 }
 0x5f8   : > { %v5242_v7 = vpop.permute.xlu0 %5241  ;;  %v4543_v5 = vpack.c.bf16 %v3045_v46, %v3044_v39  ;;  %v5194_v28 = vunpack.i.h.bf16 %v5192_v27  ;;  %v5193_v61 = vunpack.i.l.bf16 %v5192_v27  ;;  %v5164_v27 = vunpack.i.h.bf16 %v6894_v58 }
 0x5f9   : > { %v5244_v54 = vunpack.i.h.bf16 %v5242_v7  ;;  %v5243_v34 = vunpack.i.l.bf16 %v5242_v7  ;;  %v5163_v39 = vunpack.i.l.bf16 %v6894_v58 }
 0x5fa   : > { %4544 = vmatprep.subr.bf16.mxu0 %v4543_v5  ;;  %4614 = vmatpush1.bf16.msra.mxu1 %v6859_v38  ;;  %v3092_v48 = vsel %vm530_vm1, %v5193_v61, %v5194_v28 }
 0x5fb   : > { %v3069_v45 = vsel %vm3017_vm8, %v5243_v34, %v5244_v54  ;;  %4546 = vmatpush1.bf16.msra.mxu0 %v6758_v37  ;;  %v5197_v15 = vpop.permute.xlu1 %5196 }
 0x5fc   : > { %v6928_v31 = vpack.c.bf16 %v3069_v45, %v3068_v47  ;;  %v5247_v19 = vpop.permute.xlu0 %5246  ;;  %4548 = vmatprep.subr.bf16.mxu0 %v4547_v9  ;;  %v5199_v16 = vunpack.i.h.bf16 %v5197_v15  ;;  %v5198_v6 = vunpack.i.l.bf16 %v5197_v15 }
 0x5fd   : > { %v5249_v53 = vunpack.i.h.bf16 %v5247_v19  ;;  %v5248_v24 = vunpack.i.l.bf16 %v5247_v19 }
 0x5fe   : > { %4616 = vmatprep.subr.bf16.mxu1 %v6928_v31  ;;  %v3117_v29 = vsel %vm3114_vm10, %v5198_v6, %v5199_v16  ;;  %v5119_v6 = vunpack.i.h.bf16 %v6892_v36 }
 0x5ff   : > { %4550 = vmatpush1.bf16.msra.mxu0 %v6874_v30  ;;  %4618 = vmatpush1.bf16.msra.mxu1 %v6900_v59  ;;  %v5202_v37 = vpop.permute.xlu1 %5201  ;;  %v3093_v55 = vsel %vm530_vm1, %v5248_v24, %v5249_v53  ;;  %v5158_v30 = vunpack.i.l.bf16 %v6890_v23  ;;  %vm3187_vm1 = vcmask 965632   ;;  %v5169_v24 = vunpack.i.h.bf16 %v6896_v0 }
 0x600   : > { %v5252_v1 = vpop.permute.xlu0 %5251  ;;  %4620 = vmatprep.subr.bf16.mxu1 %v6934_v41  ;;  %v4551_v50 = vpack.c.bf16 %v3093_v55, %v3092_v48  ;;  %v5204_v22 = vunpack.i.h.bf16 %v5202_v37  ;;  %v5203_v8 = vunpack.i.l.bf16 %v5202_v37  ;;  %v3189_v47 = vsel %vm3187_vm1, %v5163_v39, %v5164_v27 }
 0x601   : > { %v5254_v56 = vunpack.i.h.bf16 %v5252_v1  ;;  %v5253_v57 = vunpack.i.l.bf16 %v5252_v1  ;;  %v3140_v10 = vsel %vm2323_vm4, %v5158_v30, %v5159_v2  ;;  %v3188_v19 = vsel %vm3187_vm1, %v5113_v63, %v5114_v52 }
 0x602   : > { %4552 = vmatprep.subr.bf16.mxu0 %v4551_v50  ;;  %v6971_v58 = vpack.c.bf16 %v3140_v10, %v3139_v20  ;;  %v3165_v34 = vsel %vm2323_vm4, %v5203_v8, %v5204_v22  ;;  %v6986_v53 = vpack.c.bf16 %v3189_v47, %v3188_v19  ;;  %v5118_v37 = vunpack.i.l.bf16 %v6892_v36 }
 0x603   : > { %4554 = vmatpush1.bf16.msra.mxu0 %v4543_v5  ;;  %4622 = vmatpush1.bf16.msra.mxu1 %v6911_v40  ;;  %v5207_v35 = vpop.permute.xlu1 %5206  ;;  %v3118_v25 = vsel %vm3114_vm10, %v5253_v57, %v5254_v56  ;;  %v3213_v11 = vsel %vm3187_vm1, %v5168_v51, %v5169_v24 }
 0x604   : > { %v5257_v4 = vpop.permute.xlu0 %5256  ;;  %4556 = vmatprep.subr.bf16.mxu0 %v6859_v38  ;;  %v6953_v23 = vpack.c.bf16 %v3118_v25, %v3117_v29  ;;  %v5209_v26 = vunpack.i.h.bf16 %v5207_v35  ;;  %v5208_v46 = vunpack.i.l.bf16 %v5207_v35  ;;  %v3212_v36 = vsel %vm3187_vm1, %v5118_v37, %v5119_v6 }
 0x605   : > { %v5259_v62 = vunpack.i.h.bf16 %v5257_v4  ;;  %v5258_v12 = vunpack.i.l.bf16 %v5257_v4  ;;  %v7006_v56 = vpack.c.bf16 %v3213_v11, %v3212_v36 }
 0x606   : > { %4624 = vmatprep.subr.bf16.mxu1 %v6953_v23  ;;  %v3141_v28 = vsel %vm2323_vm4, %v5208_v46, %v5209_v26 }
 0x607   : > { %v3166_v7 = vsel %vm2323_vm4, %v5258_v12, %v5259_v62  ;;  %4558 = vmatpush1.bf16.msra.mxu0 %v6867_v13  ;;  %4626 = vmatpush1.bf16.msra.mxu1 %v6928_v31  ;;  %v6964_v5 = vpop.permute.xlu1 %5211 }
 0x608   : > { %v5262_v54 = vpop.permute.xlu0 %5261  ;;  %4560 = vmatprep.subr.bf16.mxu0 %v6900_v59  ;;  %4628 = vmatprep.subr.bf16.mxu1 %v6955_v33  ;;  %v6974_v49 = vpack.c.bf16 %v3166_v7, %v3165_v34  ;;  %v5214_v35 = vunpack.i.h.bf16 %v6964_v5  ;;  %v5213_v29 = vunpack.i.l.bf16 %v6964_v5 }
 0x609   : > { %v5264_v13 = vunpack.i.h.bf16 %v5262_v54  ;;  %v5263_v9 = vunpack.i.l.bf16 %v5262_v54 }
 0x60a   : > { %v3262_v27 = vsel %vm3261_vm11, %v5213_v29, %v5214_v35 }
 0x60b   : > { %v3142_v21 = vsel %vm2323_vm4, %v5263_v9, %v5264_v13  ;;  %4562 = vmatpush1.bf16.msra.mxu0 %v6909_v44  ;;  %4630 = vmatpush1.bf16.msra.mxu1 %v6971_v58  ;;  %v5217_v61 = vpop.permute.xlu1 %5216 }
 0x60c   : > { %v6981_v45 = vpack.c.bf16 %v3142_v21, %v3141_v28  ;;  %v5267_v15 = vpop.permute.xlu0 %5266  ;;  %4564 = vmatprep.subr.bf16.mxu0 %v6911_v40  ;;  %4632 = vmatprep.subr.bf16.mxu1 %v6974_v49  ;;  %v5219_v42 = vunpack.i.h.bf16 %v5217_v61  ;;  %v5218_v44 = vunpack.i.l.bf16 %v5217_v61 }
 0x60d   : > { %v5269_v57 = vunpack.i.h.bf16 %v5267_v15  ;;  %v5268_v2 = vunpack.i.l.bf16 %v5267_v15 }
 0x60e   : > { %v3190_v0 = vsel %vm3187_vm1, %v5218_v44, %v5219_v42 }
 0x60f   : > { %4566 = vmatpush1.bf16.msra.mxu0 %v6859_v38  ;;  %4634 = vmatpush1.bf16.msra.mxu1 %v6981_v45  ;;  %v5222_v14 = vpop.permute.xlu1 %5221 }
 0x610   : > { %v5277_v16 = vpop.permute.xlu0 %5276  ;;  %4568 = vmatprep.subr.bf16.mxu0 %v6928_v31  ;;  %4636 = vmatprep.subr.bf16.mxu1 %v6986_v53  ;;  %v5224_v30 = vunpack.i.h.bf16 %v5222_v14 }
 0x611   : > { %v5279_v48 = vunpack.i.h.bf16 %v5277_v16  ;;  %v5278_v55 = vunpack.i.l.bf16 %v5277_v16 }
 0x613   : > { %v3191_v32 = vsel %vm3187_vm1, %v5278_v55, %v5279_v48  ;;  %4570 = vmatpush1.bf16.msra.mxu0 %v6900_v59  ;;  %4638 = vmatpush1.bf16.msra.mxu1 %v6955_v33  ;;  %v5272_v38 = vpop.permute.xlu1 %5271  ;;  %v5223_v59 = vunpack.i.l.bf16 %v5222_v14 }
 0x614   : > { %v7001_v1 = vpack.c.bf16 %v3191_v32, %v3190_v0  ;;  %v5282_v50 = vpop.permute.xlu0 %5281  ;;  %4572 = vmatprep.subr.bf16.mxu0 %v6934_v41  ;;  %v5274_v43 = vunpack.i.h.bf16 %v5272_v38  ;;  %v5273_v17 = vunpack.i.l.bf16 %v5272_v38 }
 0x615   : > { %v5284_v4 = vunpack.i.h.bf16 %v5282_v50  ;;  %v5283_v22 = vunpack.i.l.bf16 %v5282_v50  ;;  %v3214_v8 = vsel %vm3187_vm1, %v5223_v59, %v5224_v30 }
 0x616   : > { %4640 = vmatprep.subr.bf16.mxu1 %v7001_v1  ;;  %v3237_v7 = vsel %vm3236_vm12, %v5273_v17, %v5274_v43 }
 0x617   : > { %4574 = vmatpush1.bf16.msra.mxu0 %v6911_v40  ;;  %4642 = vmatpush1.bf16.msra.mxu1 %v6974_v49  ;;  %v5287_v18 = vpop.permute.xlu1 %5286  ;;  %v3238_v5 = vsel %vm3236_vm12, %v5283_v22, %v5284_v4 }
 0x618   : > { %v5302_v41 = vpop.permute.xlu0 %5301  ;;  %4576 = vmatprep.subr.bf16.mxu0 %v6953_v23  ;;  %4644 = vmatprep.subr.bf16.mxu1 %v7006_v56  ;;  %v3263_v23 = vsel %vm3261_vm11, %v5268_v2, %v5269_v57  ;;  %v5289_v39 = vunpack.i.h.bf16 %v5287_v18  ;;  %v5288_v26 = vunpack.i.l.bf16 %v5287_v18  ;;  %v4653_v9 = vpack.c.bf16 %v3238_v5, %v3237_v7  ;;  %v2946_v7 = vld [vmem:[%s7174_s5 + $0x90] sm:$0xff] }
 0x619   : > { %v5304_v25 = vunpack.i.h.bf16 %v5302_v41  ;;  %v5303_v60 = vunpack.i.l.bf16 %v5302_v41  ;;  %v4651_v20 = vpack.c.bf16 %v3263_v23, %v3262_v27  ;;  %v2941_v27 = vld [vmem:[%s7174_s5 + $0x68] sm:$0xff]  ;;  %v2950_v5 = vld [vmem:[%s7174_s5 + $0xb0] sm:$0xff] }
 0x61a   : > { %v3264_v21 = vsel %vm3261_vm11, %v5288_v26, %v5289_v39  ;;  %v2940_v39 = vld [vmem:[%s7174_s5 + $0x60] sm:$0xff] }
 0x61b   : > { %4578 = vmatpush1.bf16.msra.mxu0 %v6928_v31  ;;  %4646 = vmatpush1.bf16.msra.mxu1 %v6986_v53  ;;  %v5292_v40 = vpop.permute.xlu1 %5291  ;;  %v3215_v62 = vsel %vm3187_vm1, %v5303_v60, %v5304_v25  ;;  %v2931_v60 = vld [vmem:[%s7174_s5 + $0x18] sm:$0xff]  ;;  %v2944_v26 = vld [vmem:[%s7174_s5 + $0x80] sm:$0xff] }
 0x61c   : > { %v5307_v12 = vpop.permute.xlu0 %5306  ;;  %4580 = vmatprep.subr.bf16.mxu0 %v6955_v33  ;;  %v7020_v10 = vpack.c.bf16 %v3215_v62, %v3214_v8  ;;  %v5294_v52 = vunpack.i.h.bf16 %v5292_v40  ;;  %v5293_v63 = vunpack.i.l.bf16 %v5292_v40  ;;  %v2934_v8 = vld [vmem:[%s7174_s5 + $0x30] sm:$0xff] }
 0x61d   : > { %v5309_v46 = vunpack.i.h.bf16 %v5307_v12  ;;  %v5308_v31 = vunpack.i.l.bf16 %v5307_v12 }
 0x61e   : > { %4648 = vmatprep.subr.bf16.mxu1 %v7020_v10  ;;  %v3239_v15 = vsel %vm3236_vm12, %v5293_v63, %v5294_v52  ;;  %v2930_v52 = vld [vmem:[%s7174_s5 + $0x10] sm:$0xff]  ;;  %v2933_v63 = vld [vmem:[%s7174_s5 + $0x28] sm:$0xff] }
 0x61f   : > { %4582 = vmatpush1.bf16.msra.mxu0 %v6971_v58  ;;  %4650 = vmatpush1.bf16.msra.mxu1 %v7001_v1  ;;  %v5297_v54 = vpop.permute.xlu1 %5296  ;;  %v3265_v34 = vsel %vm3261_vm11, %v5308_v31, %v5309_v46  ;;  %v2943_v46 = vld [vmem:[%s7174_s5 + $0x78] sm:$0xff] }
 0x620   : > { %v5312_v13 = vpop.permute.xlu0 %5311  ;;  %4584 = vmatprep.subr.bf16.mxu0 %v6974_v49  ;;  %4652 = vmatprep.subr.bf16.mxu1 %v4651_v20  ;;  %v4655_v61 = vpack.c.bf16 %v3265_v34, %v3264_v21  ;;  %v5299_v19 = vunpack.i.h.bf16 %v5297_v54  ;;  %v5298_v24 = vunpack.i.l.bf16 %v5297_v54  ;;  %v2947_v31 = vld [vmem:[%s7174_s5 + $0x98] sm:$0xff]  ;;  %v2936_v54 = vld [vmem:[%s7174_s5 + $0x40] sm:$0xff] }
 0x621   : > { %v5314_v47 = vunpack.i.h.bf16 %v5312_v13  ;;  %v5313_v28 = vunpack.i.l.bf16 %v5312_v13  ;;  %v2939_v34 = vld [vmem:[%s7174_s5 + $0x58] sm:$0xff]  ;;  %v2942_v13 = vld [vmem:[%s7174_s5 + $0x70] sm:$0xff] }
 0x622   : > { %v3286_v55 = vsel %vm3261_vm11, %v5298_v24, %v5299_v19 }
 0x623   : > { %v3240_v58 = vsel %vm3236_vm12, %v5313_v28, %v5314_v47  ;;  %4586 = vmatpush1.bf16.msra.mxu0 %v6981_v45  ;;  %4654 = vmatpush1.bf16.msra.mxu1 %v4653_v9  ;;  %v5322_v51 = vpop.permute.xlu1 %5321  ;;  %v2945_v9 = vld [vmem:[%s7174_s5 + $0x88] sm:$0xff]  ;;  %v2948_v47 = vld [vmem:[%s7174_s5 + $0xa0] sm:$0xff]  ;;  %v2951_v28 = vld [vmem:[%s7174_s5 + $0xb8] sm:$0xff] }
 0x624   : > { %v4657_v42 = vpack.c.bf16 %v3240_v58, %v3239_v15  ;;  %v5317_v44 = vpop.permute.xlu0 %5316  ;;  %4588 = vmatprep.subr.bf16.mxu0 %v6986_v53  ;;  %4656 = vmatprep.subr.bf16.mxu1 %v4655_v61  ;;  %v5324_v6 = vunpack.i.h.bf16 %v5322_v51  ;;  %v5323_v37 = vunpack.i.l.bf16 %v5322_v51 }
 0x625   : > { %v5319_v14 = vunpack.i.h.bf16 %v5317_v44  ;;  %v5318_v16 = vunpack.i.l.bf16 %v5317_v44 }
 0x626   : > { %v3288_v57 = vsel %vm3261_vm11, %v5323_v37, %v5324_v6 }
 0x627   : > { %4590 = vmatpush1.bf16.msra.mxu0 %v6955_v33  ;;  %4658 = vmatpush1.bf16.msra.mxu1 %v4657_v42  ;;  %v5332_v48 = vpop.permute.xlu1 %5331  ;;  %v3287_v0 = vsel %vm3261_vm11, %v5318_v16, %v5319_v14  ;;  %v2928_v33 = vld [vmem:[%s7174_s5] sm:$0xff] }
 0x628   : > { %v5327_v45 = vpop.permute.xlu0 %5326  ;;  %4592 = vmatprep.subr.bf16.mxu0 %v7001_v1  ;;  %v4659_v32 = vpack.c.bf16 %v3287_v0, %v3286_v55  ;;  %v5334_v50 = vunpack.i.h.bf16 %v5332_v48  ;;  %v5333_v36 = vunpack.i.l.bf16 %v5332_v48 }
 0x629   : > { %v5329_v38 = vunpack.i.h.bf16 %v5327_v45  ;;  %v5328_v11 = vunpack.i.l.bf16 %v5327_v45 }
 0x62a   : > { %4660 = vmatprep.subr.bf16.mxu1 %v4659_v32 }
 0x62b   : > { %4594 = vmatpush1.bf16.msra.mxu0 %v6974_v49  ;;  %4662 = vmatpush1.bf16.msra.mxu1 %v4651_v20  ;;  %v3289_v2 = vsel %vm3261_vm11, %v5328_v11, %v5329_v38  ;;  %v5342_v30 = vpop.permute.xlu1 %5341  ;;  %v2932_v49 = vld [vmem:[%s7174_s5 + $0x20] sm:$0xff]  ;;  %v2949_v20 = vld [vmem:[%s7174_s5 + $0xa8] sm:$0xff] }
 0x62c   : > { %v5337_v59 = vpop.permute.xlu0 %5336  ;;  %4596 = vmatprep.subr.bf16.mxu0 %v7006_v56  ;;  %v4663_v18 = vpack.c.bf16 %v3289_v2, %v3288_v57  ;;  %v5344_v41 = vunpack.i.h.bf16 %v5342_v30  ;;  %v5343_v25 = vunpack.i.l.bf16 %v5342_v30  ;;  %v3310_v56 = vsel %vm7299_vm14, %v5333_v36, %v5334_v50 }
 0x62d   : > { %v5339_v35 = vunpack.i.h.bf16 %v5337_v59  ;;  %v5338_v29 = vunpack.i.l.bf16 %v5337_v59 }
 0x62e   : > { %3408 = vmatmul.mubr.f32.vlgmr.msra.gmra.mrb[36].mxu0 %v2928_v33  ;;  %4664 = vmatprep.subr.bf16.mxu1 %v4663_v18  ;;  %v3312_v62 = vsel %vm7301_vm13, %v5343_v25, %v5344_v41 }
 0x62f   : > { %4598 = vmatpush1.bf16.msra.mxu0 %v6986_v53  ;;  %4666 = vmatpush1.bf16.msra.mxu1 %v4655_v61  ;;  %v3311_v43 = vsel %vm7300_vm15, %v5338_v29, %v5339_v35  ;;  %v2935_v53 = vld [vmem:[%s7174_s5 + $0x38] sm:$0xff] }
 0x630   : > { %v5347_v17 = vpop.permute.xlu0 %5346  ;;  %4600 = vmatprep.subr.bf16.mxu0 %v7020_v10  ;;  %3413 = vmatprep.mubr.f32.mxu0 %v2932_v49  ;;  %v4667_v4 = vpack.c.bf16 %v3311_v43, %v3310_v56  ;;  %v2938_v10 = vld [vmem:[%s7174_s5 + $0x50] sm:$0xff] }
 0x631   : > { %v5349_v22 = vunpack.i.h.bf16 %v5347_v17  ;;  %v5348_v40 = vunpack.i.l.bf16 %v5347_v17 }
 0x632   : > { %3414 = vmatmul.mubr.f32.gmra.mrb[38].mxu0 %v2931_v60  ;;  %3634 = vmatmul.mubr.f32.vlgmr.msra.gmra.mrb[36].mxu1 %v2928_v33 }
 0x633   : > { %4668 = vmatprep.subr.bf16.mxu1 %v4667_v4  ;;  %4602 = vmatpush1.bf16.msra.mxu0 %v7001_v1  ;;  %v3313_v23 = vsel %vm7302_vm0, %v5348_v40, %v5349_v22  ;;  %v2937_v1 = vld [vmem:[%s7174_s5 + $0x48] sm:$0xff] }
 0x634   : > { %4670 = vmatpush1.bf16.msra.mxu1 %v4659_v32  ;;  %3419 = vmatprep.mubr.f32.mxu0 %v2935_v53  ;;  %v4671_v12 = vpack.c.bf16 %v3313_v23, %v3312_v62 }
 0x635   : > { %3639 = vmatprep.mubr.f32.mxu1 %v2932_v49 }
 0x636   : > { %3420 = vmatmul.mubr.f32.gmra.mrb[40].mxu0 %v2934_v8  ;;  %3640 = vmatmul.mubr.f32.gmra.mrb[38].mxu1 %v2931_v60 }
 0x637   : > { %4672 = vmatprep.subr.bf16.mxu1 %v4671_v12  ;;  %3425 = vmatprep.mubr.f32.mxu0 %v2938_v10 }
 0x638   : > { %4674 = vmatpush1.bf16.msra.mxu1 %v4663_v18  ;;  %3645 = vmatprep.mubr.f32.mxu1 %v2935_v53 }
 0x63a   : > { %3426 = vmatmul.mubr.f32.gmra.mrb[42].mxu0 %v2937_v1  ;;  %3646 = vmatmul.mubr.f32.gmra.mrb[40].mxu1 %v2934_v8 }
 0x63b   : > { %3431 = vmatprep.mubr.f32.mxu0 %v2941_v27  ;;  %3651 = vmatprep.mubr.f32.mxu1 %v2938_v10 }
 0x63c   : > { %v3822_v14 = vpop.permute.xlu1 %3821 }
 0x63e   : > { %3432 = vmatmul.mubr.f32.gmra.mrb[44].mxu0 %v2940_v39  ;;  %3652 = vmatmul.mubr.f32.gmra.mrb[42].mxu1 %v2937_v1 }
 0x63f   : > { %3437 = vmatprep.mubr.f32.mxu0 %v2944_v26  ;;  %3657 = vmatprep.mubr.f32.mxu1 %v2941_v27 }
 0x640   : > { %v3832_v18 = vpop.permute.xlu1 %3831 }
 0x641   : > { %v3827_v32 = vpop.permute.xlu0 %3826 }
 0x642   : > { %3438 = vmatmul.mubr.f32.gmra.mrb[46].mxu0 %v2943_v46  ;;  %3658 = vmatmul.mubr.f32.gmra.mrb[44].mxu1 %v2940_v39 }
 0x643   : > { %3443 = vmatprep.mubr.f32.mxu0 %v2947_v31  ;;  %3663 = vmatprep.mubr.f32.mxu1 %v2944_v26 }
 0x644   : > { %v3842_v27 = vpop.permute.xlu1 %3841 }
 0x645   : > { %v3837_v4 = vpop.permute.xlu0 %3836 }
 0x646   : > { %3444 = vmatmul.mubr.f32.gmra.mrb[48].mxu0 %v2946_v7  ;;  %3664 = vmatmul.mubr.f32.gmra.mrb[46].mxu1 %v2943_v46 }
 0x647   : > { %3449 = vmatprep.mubr.f32.mxu0 %v2950_v5  ;;  %3669 = vmatprep.mubr.f32.mxu1 %v2947_v31 }
 0x64a   : > { %3450 = vmatmul.mubr.f32.gmra.mrb[50].mxu0 %v2949_v20  ;;  %3670 = vmatmul.mubr.f32.gmra.mrb[48].mxu1 %v2946_v7 }
 0x64b   : > { %3520 = vmatprep.mubr.f32.mxu0 %v7245_v3  ;;  %3675 = vmatprep.mubr.f32.mxu1 %v2950_v5 }
 0x64e   : > { %4070 = vmatmul.mubr.msk.f32.vlgmr.msra.gmra.mrb[36].mxu0 %vm3318_vm2, %v2930_v52  ;;  %3676 = vmatmul.mubr.f32.gmra.mrb[50].mxu1 %v2949_v20 }
 0x64f   : > { %3526 = vmatprep.mubr.f32.mxu0 %v7245_v3  ;;  %3746 = vmatprep.mubr.f32.mxu1 %v7245_v3 }
 0x652   : > { %4071 = vmatmul.mubr.msk.f32.gmra.mrb[38].mxu0 %vm3318_vm2, %v2933_v63  ;;  %4078 = vmatmul.mubr.msk.f32.vlgmr.msra.gmra.mrb[36].mxu1 %vm3318_vm2, %v2930_v52 }
 0x653   : > { %3532 = vmatprep.mubr.f32.mxu0 %v7245_v3  ;;  %3752 = vmatprep.mubr.f32.mxu1 %v7245_v3 }
 0x656   : > { %4072 = vmatmul.mubr.msk.f32.gmra.mrb[40].mxu0 %vm3318_vm2, %v2936_v54  ;;  %4079 = vmatmul.mubr.msk.f32.gmra.mrb[38].mxu1 %vm3318_vm2, %v2933_v63 }
 0x657   : > { %3538 = vmatprep.mubr.f32.mxu0 %v7245_v3  ;;  %3758 = vmatprep.mubr.f32.mxu1 %v7245_v3 }
 0x65a   : > { %4073 = vmatmul.mubr.msk.f32.gmra.mrb[42].mxu0 %vm3318_vm2, %v2939_v34  ;;  %4080 = vmatmul.mubr.msk.f32.gmra.mrb[40].mxu1 %vm3318_vm2, %v2936_v54  ;;  %v3847_v54 = vpop.permute.xlu0 %3846 }
 0x65b   : > { %3544 = vmatprep.mubr.f32.mxu0 %v7245_v3  ;;  %3764 = vmatprep.mubr.f32.mxu1 %v7245_v3 }
 0x65e   : > { %4074 = vmatmul.mubr.msk.f32.gmra.mrb[44].mxu0 %vm3318_vm2, %v2942_v13  ;;  %4081 = vmatmul.mubr.msk.f32.gmra.mrb[42].mxu1 %vm3318_vm2, %v2939_v34 }
 0x65f   : > { %3550 = vmatprep.mubr.f32.mxu0 %v7245_v3  ;;  %3770 = vmatprep.mubr.f32.mxu1 %v7245_v3 }
 0x662   : > { %4075 = vmatmul.mubr.msk.f32.gmra.mrb[46].mxu0 %vm3318_vm2, %v2945_v9  ;;  %4082 = vmatmul.mubr.msk.f32.gmra.mrb[44].mxu1 %vm3318_vm2, %v2942_v13 }
 0x663   : > { %3556 = vmatprep.mubr.f32.mxu0 %v7245_v3  ;;  %3776 = vmatprep.mubr.f32.mxu1 %v7245_v3 }
 0x666   : > { %4076 = vmatmul.mubr.msk.f32.gmra.mrb[48].mxu0 %vm3318_vm2, %v2948_v47  ;;  %4083 = vmatmul.mubr.msk.f32.gmra.mrb[46].mxu1 %vm3318_vm2, %v2945_v9 }
 0x667   : > { %3562 = vmatprep.mubr.f32.mxu0 %v7245_v3  ;;  %3782 = vmatprep.mubr.f32.mxu1 %v7245_v3 }
 0x66a   : > { %4077 = vmatmul.mubr.msk.f32.gmra.mrb[50].mxu0 %vm3318_vm2, %v2951_v28  ;;  %4084 = vmatmul.mubr.msk.f32.gmra.mrb[48].mxu1 %vm3318_vm2, %v2948_v47 }
 0x66b   : > { %3788 = vmatprep.mubr.f32.mxu1 %v7245_v3 }
 0x66e   : > { %4085 = vmatmul.mubr.msk.f32.gmra.mrb[50].mxu1 %vm3318_vm2, %v2951_v28 }
 0x721   : > { %v3522_v21 = vpop.f32.mrb[36].mxu0 }
 0x722   : > { %v3524_v61 = vpop.f32.mrb[37].mxu0 }
 0x723   : > { %v3795_v15 = vmax.f32 %v3522_v21, %v3524_v61 }
 0x725   : > { %v3528_v19 = vpop.f32.mrb[38].mxu0  ;;  %v3748_v24 = vpop.f32.mrb[36].mxu1 }
 0x726   : > { %v3530_v58 = vpop.f32.mrb[39].mxu0  ;;  %v3750_v51 = vpop.f32.mrb[37].mxu1 }
 0x727   : > { %v3796_v42 = vmax.f32 %v3528_v19, %v3530_v58  ;;  %v3803_v44 = vmax.f32 %v3748_v24, %v3750_v51 }
 0x729   : > { %v3811_v16 = vmax.f32 %v3795_v15, %v3803_v44  ;;  %v3534_v6 = vpop.f32.mrb[40].mxu0  ;;  %v3754_v37 = vpop.f32.mrb[38].mxu1 }
 0x72a   : > { %v3536_v48 = vpop.f32.mrb[41].mxu0  ;;  %v3756_v55 = vpop.f32.mrb[39].mxu1 }
 0x72b   : > { %v3859_v0 = vadd.f32 %v3822_v14, %v3811_v16  ;;  %v3797_v3 = vmax.f32 %v3534_v6, %v3536_v48  ;;  %v3804_v45 = vmax.f32 %v3754_v37, %v3756_v55  ;;  %v3857_v48 = vpop.permute.xlu0 %3856 }
 0x72d   : > { %v3867_v38 = vmax.f32 %v3859_v0, 0.0  ;;  %v3812_v11 = vmax.f32 %v3796_v42, %v3804_v45  ;;  %v3540_v50 = vpop.f32.mrb[42].mxu0  ;;  %v3760_v36 = vpop.f32.mrb[40].mxu1 }
 0x72e   : > { %v3542_v33 = vpop.f32.mrb[43].mxu0  ;;  %v3762_v57 = vpop.f32.mrb[41].mxu1 }
 0x72f   : > { %3875 = vst [vmem:[%s7156_s21] sm:$0xff] %v3867_v38  ;;  %v3860_v2 = vadd.f32 %v3827_v32, %v3812_v11  ;;  %v3798_v30 = vmax.f32 %v3540_v50, %v3542_v33  ;;  %v3805_v59 = vmax.f32 %v3760_v36, %v3762_v57  ;;  %v3852_v42 = vpop.permute.xlu1 %3851 }
 0x731   : > { %v3868_v35 = vmax.f32 %v3860_v2, 0.0  ;;  %v3813_v29 = vmax.f32 %v3797_v3, %v3805_v59  ;;  %v3546_v49 = vpop.f32.mrb[44].mxu0  ;;  %v3766_v41 = vpop.f32.mrb[42].mxu1 }
 0x732   : > { %v3548_v25 = vpop.f32.mrb[45].mxu0  ;;  %v3768_v60 = vpop.f32.mrb[43].mxu1 }
 0x733   : > { %3876 = vst [vmem:[%s7156_s21 + $0x8] sm:$0xff] %v3868_v35  ;;  %v3861_v56 = vadd.f32 %v3832_v18, %v3813_v29  ;;  %v3799_v43 = vmax.f32 %v3546_v49, %v3548_v25  ;;  %v3806_v17 = vmax.f32 %v3766_v41, %v3768_v60 }
 0x735   : > { %v3869_v22 = vmax.f32 %v3861_v56, 0.0  ;;  %v3814_v40 = vmax.f32 %v3798_v30, %v3806_v17  ;;  %v3552_v53 = vpop.f32.mrb[46].mxu0  ;;  %v3772_v8 = vpop.f32.mrb[44].mxu1 }
 0x736   : > { %v3554_v62 = vpop.f32.mrb[47].mxu0  ;;  %v3774_v23 = vpop.f32.mrb[45].mxu1 }
 0x737   : > { %3877 = vst [vmem:[%s7156_s21 + $0x10] sm:$0xff] %v3869_v22  ;;  %v3862_v12 = vadd.f32 %v3837_v4, %v3814_v40  ;;  %v3800_v10 = vmax.f32 %v3552_v53, %v3554_v62  ;;  %v3807_v1 = vmax.f32 %v3772_v8, %v3774_v23 }
 0x739   : > { %v3870_v39 = vmax.f32 %v3862_v12, 0.0  ;;  %v3815_v26 = vmax.f32 %v3799_v43, %v3807_v1  ;;  %v3558_v46 = vpop.f32.mrb[48].mxu0  ;;  %v3778_v31 = vpop.f32.mrb[46].mxu1 }
 0x73a   : > { %v3560_v7 = vpop.f32.mrb[49].mxu0  ;;  %v3780_v5 = vpop.f32.mrb[47].mxu1 }
 0x73b   : > { %3878 = vst [vmem:[%s7156_s21 + $0x18] sm:$0xff] %v3870_v39  ;;  %v3863_v20 = vadd.f32 %v3842_v27, %v3815_v26  ;;  %v3801_v52 = vmax.f32 %v3558_v46, %v3560_v7  ;;  %v3808_v63 = vmax.f32 %v3778_v31, %v3780_v5 }
 0x73d   : > { %v3871_v34 = vmax.f32 %v3863_v20, 0.0  ;;  %v3816_v13 = vmax.f32 %v3800_v10, %v3808_v63  ;;  %v3564_v9 = vpop.f32.mrb[50].mxu0  ;;  %v3784_v47 = vpop.f32.mrb[48].mxu1 }
 0x73e   : > { %v3566_v28 = vpop.f32.mrb[51].mxu0  ;;  %v3786_v21 = vpop.f32.mrb[49].mxu1 }
 0x73f   : > { %3879 = vst [vmem:[%s7156_s21 + $0x20] sm:$0xff] %v3871_v34  ;;  %v3864_v61 = vadd.f32 %v3847_v54, %v3816_v13  ;;  %v3802_v15 = vmax.f32 %v3564_v9, %v3566_v28  ;;  %v3809_v19 = vmax.f32 %v3784_v47, %v3786_v21 }
 0x741   : > { %v3872_v24 = vmax.f32 %v3864_v61, 0.0  ;;  %v3817_v58 = vmax.f32 %v3801_v52, %v3809_v19  ;;  %v3790_v51 = vpop.f32.mrb[50].mxu1 }
 0x742   : > { %v3792_v44 = vpop.f32.mrb[51].mxu1 }
 0x743   : > { %3880 = vst [vmem:[%s7156_s21 + $0x28] sm:$0xff] %v3872_v24  ;;  %v3865_v14 = vadd.f32 %v3852_v42, %v3817_v58  ;;  %v3810_v16 = vmax.f32 %v3790_v51, %v3792_v44 }
 0x745   : > { %v3873_v6 = vmax.f32 %v3865_v14, 0.0  ;;  %v3818_v37 = vmax.f32 %v3802_v15, %v3810_v16 }
 0x747   : > { %3881 = vst [vmem:[%s7156_s21 + $0x30] sm:$0xff] %v3873_v6  ;;  %v3866_v55 = vadd.f32 %v3857_v48, %v3818_v37 }
 0x749   : > { %v3874_v0 = vmax.f32 %v3866_v55, 0.0 }
 0x74b   : > { %3882 = vst [vmem:[%s7156_s21 + $0x38] sm:$0xff] %v3874_v0 }
 0x74c PF: > { %s23_s17 = sadd.s32 1, %s5388_s17  }
 0x74d   : > { %p20_p3 = scmp.ge.s32.totalorder %s23_s17, 4  }
 0x74f   :  { %22 = sbr.rel (!%p20_p3) target bundleno = 1 (0x1), region = 115 }
 0x756   :  { %3936 = vsyncpa [#allocation3], 1 }
 0x757   :  { %3938 = vsyncpa [#allocation3 + $0x1], 1 }

</bundles_post_ra>
